<compile_context>
chip_gen: v7x
topology: tpu7x:2x2x1
jax: 0.10.0
libtpu: 0.0.40
codegen_flags: <defaults>
</compile_context>

<pallas_src>
import math

import jax
import jax.numpy as jnp
from jax.experimental import pallas as pl
from jax.experimental.pallas import tpu as pltpu

IN_DIM = 1280
HID_DIM = 1024
OUT_DIM = 512


def _round_up(x, m):
    return (x + m - 1) // m * m


def _mlp_kernel(x_ref, w1_ref, b1_ref, w2_ref, b2_ref, o_ref):
    # Cast the activation tile to bf16 in-kernel (VPU op, hidden under MXU).
    x = x_ref[...].astype(jnp.bfloat16)
    # Layer 1: bf16 operands on the MXU, f32 accumulation; bias + ReLU in f32.
    h = jnp.dot(x, w1_ref[...], preferred_element_type=jnp.float32)
    h = jnp.maximum(h + b1_ref[...], 0.0)
    # Layer 2: cast the f32 hidden activations to bf16 only for the matmul.
    y = jnp.dot(h.astype(jnp.bfloat16), w2_ref[...],
                preferred_element_type=jnp.float32)
    y = y + b2_ref[...]
    # Numerically stable sigmoid: exp and the approximate reciprocal both run
    # on the EUP slot (idle under the MXU), so the epilogue is near-free.
    z = jnp.exp(-jnp.abs(y))                    # z in (0, 1], never overflows
    inv = pl.reciprocal(1.0 + z, approx=True)   # = sigmoid(|y|)
    sig = jnp.where(y >= 0.0, inv, z * inv)     # = sigmoid(y)
    o_ref[...] = sig.astype(o_ref.dtype)


def _pick_batch_tile(B):
    """Tile policy: 16-row granularity, >=2 grid steps for mid-size batches
    (v7x megacore), large tiles for big batches (v6e step-overhead), and
    waste-aware padding for awkward B."""
    B16 = _round_up(B, 16)
    if B16 <= 32:
        return B16                                   # tiny batch: one small tile
    if B16 <= 512:
        # Two grid steps so the "parallel" batch axis shards across v7x's two
        # TensorCores; on v5e/v6e the extra ~0.35us step is negligible.
        return _round_up(pl.cdiv(B16, 2), 16)
    # Large batch: biggest tile whose padding waste stays small.
    for t in (512, 256, 128, 64, 32, 16):
        if _round_up(B, t) - B <= max(32, B // 8):
            return t
    return 16


def prepare_params(w1, b1, w2, b2):
    """One-time parameter prep (hoisted out of the per-call path):
    bf16 weights stored as (in, out), f32 biases reshaped to (1, out)."""
    return (w1.astype(jnp.bfloat16),
            b1.reshape(1, HID_DIM).astype(jnp.float32),
            w2.astype(jnp.bfloat16),
            b2.reshape(1, OUT_DIM).astype(jnp.float32))


def extra_layers_forward(x, prepared_params, *, batch_tile=None, out_dtype=None):
    """x: (B, 1280) f32.  prepared_params: output of prepare_params()."""
    w1_bf, b1_2d, w2_bf, b2_2d = prepared_params
    B = x.shape[0]
    out_dtype = x.dtype if out_dtype is None else out_dtype

    if batch_tile is None:
        batch_tile = _pick_batch_tile(B)
    batch_tile = _round_up(batch_tile, 16)     # bf16 packed-sublane quantum

    # Pad ragged batches to a tile multiple (padded rows are sliced off).
    B_pad = _round_up(B, batch_tile)
    if B_pad != B:
        x = jnp.pad(x, ((0, B_pad - B), (0, 0)))

    grid = (B_pad // batch_tile,)
    out = pl.pallas_call(
        _mlp_kernel,
        out_shape=jax.ShapeDtypeStruct((B_pad, OUT_DIM), out_dtype),
        grid_spec=pltpu.PrefetchScalarGridSpec(
            num_scalar_prefetch=0,
            grid=grid,
            in_specs=[
                pl.BlockSpec((batch_tile, IN_DIM), lambda i: (i, 0)),   # x tile (f32)
                # Weight/bias index maps are constant across the grid, so the
                # pipeline skips re-DMAing them per step (resident in VMEM).
                pl.BlockSpec((IN_DIM, HID_DIM), lambda i: (0, 0)),      # W1 (bf16)
                pl.BlockSpec((1, HID_DIM), lambda i: (0, 0)),           # b1 (f32)
                pl.BlockSpec((HID_DIM, OUT_DIM), lambda i: (0, 0)),     # W2 (bf16)
                pl.BlockSpec((1, OUT_DIM), lambda i: (0, 0)),           # b2 (f32)
            ],
            out_specs=pl.BlockSpec((batch_tile, OUT_DIM), lambda i: (i, 0)),
        ),
        compiler_params=pltpu.CompilerParams(
            dimension_semantics=("parallel",),
            # Working set at batch_tile=512: bf16 weights (3.5 MiB) + f32 x
            # tiles (2.5 MiB x2) + f32 out tiles (1 MiB x2) + intermediates
            # ~= 20 MiB double-buffered; 48 MiB leaves margin and still fits
            # under v7x's 64 MiB physical VMEM per TensorCore.
            vmem_limit_bytes=48 << 20,
        ),
    )(x, w1_bf, b1_2d, w2_bf, b2_2d)

    return out[:B] if B_pad != B else out


def init_params(key):
    """Deterministic init mirroring PyTorch Linear default: U(-1/sqrt(fan_in), 1/sqrt(fan_in))."""
    k1, k2, k3, k4 = jax.random.split(key, 4)
    bound1 = 1.0 / math.sqrt(IN_DIM)
    bound2 = 1.0 / math.sqrt(HID_DIM)
    # Stored as (in, out) — transpose of PyTorch's (out, in) layout.
    w1 = jax.random.uniform(k1, (IN_DIM, HID_DIM), jnp.float32, -bound1, bound1)
    b1 = jax.random.uniform(k2, (HID_DIM,), jnp.float32, -bound1, bound1)
    w2 = jax.random.uniform(k3, (HID_DIM, OUT_DIM), jnp.float32, -bound2, bound2)
    b2 = jax.random.uniform(k4, (OUT_DIM,), jnp.float32, -bound2, bound2)
    return w1, b1, w2, b2


def reference_forward_f32(x, w1, b1, w2, b2):
    h = jnp.maximum(x @ w1 + b1, 0.0)
    return jax.nn.sigmoid(h @ w2 + b2)


def reference_forward_bf16(x, w1, b1, w2, b2):
    # Matches the kernel's bf16-operand / f32-accumulate arithmetic.
    h = jnp.dot(x.astype(jnp.bfloat16), w1.astype(jnp.bfloat16),
                preferred_element_type=jnp.float32)
    h = jnp.maximum(h + b1, 0.0)
    y = jnp.dot(h.astype(jnp.bfloat16), w2.astype(jnp.bfloat16),
                preferred_element_type=jnp.float32)
    return jax.nn.sigmoid(y + b2)


if __name__ == "__main__":
    key = jax.random.PRNGKey(0)
    kp, kx = jax.random.split(key)
    w1, b1, w2, b2 = init_params(kp)
    params = prepare_params(w1, b1, w2, b2)   # one-time, outside the hot path

    # Case 1: small ragged batch -> exercises padding + default tile selection.
    B1 = 4
    x1 = jax.random.normal(kx, (B1, IN_DIM), jnp.float32)
    out1 = jax.block_until_ready(extra_layers_forward(x1, params))
    assert out1.shape == (B1, OUT_DIM)
    assert jnp.allclose(out1, reference_forward_bf16(x1, w1, b1, w2, b2),
                        atol=5e-3, rtol=5e-3), "mismatch vs bf16 reference"
    assert jnp.allclose(out1, reference_forward_f32(x1, w1, b1, w2, b2),
                        atol=2e-2, rtol=2e-2), "mismatch vs f32 reference"

    # Case 2: mid-size batch with the default policy -> multi-step grid
    # (2 steps of 32 rows), exercising the index maps / megacore path.
    B2 = 48
    x2 = jax.random.normal(jax.random.PRNGKey(1), (B2, IN_DIM), jnp.float32)
    out2 = jax.block_until_ready(extra_layers_forward(x2, params))
    assert out2.shape == (B2, OUT_DIM)
    assert jnp.allclose(out2, reference_forward_bf16(x2, w1, b1, w2, b2),
                        atol=5e-3, rtol=5e-3), "mismatch vs bf16 reference (grid>1)"

    # Case 3: explicit tile override still works.
    out3 = jax.block_until_ready(
        extra_layers_forward(x2, params, batch_tile=16))
    assert out3.shape == (B2, OUT_DIM)
    assert jnp.allclose(out3, reference_forward_bf16(x2, w1, b1, w2, b2),
                        atol=5e-3, rtol=5e-3), "mismatch vs bf16 reference (tile=16)"

    print("KERNEL_OK")
</pallas_src>

<mosaic_0001>
module attributes {stable_mosaic.version = 11 : i64} {
  func.func @_mlp_kernel(%arg0: i32, %arg1: memref<16x1280xf32, #tpu.memory_space<vmem>>, %arg2: memref<1280x1024xbf16, #tpu.memory_space<vmem>>, %arg3: memref<1x1024xf32, #tpu.memory_space<vmem>>, %arg4: memref<1024x512xbf16, #tpu.memory_space<vmem>>, %arg5: memref<1x512xf32, #tpu.memory_space<vmem>>, %arg6: memref<16x512xf32, #tpu.memory_space<vmem>>) attributes {dimension_semantics = [#tpu.dimension_semantics<parallel>], iteration_bounds = array<i64: 1>, scalar_prefetch = 0 : i64, scratch_operands = 0 : i64, tpu.core_type = #tpu.core_type<tc>, window_params = [{transform_indices = @transform_0, window_bounds = array<i64: 16, 1280>}, {pipeline_mode = #tpu.pipeline_mode<synchronous>, transform_indices = @transform_1, window_bounds = array<i64: 1280, 1024>}, {pipeline_mode = #tpu.pipeline_mode<synchronous>, transform_indices = @transform_2, window_bounds = array<i64: 1, 1024>}, {pipeline_mode = #tpu.pipeline_mode<synchronous>, transform_indices = @transform_3, window_bounds = array<i64: 1024, 512>}, {pipeline_mode = #tpu.pipeline_mode<synchronous>, transform_indices = @transform_4, window_bounds = array<i64: 1, 512>}, {transform_indices = @transform_5, window_bounds = array<i64: 16, 512>}]} {
    %c0 = arith.constant 0 : index
    %c0_0 = arith.constant 0 : index
    %0 = vector.load %arg1[%c0, %c0_0] : memref<16x1280xf32, #tpu.memory_space<vmem>>, vector<16x1280xf32>
    %1 = arith.truncf %0 : vector<16x1280xf32> to vector<16x1280xbf16>
    %c0_1 = arith.constant 0 : index
    %c0_2 = arith.constant 0 : index
    %2 = vector.load %arg2[%c0_1, %c0_2] : memref<1280x1024xbf16, #tpu.memory_space<vmem>>, vector<1280x1024xbf16>
    %cst = arith.constant dense<0.000000e+00> : vector<16x1024xf32>
    %3 = tpu.matmul %1, %2, %cst {dimension_numbers = #tpu.dot_dimension_numbers<[1], [0], [0], [1], [0, 0, 1, 1], [], []>} : vector<16x1280xbf16>, vector<1280x1024xbf16>, vector<16x1024xf32> -> vector<16x1024xf32>
    %c0_3 = arith.constant 0 : index
    %c0_4 = arith.constant 0 : index
    %4 = vector.load %arg3[%c0_3, %c0_4] : memref<1x1024xf32, #tpu.memory_space<vmem>>, vector<1x1024xf32>
    %5 = vector.broadcast %4 : vector<1x1024xf32> to vector<16x1024xf32>
    %6 = arith.addf %3, %5 : vector<16x1024xf32>
    %cst_5 = arith.constant 0.000000e+00 : f32
    %7 = vector.broadcast %cst_5 : f32 to vector<16x1024xf32>
    %8 = arith.maximumf %6, %7 : vector<16x1024xf32>
    %9 = arith.truncf %8 : vector<16x1024xf32> to vector<16x1024xbf16>
    %c0_6 = arith.constant 0 : index
    %c0_7 = arith.constant 0 : index
    %10 = vector.load %arg4[%c0_6, %c0_7] : memref<1024x512xbf16, #tpu.memory_space<vmem>>, vector<1024x512xbf16>
    %cst_8 = arith.constant dense<0.000000e+00> : vector<16x512xf32>
    %11 = tpu.matmul %9, %10, %cst_8 {dimension_numbers = #tpu.dot_dimension_numbers<[1], [0], [0], [1], [0, 0, 1, 1], [], []>} : vector<16x1024xbf16>, vector<1024x512xbf16>, vector<16x512xf32> -> vector<16x512xf32>
    %c0_9 = arith.constant 0 : index
    %c0_10 = arith.constant 0 : index
    %12 = vector.load %arg5[%c0_9, %c0_10] : memref<1x512xf32, #tpu.memory_space<vmem>>, vector<1x512xf32>
    %13 = vector.broadcast %12 : vector<1x512xf32> to vector<16x512xf32>
    %14 = arith.addf %11, %13 : vector<16x512xf32>
    %15 = math.absf %14 : vector<16x512xf32>
    %cst_11 = arith.constant 0.000000e+00 : f32
    %16 = vector.broadcast %cst_11 : f32 to vector<16x512xf32>
    %17 = arith.subf %16, %15 : vector<16x512xf32>
    %18 = math.exp %17 : vector<16x512xf32>
    %cst_12 = arith.constant 1.000000e+00 : f32
    %19 = vector.broadcast %cst_12 : f32 to vector<16x512xf32>
    %20 = arith.addf %19, %18 : vector<16x512xf32>
    %21 = tpu.reciprocal %20 {approx = true} : vector<16x512xf32> -> vector<16x512xf32>
    %cst_13 = arith.constant 0.000000e+00 : f32
    %22 = vector.broadcast %cst_13 : f32 to vector<16x512xf32>
    %23 = arith.cmpf oge, %14, %22 : vector<16x512xf32>
    %24 = arith.mulf %18, %21 : vector<16x512xf32>
    %25 = arith.select %23, %21, %24 : vector<16x512xi1>, vector<16x512xf32>
    %c0_14 = arith.constant 0 : index
    %c0_15 = arith.constant 0 : index
    %26 = vector.load %arg6[%c0_14, %c0_15] : memref<16x512xf32, #tpu.memory_space<vmem>>, vector<16x512xf32>
    tpu.vector_store %arg6[%c0_14, %c0_15], %25 {strides = array<i32>} : memref<16x512xf32, #tpu.memory_space<vmem>>, vector<16x512xf32>,
    return
  }
  func.func @transform_0(%arg0: i32) -> (i32, i32) {
    %c0_i32 = arith.constant 0 : i32
    %c0_i32_0 = arith.constant 0 : i32
    return %arg0, %c0_i32 : i32, i32
  }
  func.func @transform_1(%arg0: i32) -> (i32, i32) {
    %c0_i32 = arith.constant 0 : i32
    %c0_i32_0 = arith.constant 0 : i32
    %c0_i32_1 = arith.constant 0 : i32
    return %c0_i32, %c0_i32_0 : i32, i32
  }
  func.func @transform_2(%arg0: i32) -> (i32, i32) {
    %c0_i32 = arith.constant 0 : i32
    %c0_i32_0 = arith.constant 0 : i32
    %c0_i32_1 = arith.constant 0 : i32
    return %c0_i32, %c0_i32_0 : i32, i32
  }
  func.func @transform_3(%arg0: i32) -> (i32, i32) {
    %c0_i32 = arith.constant 0 : i32
    %c0_i32_0 = arith.constant 0 : i32
    %c0_i32_1 = arith.constant 0 : i32
    return %c0_i32, %c0_i32_0 : i32, i32
  }
  func.func @transform_4(%arg0: i32) -> (i32, i32) {
    %c0_i32 = arith.constant 0 : i32
    %c0_i32_0 = arith.constant 0 : i32
    %c0_i32_1 = arith.constant 0 : i32
    return %c0_i32, %c0_i32_0 : i32, i32
  }
  func.func @transform_5(%arg0: i32) -> (i32, i32) {
    %c0_i32 = arith.constant 0 : i32
    %c0_i32_0 = arith.constant 0 : i32
    return %arg0, %c0_i32 : i32, i32
  }
}

</mosaic_0001>

<bundles_post_ra>
// kernel: tpu_custom_call.1
= control target key start
LH: loop header
LB: loop body
LE: loop exit
PB: predicated region body
PF: predicated region fallthrough
CT: control target
= control target key end

     0   :  { %10 = vsyncpa [#allocation3], 0  ;;  %s8717_s0 = inlined_call_operand.hbm [shape: f32[16,1280], index: 0, kind: input, shape index: {}]   ;;  %s8718_s1 = inlined_call_operand.hbm [shape: bf16[1280,1024], index: 1, kind: input, shape index: {}]   ;;  %s8719_s2 = inlined_call_operand.hbm [shape: f32[1,1024], index: 2, kind: input, shape index: {}]   ;;  %s8720_s3 = inlined_call_operand.hbm [shape: bf16[1024,512], index: 3, kind: input, shape index: {}]   ;;  %s8721_s4 = inlined_call_operand.hbm [shape: f32[1,512], index: 4, kind: input, shape index: {}]   ;;  %s8722_s5 = inlined_call_operand.hbm [shape: f32[16,512], index: 5, kind: output, shape index: {}]  }
   0x1   :  { %11 = vsyncpa [#allocation6], 0 }
   0x2   :  { %12 = vsyncpa [#allocation9], 0 }
   0x3   :  { %13 = vsyncpa [#allocation4], 0  ;;  %s8459_s18 = smov [#allocation5]   ;;  %s8319_s22 = scalar_lea.hbm %s8718_s1, 81920 }
   0x4   :  { %s31_s19 = sshll.u32 %s8459_s18, 4  ;;  %p8320_p0 = scmp.ne.s32.totalorder %s8718_s1, %s8319_s22  ;;  %s32_s19 = int_to_ptr.vmem [resolvable:$true] %s31_s19 }
   0x5   :  { %p8323_p1 = scmp.lt.u32.totalorder %s8319_s22, %s8718_s1 }
   0x7   :  { %p8325_p2 = pnand %p8323_p1, %p8320_p0 }
   0x9   :  { %8328 = shalt.err (!%p8325_p2)
}
   0xa   :  { %s8329_s27 = scalar_lea.vmem %s32_s19, 81920  ;;  %p8334_p4 = scmp.lt.s32.totalorder %s32_s19, %s32_s19 }
   0xb   :  { %p8330_p3 = scmp.ne.s32.totalorder %s32_s19, %s8329_s27  ;;  %p8335_p5 = scmp.lt.s32.totalorder %s8329_s27, %s8329_s27 }
   0xd   :  { %p8336_p6 = por %p8335_p5, %p8334_p4 }
   0xf   :  { %p8337_p7 = pnand %p8336_p6, %p8330_p3 }
  0x11   :  { %8340 = shalt.err (!%p8337_p7)
}
  0x12   :  { %s8460_s28 = smov 512   ;;  %s8461_s29 = smov 32  }
  0x13   :  { %37 = dma.hbm_to_vmem [thread:$0]  %s8718_s1, 81920, %s32_s19, [#allocation6], %s8460_s28, %s8460_s28, %s8461_s29  }
  0x14   :  { %s8462_s7 = smov [#allocation8]   ;;  %s8341_s11 = scalar_lea.hbm %s8720_s3, 32768 }
  0x15   :  { %s53_s8 = sshll.u32 %s8462_s7, 4  ;;  %p8342_p8 = scmp.ne.s32.totalorder %s8720_s3, %s8341_s11  ;;  %s54_s8 = int_to_ptr.vmem [resolvable:$true] %s53_s8 }
  0x16   :  { %p8345_p9 = scmp.lt.u32.totalorder %s8341_s11, %s8720_s3 }
  0x18   :  { %p8347_p10 = pnand %p8345_p9, %p8342_p8 }
  0x1a   :  { %8350 = shalt.err (!%p8347_p10)
}
  0x1b   :  { %s8351_s16 = scalar_lea.vmem %s54_s8, 32768  ;;  %p8356_p12 = scmp.lt.s32.totalorder %s54_s8, %s54_s8 }
  0x1c   :  { %p8352_p11 = scmp.ne.s32.totalorder %s54_s8, %s8351_s16  ;;  %p8357_p13 = scmp.lt.s32.totalorder %s8351_s16, %s8351_s16 }
  0x1e   :  { %p8358_p0 = por %p8357_p13, %p8356_p12 }
  0x20   :  { %p8359_p1 = pnand %p8358_p0, %p8352_p11 }
  0x22   :  { %8362 = shalt.err (!%p8359_p1)
}
  0x23   :  { %s8463_s1 = smov 256   ;;  %s8464_s17 = smov 16  }
  0x24   :  { %59 = dma.hbm_to_vmem [thread:$0]  %s8720_s3, 32768, %s54_s8, [#allocation9], %s8463_s1, %s8463_s1, %s8464_s17  }
  0x25   :  { %s8465_s20 = smov [#allocation2]   ;;  %s8363_s24 = scalar_lea.hbm %s8717_s0, 2560 }
  0x26   :  { %s19_s21 = sshll.u32 %s8465_s20, 4  ;;  %p8364_p2 = scmp.ne.s32.totalorder %s8717_s0, %s8363_s24  ;;  %s20_s21 = int_to_ptr.vmem [resolvable:$true] %s19_s21 }
  0x27   :  { %p8367_p3 = scmp.lt.u32.totalorder %s8363_s24, %s8717_s0 }
  0x29   :  { %p8369_p4 = pnand %p8367_p3, %p8364_p2 }
  0x2b   :  { %8372 = shalt.err (!%p8369_p4)
}
  0x2c   :  { %s8373_s6 = scalar_lea.vmem %s20_s21, 2560  ;;  %p8378_p6 = scmp.lt.s32.totalorder %s20_s21, %s20_s21 }
  0x2d   :  { %p8374_p5 = scmp.ne.s32.totalorder %s20_s21, %s8373_s6  ;;  %p8379_p7 = scmp.lt.s32.totalorder %s8373_s6, %s8373_s6 }
  0x2f   :  { %p8380_p8 = por %p8379_p7, %p8378_p6 }
  0x31   :  { %p8381_p9 = pnand %p8380_p8, %p8374_p5 }
  0x33   :  { %8384 = shalt.err (!%p8381_p9)
}
  0x34   :  { %s8466_s3 = smov 1280   ;;  %s8467_s7 = smov 80  }
  0x35   :  { %25 = dma.hbm_to_vmem [thread:$0]  %s8717_s0, 2560, %s20_s21, [#allocation3], %s8466_s3, %s8466_s3, %s8467_s7  }
  0x36   :  { %s8468_s10 = smov [#allocation7]   ;;  %s8469_s12 = smov [#allocation10]  }
  0x37   :  { %s44_s11 = sshll.u32 %s8468_s10, 4  ;;  %s66_s13 = sshll.u32 %s8469_s12, 4  ;;  %s45_s11 = int_to_ptr.vmem [resolvable:$true] %s44_s11  ;;  %s67_s13 = int_to_ptr.vmem [resolvable:$true] %s66_s13 }
  0x38   :  { %s8385_s16 = scalar_lea.hbm %s8719_s2, 128 }
  0x39   :  { %p8386_p10 = scmp.ne.s32.totalorder %s8719_s2, %s8385_s16  ;;  %p8389_p11 = scmp.lt.u32.totalorder %s8385_s16, %s8719_s2 }
  0x3b   :  { %p8391_p12 = pnand %p8389_p11, %p8386_p10 }
  0x3d   :  { %8394 = shalt.err (!%p8391_p12)
}
  0x3e   :  { %s8395_s0 = scalar_lea.vmem %s45_s11, 128  ;;  %p8400_p0 = scmp.lt.s32.totalorder %s45_s11, %s45_s11 }
  0x3f   :  { %p8396_p13 = scmp.ne.s32.totalorder %s45_s11, %s8395_s0  ;;  %p8401_p1 = scmp.lt.s32.totalorder %s8395_s0, %s8395_s0 }
  0x41   :  { %p8402_p2 = por %p8401_p1, %p8400_p0 }
  0x43   :  { %p8403_p3 = pnand %p8402_p2, %p8396_p13 }
  0x45   :  { %8406 = shalt.err (!%p8403_p3)
}
  0x46   :  { %47 = dma.hbm_to_vmem [thread:$0]  %s8719_s2, 128, %s45_s11, [#allocation6]  }
  0x47   :  { %s8407_s24 = scalar_lea.hbm %s8721_s4, 64 }
  0x48   :  { %p8408_p4 = scmp.ne.s32.totalorder %s8721_s4, %s8407_s24  ;;  %p8411_p5 = scmp.lt.u32.totalorder %s8407_s24, %s8721_s4 }
  0x4a   :  { %p8413_p6 = pnand %p8411_p5, %p8408_p4 }
  0x4c   :  { %8416 = shalt.err (!%p8413_p6)
}
  0x4d   :  { %s8417_s6 = scalar_lea.vmem %s67_s13, 64  ;;  %p8422_p8 = scmp.lt.s32.totalorder %s67_s13, %s67_s13 }
  0x4e   :  { %p8418_p7 = scmp.ne.s32.totalorder %s67_s13, %s8417_s6  ;;  %p8423_p9 = scmp.lt.s32.totalorder %s8417_s6, %s8417_s6 }
  0x50   :  { %p8424_p10 = por %p8423_p9, %p8422_p8 }
  0x52   :  { %p8425_p11 = pnand %p8424_p10, %p8418_p7 }
  0x54   :  { %8428 = shalt.err (!%p8425_p11)
}
  0x55   :  { %69 = dma.hbm_to_vmem [thread:$0]  %s8721_s4, 64, %s67_s13, [#allocation9]  }
  0x56   :  { %8451 = dma.done.wait [#allocation3], 2560  }
  0x57   :  { %8452 = vsyncadd [#allocation3], 4294964736 }
  0x58   :  { %8453 = dma.done.wait [#allocation6], 82048  }
  0x59   :  { %8454 = vsyncadd [#allocation6], 4294885248 }
  0x5a   :  { %8455 = dma.done.wait [#allocation9], 32832  }
  0x5b   :  { %8456 = vsyncadd [#allocation9], 4294934464  ;;  %v115_v0 = vld [vmem:[#allocation5] sm:$0xff]  ;;  %v116_v2 = vld [vmem:[#allocation5 + $0x8] sm:$0xff]  ;;  %s8470_s4 = smov [#allocation11]  }
  0x5c   :  { %v119_v1 = vld [vmem:[#allocation5 + $0x20] sm:$0xff]  ;;  %v120_v4 = vld [vmem:[#allocation5 + $0x28] sm:$0xff]  ;;  %v96_v54 = vld [vmem:[#allocation2 + $0x58] sm:$0xff]  ;;  %s6868_s7 = sshll.u32 %s8470_s4, 4  ;;  %s6869_s7 = int_to_ptr.vmem [resolvable:$true] %s6868_s7 }
  0x5d   :  { %v6883_v3 = vcombine.high %v115_v0, %v119_v1  ;;  %v6882_v5 = vcombine.low %v115_v0, %v119_v1  ;;  %v123_v6 = vld [vmem:[#allocation5 + $0x40] sm:$0xff]  ;;  %v6885_v8 = vcombine.high %v116_v2, %v120_v4  ;;  %v6884_v9 = vcombine.low %v116_v2, %v120_v4  ;;  %v124_v11 = vld [vmem:[#allocation5 + $0x48] sm:$0xff]  ;;  %s8429_s8 = scalar_lea.vmem %s6869_s7, 1024  ;;  %p8434_p13 = scmp.lt.s32.totalorder %s6869_s7, %s6869_s7 }
  0x5e   :  { %v127_v7 = vld [vmem:[#allocation5 + $0x60] sm:$0xff]  ;;  %v128_v12 = vld [vmem:[#allocation5 + $0x68] sm:$0xff]  ;;  %p8430_p12 = scmp.ne.s32.totalorder %s6869_s7, %s8429_s8  ;;  %p8435_p0 = scmp.lt.s32.totalorder %s8429_s8, %s8429_s8 }
  0x5f   :  { %v6891_v10 = vcombine.high %v123_v6, %v127_v7  ;;  %v131_v13 = vld [vmem:[#allocation5 + $0x80] sm:$0xff]  ;;  %3997 = vmatprep.subr.bf16.mxu0 %v6883_v3  ;;  %v6893_v14 = vcombine.high %v124_v11, %v128_v12  ;;  %v132_v16 = vld [vmem:[#allocation5 + $0x88] sm:$0xff]  ;;  %4212 = vmatprep.subr.bf16.mxu1 %v6885_v8  ;;  %v6890_v18 = vcombine.low %v123_v6, %v127_v7 }
  0x60   :  { %v135_v15 = vld [vmem:[#allocation5 + $0xa0] sm:$0xff]  ;;  %v136_v17 = vld [vmem:[#allocation5 + $0xa8] sm:$0xff]  ;;  %3998 = vmatpush1.bf16.msra.mxu0 %v6882_v5  ;;  %4213 = vmatpush1.bf16.msra.mxu1 %v6884_v9  ;;  %v6892_v19 = vcombine.low %v124_v11, %v128_v12  ;;  %p8436_p1 = por %p8435_p0, %p8434_p13 }
  0x61   :  { %3999 = vmatprep.subr.bf16.mxu0 %v6891_v10  ;;  %v6899_v20 = vcombine.high %v131_v13, %v135_v15  ;;  %4214 = vmatprep.subr.bf16.mxu1 %v6893_v14  ;;  %v6901_v21 = vcombine.high %v132_v16, %v136_v17  ;;  %v139_v22 = vld [vmem:[#allocation5 + $0xc0] sm:$0xff]  ;;  %v140_v24 = vld [vmem:[#allocation5 + $0xc8] sm:$0xff]  ;;  %v6898_v26 = vcombine.low %v131_v13, %v135_v15 }
  0x62   :  { %v143_v23 = vld [vmem:[#allocation5 + $0xe0] sm:$0xff]  ;;  %v144_v25 = vld [vmem:[#allocation5 + $0xe8] sm:$0xff]  ;;  %v6900_v27 = vcombine.low %v132_v16, %v136_v17  ;;  %p8437_p2 = pnand %p8436_p1, %p8430_p12 }
  0x63   :  { %v6907_v28 = vcombine.high %v139_v22, %v143_v23  ;;  %v6909_v29 = vcombine.high %v140_v24, %v144_v25  ;;  %v147_v30 = vld [vmem:[#allocation5 + $0x100] sm:$0xff]  ;;  %v148_v32 = vld [vmem:[#allocation5 + $0x108] sm:$0xff]  ;;  %v6906_v34 = vcombine.low %v139_v22, %v143_v23  ;;  %v6908_v35 = vcombine.low %v140_v24, %v144_v25 }
  0x64   :  { %4000 = vmatpush1.bf16.msra.mxu0 %v6890_v18  ;;  %4215 = vmatpush1.bf16.msra.mxu1 %v6892_v19  ;;  %v151_v31 = vld [vmem:[#allocation5 + $0x120] sm:$0xff]  ;;  %v152_v33 = vld [vmem:[#allocation5 + $0x128] sm:$0xff] }
  0x65   :  { %4001 = vmatprep.subr.bf16.mxu0 %v6899_v20  ;;  %4216 = vmatprep.subr.bf16.mxu1 %v6901_v21  ;;  %v6915_v36 = vcombine.high %v147_v30, %v151_v31  ;;  %v6917_v37 = vcombine.high %v148_v32, %v152_v33  ;;  %v155_v38 = vld [vmem:[#allocation5 + $0x140] sm:$0xff]  ;;  %v156_v40 = vld [vmem:[#allocation5 + $0x148] sm:$0xff]  ;;  %v6914_v42 = vcombine.low %v147_v30, %v151_v31 }
  0x66   :  { %v159_v39 = vld [vmem:[#allocation5 + $0x160] sm:$0xff]  ;;  %v160_v41 = vld [vmem:[#allocation5 + $0x168] sm:$0xff]  ;;  %v6916_v43 = vcombine.low %v148_v32, %v152_v33 }
  0x67   :  { %v6923_v44 = vcombine.high %v155_v38, %v159_v39  ;;  %v6925_v45 = vcombine.high %v156_v40, %v160_v41  ;;  %v163_v46 = vld [vmem:[#allocation5 + $0x180] sm:$0xff]  ;;  %v164_v48 = vld [vmem:[#allocation5 + $0x188] sm:$0xff]  ;;  %v6922_v50 = vcombine.low %v155_v38, %v159_v39  ;;  %v6924_v51 = vcombine.low %v156_v40, %v160_v41 }
  0x68   :  { %4002 = vmatpush1.bf16.msra.mxu0 %v6898_v26  ;;  %4217 = vmatpush1.bf16.msra.mxu1 %v6900_v27  ;;  %v167_v47 = vld [vmem:[#allocation5 + $0x1a0] sm:$0xff]  ;;  %v168_v49 = vld [vmem:[#allocation5 + $0x1a8] sm:$0xff] }
  0x69   :  { %4003 = vmatprep.subr.bf16.mxu0 %v6907_v28  ;;  %4218 = vmatprep.subr.bf16.mxu1 %v6909_v29  ;;  %v6931_v52 = vcombine.high %v163_v46, %v167_v47  ;;  %v86_v53 = vld [vmem:[#allocation2 + $0x8] sm:$0xff]  ;;  %v6933_v55 = vcombine.high %v164_v48, %v168_v49  ;;  %v171_v56 = vld [vmem:[#allocation5 + $0x1c0] sm:$0xff]  ;;  %v6930_v61 = vcombine.low %v163_v46, %v167_v47 }
  0x6a   :  { %v175_v57 = vld [vmem:[#allocation5 + $0x1e0] sm:$0xff]  ;;  %v8564_v58 = vpack.c.bf16 %v96_v54, %v86_v53  ;;  %v172_v59 = vld [vmem:[#allocation5 + $0x1c8] sm:$0xff]  ;;  %v6932_v62 = vcombine.low %v164_v48, %v168_v49 }
  0x6b   :  { %v176_v60 = vld [vmem:[#allocation5 + $0x1e8] sm:$0xff]  ;;  %v6939_v63 = vcombine.high %v171_v56, %v175_v57  ;;  %v179_v1 = vld [vmem:[#allocation5 + $0x200] sm:$0xff]  ;;  %v6938_v5 = vcombine.low %v171_v56, %v175_v57 }
  0x6c   :  { %4004 = vmatpush1.bf16.msra.mxu0 %v6906_v34  ;;  %4219 = vmatpush1.bf16.msra.mxu1 %v6908_v35  ;;  %v6941_v0 = vcombine.high %v172_v59, %v176_v60  ;;  %v183_v2 = vld [vmem:[#allocation5 + $0x220] sm:$0xff]  ;;  %v180_v3 = vld [vmem:[#allocation5 + $0x208] sm:$0xff]  ;;  %v6940_v6 = vcombine.low %v172_v59, %v176_v60 }
  0x6d   :  { %4005 = vmatprep.subr.bf16.mxu0 %v6915_v36  ;;  %4220 = vmatprep.subr.bf16.mxu1 %v6917_v37  ;;  %v184_v4 = vld [vmem:[#allocation5 + $0x228] sm:$0xff]  ;;  %v6947_v7 = vcombine.high %v179_v1, %v183_v2  ;;  %v187_v9 = vld [vmem:[#allocation5 + $0x240] sm:$0xff]  ;;  %v6946_v13 = vcombine.low %v179_v1, %v183_v2 }
  0x6e   :  { %4029 = vmatprep.mubr.bf16.mxu0 %v8564_v58  ;;  %4244 = vmatprep.mubr.bf16.mxu1 %v8564_v58  ;;  %v6949_v8 = vcombine.high %v180_v3, %v184_v4  ;;  %v191_v10 = vld [vmem:[#allocation5 + $0x260] sm:$0xff]  ;;  %v188_v11 = vld [vmem:[#allocation5 + $0x248] sm:$0xff]  ;;  %v6948_v14 = vcombine.low %v180_v3, %v184_v4 }
  0x6f   :  { %v192_v12 = vld [vmem:[#allocation5 + $0x268] sm:$0xff]  ;;  %v6955_v15 = vcombine.high %v187_v9, %v191_v10  ;;  %v195_v17 = vld [vmem:[#allocation5 + $0x280] sm:$0xff]  ;;  %v6954_v21 = vcombine.low %v187_v9, %v191_v10 }
  0x70   :  { %4006 = vmatpush1.bf16.msra.mxu0 %v6914_v42  ;;  %4221 = vmatpush1.bf16.msra.mxu1 %v6916_v43  ;;  %v6957_v16 = vcombine.high %v188_v11, %v192_v12  ;;  %v199_v18 = vld [vmem:[#allocation5 + $0x2a0] sm:$0xff]  ;;  %v196_v19 = vld [vmem:[#allocation5 + $0x288] sm:$0xff]  ;;  %v6956_v22 = vcombine.low %v188_v11, %v192_v12 }
  0x71   :  { %4007 = vmatprep.subr.bf16.mxu0 %v6923_v44  ;;  %4222 = vmatprep.subr.bf16.mxu1 %v6925_v45  ;;  %v200_v20 = vld [vmem:[#allocation5 + $0x2a8] sm:$0xff]  ;;  %v6963_v23 = vcombine.high %v195_v17, %v199_v18  ;;  %v203_v25 = vld [vmem:[#allocation5 + $0x2c0] sm:$0xff]  ;;  %v6962_v29 = vcombine.low %v195_v17, %v199_v18  ;;  %v88_v17 = vld [vmem:[#allocation2 + $0x18] sm:$0xff] }
  0x72   :  { %v6965_v24 = vcombine.high %v196_v19, %v200_v20  ;;  %v207_v26 = vld [vmem:[#allocation5 + $0x2e0] sm:$0xff]  ;;  %v204_v27 = vld [vmem:[#allocation5 + $0x2c8] sm:$0xff]  ;;  %v6964_v30 = vcombine.low %v196_v19, %v200_v20 }
  0x73   :  { %v208_v28 = vld [vmem:[#allocation5 + $0x2e8] sm:$0xff]  ;;  %v6971_v31 = vcombine.high %v203_v25, %v207_v26  ;;  %v211_v33 = vld [vmem:[#allocation5 + $0x300] sm:$0xff]  ;;  %v6970_v37 = vcombine.low %v203_v25, %v207_v26 }
  0x74   :  { %4008 = vmatpush1.bf16.msra.mxu0 %v6922_v50  ;;  %4223 = vmatpush1.bf16.msra.mxu1 %v6924_v51  ;;  %v6973_v32 = vcombine.high %v204_v27, %v208_v28  ;;  %v215_v34 = vld [vmem:[#allocation5 + $0x320] sm:$0xff]  ;;  %v212_v35 = vld [vmem:[#allocation5 + $0x308] sm:$0xff]  ;;  %v6972_v38 = vcombine.low %v204_v27, %v208_v28 }
  0x75   :  { %4009 = vmatprep.subr.bf16.mxu0 %v6931_v52  ;;  %4224 = vmatprep.subr.bf16.mxu1 %v6933_v55  ;;  %v216_v36 = vld [vmem:[#allocation5 + $0x328] sm:$0xff]  ;;  %v6979_v39 = vcombine.high %v211_v33, %v215_v34  ;;  %v219_v41 = vld [vmem:[#allocation5 + $0x340] sm:$0xff]  ;;  %v6978_v45 = vcombine.low %v211_v33, %v215_v34 }
  0x76   :  { %v6981_v40 = vcombine.high %v212_v35, %v216_v36  ;;  %v223_v42 = vld [vmem:[#allocation5 + $0x360] sm:$0xff]  ;;  %v220_v43 = vld [vmem:[#allocation5 + $0x348] sm:$0xff]  ;;  %v6980_v46 = vcombine.low %v212_v35, %v216_v36 }
  0x77   :  { %v224_v44 = vld [vmem:[#allocation5 + $0x368] sm:$0xff]  ;;  %v6987_v47 = vcombine.high %v219_v41, %v223_v42  ;;  %v227_v49 = vld [vmem:[#allocation5 + $0x380] sm:$0xff]  ;;  %v6986_v53 = vcombine.low %v219_v41, %v223_v42 }
  0x78   :  { %4010 = vmatpush1.bf16.msra.mxu0 %v6930_v61  ;;  %4225 = vmatpush1.bf16.msra.mxu1 %v6932_v62  ;;  %v6989_v48 = vcombine.high %v220_v43, %v224_v44  ;;  %v231_v50 = vld [vmem:[#allocation5 + $0x3a0] sm:$0xff]  ;;  %v228_v51 = vld [vmem:[#allocation5 + $0x388] sm:$0xff]  ;;  %v6988_v54 = vcombine.low %v220_v43, %v224_v44 }
  0x79   :  { %4011 = vmatprep.subr.bf16.mxu0 %v6939_v63  ;;  %4226 = vmatprep.subr.bf16.mxu1 %v6941_v0  ;;  %v232_v52 = vld [vmem:[#allocation5 + $0x3a8] sm:$0xff]  ;;  %v6995_v55 = vcombine.high %v227_v49, %v231_v50  ;;  %v235_v57 = vld [vmem:[#allocation5 + $0x3c0] sm:$0xff]  ;;  %v6994_v62 = vcombine.low %v227_v49, %v231_v50 }
  0x7a   :  { %v6997_v56 = vcombine.high %v228_v51, %v232_v52  ;;  %v239_v59 = vld [vmem:[#allocation5 + $0x3e0] sm:$0xff]  ;;  %v236_v60 = vld [vmem:[#allocation5 + $0x3c8] sm:$0xff]  ;;  %v6996_v63 = vcombine.low %v228_v51, %v232_v52 }
  0x7b   :  { %v240_v61 = vld [vmem:[#allocation5 + $0x3e8] sm:$0xff]  ;;  %v7003_v0 = vcombine.high %v235_v57, %v239_v59  ;;  %v243_v2 = vld [vmem:[#allocation5 + $0x400] sm:$0xff] }
  0x7c   :  { %4012 = vmatpush1.bf16.msra.mxu0 %v6938_v5  ;;  %4227 = vmatpush1.bf16.msra.mxu1 %v6940_v6  ;;  %v7005_v1 = vcombine.high %v236_v60, %v240_v61  ;;  %v247_v3 = vld [vmem:[#allocation5 + $0x420] sm:$0xff]  ;;  %v244_v4 = vld [vmem:[#allocation5 + $0x408] sm:$0xff]  ;;  %v7002_v6 = vcombine.low %v235_v57, %v239_v59  ;;  %v7004_v9 = vcombine.low %v236_v60, %v240_v61 }
  0x7d   :  { %4013 = vmatprep.subr.bf16.mxu0 %v6947_v7  ;;  %4228 = vmatprep.subr.bf16.mxu1 %v6949_v8  ;;  %v248_v5 = vld [vmem:[#allocation5 + $0x428] sm:$0xff]  ;;  %v85_v7 = vld [vmem:[#allocation2] sm:$0xff]  ;;  %v95_v8 = vld [vmem:[#allocation2 + $0x50] sm:$0xff]  ;;  %v7011_v10 = vcombine.high %v243_v2, %v247_v3  ;;  %v7010_v19 = vcombine.low %v243_v2, %v247_v3 }
  0x7e   :  { %v7013_v11 = vcombine.high %v244_v4, %v248_v5  ;;  %v251_v12 = vld [vmem:[#allocation5 + $0x440] sm:$0xff]  ;;  %v98_v18 = vld [vmem:[#allocation2 + $0x68] sm:$0xff]  ;;  %v7012_v20 = vcombine.low %v244_v4, %v248_v5 }
  0x7f   :  { %v8570_v25 = vpack.c.bf16 %v98_v18, %v88_v17  ;;  %v260_v26 = vld [vmem:[#allocation5 + $0x488] sm:$0xff]  ;;  %v315_v17 = vld [vmem:[#allocation5 + $0x640] sm:$0xff] }
  0x80   :  { %4014 = vmatpush1.bf16.msra.mxu0 %v6946_v13  ;;  %4229 = vmatpush1.bf16.msra.mxu1 %v6948_v14  ;;  %v255_v13 = vld [vmem:[#allocation5 + $0x460] sm:$0xff]  ;;  %v252_v14 = vld [vmem:[#allocation5 + $0x448] sm:$0xff] }
  0x81   :  { %4015 = vmatprep.subr.bf16.mxu0 %v6955_v15  ;;  %4230 = vmatprep.subr.bf16.mxu1 %v6957_v16  ;;  %v8568_v15 = vpack.c.bf16 %v95_v8, %v85_v7  ;;  %v256_v16 = vld [vmem:[#allocation5 + $0x468] sm:$0xff]  ;;  %v7018_v28 = vcombine.low %v251_v12, %v255_v13  ;;  %v307_v8 = vld [vmem:[#allocation5 + $0x600] sm:$0xff] }
  0x82   :  { %v264_v27 = vld [vmem:[#allocation5 + $0x4a8] sm:$0xff]  ;;  %v319_v18 = vld [vmem:[#allocation5 + $0x660] sm:$0xff] }
  0x83   :  { %v7029_v33 = vcombine.high %v260_v26, %v264_v27  ;;  %v268_v34 = vld [vmem:[#allocation5 + $0x4c8] sm:$0xff] }
  0x84   :  { %4016 = vmatpush1.bf16.msra.mxu0 %v6954_v21  ;;  %4231 = vmatpush1.bf16.msra.mxu1 %v6956_v22  ;;  %v7019_v21 = vcombine.high %v251_v12, %v255_v13  ;;  %v7021_v22 = vcombine.high %v252_v14, %v256_v16  ;;  %v272_v35 = vld [vmem:[#allocation5 + $0x4e8] sm:$0xff] }
  0x85   :  { %4017 = vmatprep.subr.bf16.mxu0 %v6963_v23  ;;  %4232 = vmatprep.subr.bf16.mxu1 %v6965_v24  ;;  %v259_v23 = vld [vmem:[#allocation5 + $0x480] sm:$0xff]  ;;  %v276_v41 = vld [vmem:[#allocation5 + $0x508] sm:$0xff]  ;;  %v7037_v42 = vcombine.high %v268_v34, %v272_v35 }
  0x86   :  { %v263_v24 = vld [vmem:[#allocation5 + $0x4a0] sm:$0xff]  ;;  %v280_v43 = vld [vmem:[#allocation5 + $0x528] sm:$0xff] }
  0x87   :  { %v7026_v36 = vcombine.low %v259_v23, %v263_v24  ;;  %v284_v49 = vld [vmem:[#allocation5 + $0x548] sm:$0xff]  ;;  %v7045_v50 = vcombine.high %v276_v41, %v280_v43 }
  0x88   :  { %4018 = vmatpush1.bf16.msra.mxu0 %v6962_v29  ;;  %4233 = vmatpush1.bf16.msra.mxu1 %v6964_v30  ;;  %v7020_v29 = vcombine.low %v252_v14, %v256_v16  ;;  %v7027_v30 = vcombine.high %v259_v23, %v263_v24  ;;  %v288_v51 = vld [vmem:[#allocation5 + $0x568] sm:$0xff]  ;;  %v7083_v24 = vcombine.high %v315_v17, %v319_v18 }
  0x89   :  { %4019 = vmatprep.subr.bf16.mxu0 %v6971_v31  ;;  %4234 = vmatprep.subr.bf16.mxu1 %v6973_v32  ;;  %v267_v31 = vld [vmem:[#allocation5 + $0x4c0] sm:$0xff]  ;;  %v292_v57 = vld [vmem:[#allocation5 + $0x588] sm:$0xff]  ;;  %v7053_v59 = vcombine.high %v284_v49, %v288_v51 }
  0x8a   :  { %v271_v32 = vld [vmem:[#allocation5 + $0x4e0] sm:$0xff]  ;;  %v296_v60 = vld [vmem:[#allocation5 + $0x5a8] sm:$0xff] }
  0x8b   :  { %v7034_v44 = vcombine.low %v267_v31, %v271_v32  ;;  %v300_v2 = vld [vmem:[#allocation5 + $0x5c8] sm:$0xff]  ;;  %v7061_v3 = vcombine.high %v292_v57, %v296_v60 }
  0x8c   :  { %4020 = vmatpush1.bf16.msra.mxu0 %v6970_v37  ;;  %4235 = vmatpush1.bf16.msra.mxu1 %v6972_v38  ;;  %v7028_v37 = vcombine.low %v260_v26, %v264_v27  ;;  %v7035_v38 = vcombine.high %v267_v31, %v271_v32  ;;  %v304_v4 = vld [vmem:[#allocation5 + $0x5e8] sm:$0xff]  ;;  %v323_v26 = vld [vmem:[#allocation5 + $0x680] sm:$0xff]  ;;  %v7082_v31 = vcombine.low %v315_v17, %v319_v18  ;;  %v87_v17 = vld [vmem:[#allocation2 + $0x10] sm:$0xff] }
  0x8d   :  { %4021 = vmatprep.subr.bf16.mxu0 %v6979_v39  ;;  %4236 = vmatprep.subr.bf16.mxu1 %v6981_v40  ;;  %v275_v39 = vld [vmem:[#allocation5 + $0x500] sm:$0xff]  ;;  %v312_v12 = vld [vmem:[#allocation5 + $0x628] sm:$0xff]  ;;  %v7068_v14 = vcombine.low %v300_v2, %v304_v4 }
  0x8e   :  { %v279_v40 = vld [vmem:[#allocation5 + $0x520] sm:$0xff] }
  0x8f   :  { %v7042_v52 = vcombine.low %v275_v39, %v279_v40  ;;  %v327_v27 = vld [vmem:[#allocation5 + $0x6a0] sm:$0xff] }
  0x90   :  { %4022 = vmatpush1.bf16.msra.mxu0 %v6978_v45  ;;  %4237 = vmatpush1.bf16.msra.mxu1 %v6980_v46  ;;  %v7036_v45 = vcombine.low %v268_v34, %v272_v35  ;;  %v7043_v46 = vcombine.high %v275_v39, %v279_v40  ;;  %v331_v34 = vld [vmem:[#allocation5 + $0x6c0] sm:$0xff]  ;;  %v7090_v39 = vcombine.low %v323_v26, %v327_v27 }
  0x91   :  { %4023 = vmatprep.subr.bf16.mxu0 %v6987_v47  ;;  %4238 = vmatprep.subr.bf16.mxu1 %v6989_v48  ;;  %v283_v47 = vld [vmem:[#allocation5 + $0x540] sm:$0xff] }
  0x92   :  { %v287_v48 = vld [vmem:[#allocation5 + $0x560] sm:$0xff] }
  0x93   :  { %v7050_v61 = vcombine.low %v283_v47, %v287_v48  ;;  %v335_v35 = vld [vmem:[#allocation5 + $0x6e0] sm:$0xff] }
  0x94   :  { %4024 = vmatpush1.bf16.msra.mxu0 %v6986_v53  ;;  %4239 = vmatpush1.bf16.msra.mxu1 %v6988_v54  ;;  %v7044_v53 = vcombine.low %v276_v41, %v280_v43  ;;  %v7051_v54 = vcombine.high %v283_v47, %v287_v48  ;;  %v7099_v41 = vcombine.high %v331_v34, %v335_v35  ;;  %v343_v43 = vld [vmem:[#allocation5 + $0x720] sm:$0xff] }
  0x95   :  { %4025 = vmatprep.subr.bf16.mxu0 %v6995_v55  ;;  %4240 = vmatprep.subr.bf16.mxu1 %v6997_v56  ;;  %v291_v55 = vld [vmem:[#allocation5 + $0x580] sm:$0xff]  ;;  %v7098_v47 = vcombine.low %v331_v34, %v335_v35 }
  0x96   :  { %v295_v56 = vld [vmem:[#allocation5 + $0x5a0] sm:$0xff] }
  0x97   :  { %v7058_v5 = vcombine.low %v291_v55, %v295_v56  ;;  %v97_v18 = vld [vmem:[#allocation2 + $0x60] sm:$0xff] }
  0x98   :  { %4026 = vmatpush1.bf16.msra.mxu0 %v6994_v62  ;;  %4241 = vmatpush1.bf16.msra.mxu1 %v6996_v63  ;;  %v7052_v62 = vcombine.low %v284_v49, %v288_v51  ;;  %v7059_v63 = vcombine.high %v291_v55, %v295_v56  ;;  %v351_v51 = vld [vmem:[#allocation5 + $0x760] sm:$0xff] }
  0x99   :  { %4027 = vmatprep.subr.bf16.mxu0 %v7003_v0  ;;  %4242 = vmatprep.subr.bf16.mxu1 %v7005_v1  ;;  %v299_v0 = vld [vmem:[#allocation5 + $0x5c0] sm:$0xff] }
  0x9a   :  { %v303_v1 = vld [vmem:[#allocation5 + $0x5e0] sm:$0xff] }
  0x9b   :  { %v7067_v7 = vcombine.high %v299_v0, %v303_v1  ;;  %v7066_v13 = vcombine.low %v299_v0, %v303_v1  ;;  %v387_v35 = vld [vmem:[#allocation5 + $0x880] sm:$0xff] }
  0x9c   :  { %4028 = vmatpush1.bf16.msra.mxu0 %v7002_v6  ;;  %4243 = vmatpush1.bf16.msra.mxu1 %v7004_v9  ;;  %v7060_v6 = vcombine.low %v292_v57, %v296_v60  ;;  %v311_v9 = vld [vmem:[#allocation5 + $0x620] sm:$0xff] }
  0x9d   :  { %4040 = vmatprep.subr.bf16.mxu0 %v7011_v10  ;;  %4255 = vmatprep.subr.bf16.mxu1 %v7013_v11  ;;  %v308_v10 = vld [vmem:[#allocation5 + $0x608] sm:$0xff]  ;;  %v7069_v11 = vcombine.high %v300_v2, %v304_v4  ;;  %v7075_v16 = vcombine.high %v307_v8, %v311_v9  ;;  %v359_v60 = vld [vmem:[#allocation5 + $0x7a0] sm:$0xff] }
  0x9e   :  { %v7076_v23 = vcombine.low %v308_v10, %v312_v12  ;;  %v367_v4 = vld [vmem:[#allocation5 + $0x7e0] sm:$0xff] }
  0x9f   :  { %4030 = vmatmul.mubr.bf16.vlgmr.msra.gmra.mrb[0].mxu0 %v8568_v15  ;;  %4245 = vmatmul.mubr.bf16.vlgmr.msra.gmra.mrb[0].mxu1 %v8568_v15 }
  0xa0   :  { %4041 = vmatpush1.bf16.msra.mxu0 %v7010_v19  ;;  %4256 = vmatpush1.bf16.msra.mxu1 %v7012_v20  ;;  %v316_v19 = vld [vmem:[#allocation5 + $0x648] sm:$0xff]  ;;  %v7077_v20 = vcombine.high %v308_v10, %v312_v12  ;;  %v375_v12 = vld [vmem:[#allocation5 + $0x820] sm:$0xff] }
  0xa1   :  { %4042 = vmatprep.subr.bf16.mxu0 %v7019_v21  ;;  %4257 = vmatprep.subr.bf16.mxu1 %v7021_v22  ;;  %v320_v21 = vld [vmem:[#allocation5 + $0x668] sm:$0xff]  ;;  %v7074_v22 = vcombine.low %v307_v8, %v311_v9  ;;  %v371_v9 = vld [vmem:[#allocation5 + $0x800] sm:$0xff] }
  0xa2   :  { %4072 = vmatprep.mubr.bf16.mxu0 %v8570_v25  ;;  %4287 = vmatprep.mubr.bf16.mxu1 %v8570_v25  ;;  %v7084_v32 = vcombine.low %v316_v19, %v320_v21 }
  0xa4   :  { %4043 = vmatpush1.bf16.msra.mxu0 %v7018_v28  ;;  %4258 = vmatpush1.bf16.msra.mxu1 %v7020_v29  ;;  %v324_v28 = vld [vmem:[#allocation5 + $0x688] sm:$0xff]  ;;  %v7085_v29 = vcombine.high %v316_v19, %v320_v21  ;;  %v383_v21 = vld [vmem:[#allocation5 + $0x860] sm:$0xff] }
  0xa5   :  { %4044 = vmatprep.subr.bf16.mxu0 %v7027_v30  ;;  %4259 = vmatprep.subr.bf16.mxu1 %v7029_v33  ;;  %v328_v30 = vld [vmem:[#allocation5 + $0x6a8] sm:$0xff]  ;;  %v7091_v33 = vcombine.high %v323_v26, %v327_v27 }
  0xa6   :  { %v7092_v40 = vcombine.low %v324_v28, %v328_v30  ;;  %v384_v26 = vld [vmem:[#allocation5 + $0x868] sm:$0xff] }
  0xa7   :  { %v90_v27 = vld [vmem:[#allocation2 + $0x28] sm:$0xff] }
  0xa8   :  { %4045 = vmatpush1.bf16.msra.mxu0 %v7026_v36  ;;  %4260 = vmatpush1.bf16.msra.mxu1 %v7028_v37  ;;  %v332_v36 = vld [vmem:[#allocation5 + $0x6c8] sm:$0xff]  ;;  %v7093_v37 = vcombine.high %v324_v28, %v328_v30  ;;  %v8576_v30 = vpack.c.bf16 %v97_v18, %v87_v17 }
  0xa9   :  { %4046 = vmatprep.subr.bf16.mxu0 %v7035_v38  ;;  %4261 = vmatprep.subr.bf16.mxu1 %v7037_v42  ;;  %v336_v38 = vld [vmem:[#allocation5 + $0x6e8] sm:$0xff]  ;;  %v339_v42 = vld [vmem:[#allocation5 + $0x700] sm:$0xff] }
  0xaa   :  { %v7100_v48 = vcombine.low %v332_v36, %v336_v38  ;;  %v7107_v49 = vcombine.high %v339_v42, %v343_v43  ;;  %v7106_v55 = vcombine.low %v339_v42, %v343_v43  ;;  %v395_v43 = vld [vmem:[#allocation5 + $0x8c0] sm:$0xff]  ;;  %v432_v17 = vld [vmem:[#allocation5 + $0x9e8] sm:$0xff] }
  0xac   :  { %4047 = vmatpush1.bf16.msra.mxu0 %v7034_v44  ;;  %4262 = vmatpush1.bf16.msra.mxu1 %v7036_v45  ;;  %v340_v44 = vld [vmem:[#allocation5 + $0x708] sm:$0xff]  ;;  %v7101_v45 = vcombine.high %v332_v36, %v336_v38  ;;  %v391_v36 = vld [vmem:[#allocation5 + $0x8a0] sm:$0xff] }
  0xad   :  { %4048 = vmatprep.subr.bf16.mxu0 %v7043_v46  ;;  %4263 = vmatprep.subr.bf16.mxu1 %v7045_v50  ;;  %v344_v46 = vld [vmem:[#allocation5 + $0x728] sm:$0xff]  ;;  %v347_v50 = vld [vmem:[#allocation5 + $0x740] sm:$0xff]  ;;  %v7155_v42 = vcombine.high %v387_v35, %v391_v36 }
  0xae   :  { %v7108_v56 = vcombine.low %v340_v44, %v344_v46  ;;  %v7115_v57 = vcombine.high %v347_v50, %v351_v51  ;;  %v7114_v0 = vcombine.low %v347_v50, %v351_v51  ;;  %v388_v38 = vld [vmem:[#allocation5 + $0x888] sm:$0xff]  ;;  %v403_v51 = vld [vmem:[#allocation5 + $0x900] sm:$0xff] }
  0xb0   :  { %4049 = vmatpush1.bf16.msra.mxu0 %v7042_v52  ;;  %4264 = vmatpush1.bf16.msra.mxu1 %v7044_v53  ;;  %v348_v52 = vld [vmem:[#allocation5 + $0x748] sm:$0xff]  ;;  %v7109_v53 = vcombine.high %v340_v44, %v344_v46  ;;  %v399_v44 = vld [vmem:[#allocation5 + $0x8e0] sm:$0xff] }
  0xb1   :  { %4050 = vmatprep.subr.bf16.mxu0 %v7051_v54  ;;  %4265 = vmatprep.subr.bf16.mxu1 %v7053_v59  ;;  %v352_v54 = vld [vmem:[#allocation5 + $0x768] sm:$0xff]  ;;  %v355_v59 = vld [vmem:[#allocation5 + $0x780] sm:$0xff]  ;;  %v7163_v50 = vcombine.high %v395_v43, %v399_v44 }
  0xb2   :  { %v7116_v1 = vcombine.low %v348_v52, %v352_v54  ;;  %v7123_v2 = vcombine.high %v355_v59, %v359_v60  ;;  %v7122_v8 = vcombine.low %v355_v59, %v359_v60  ;;  %v411_v60 = vld [vmem:[#allocation5 + $0x940] sm:$0xff] }
  0xb4   :  { %4051 = vmatpush1.bf16.msra.mxu0 %v7050_v61  ;;  %4266 = vmatpush1.bf16.msra.mxu1 %v7052_v62  ;;  %v356_v61 = vld [vmem:[#allocation5 + $0x788] sm:$0xff]  ;;  %v7117_v62 = vcombine.high %v348_v52, %v352_v54  ;;  %v407_v52 = vld [vmem:[#allocation5 + $0x920] sm:$0xff] }
  0xb5   :  { %4052 = vmatprep.subr.bf16.mxu0 %v7059_v63  ;;  %4267 = vmatprep.subr.bf16.mxu1 %v7061_v3  ;;  %v360_v63 = vld [vmem:[#allocation5 + $0x7a8] sm:$0xff]  ;;  %v363_v3 = vld [vmem:[#allocation5 + $0x7c0] sm:$0xff]  ;;  %v7171_v59 = vcombine.high %v403_v51, %v407_v52 }
  0xb6   :  { %v7124_v10 = vcombine.low %v356_v61, %v360_v63  ;;  %v7130_v19 = vcombine.low %v363_v3, %v367_v4 }
  0xb8   :  { %4053 = vmatpush1.bf16.msra.mxu0 %v7058_v5  ;;  %4268 = vmatpush1.bf16.msra.mxu1 %v7060_v6  ;;  %v364_v5 = vld [vmem:[#allocation5 + $0x7c8] sm:$0xff]  ;;  %v7125_v6 = vcombine.high %v356_v61, %v360_v63  ;;  %v415_v61 = vld [vmem:[#allocation5 + $0x960] sm:$0xff] }
  0xb9   :  { %4054 = vmatprep.subr.bf16.mxu0 %v7067_v7  ;;  %4269 = vmatprep.subr.bf16.mxu1 %v7069_v11  ;;  %v368_v7 = vld [vmem:[#allocation5 + $0x7e8] sm:$0xff]  ;;  %v7131_v11 = vcombine.high %v363_v3, %v367_v4  ;;  %v7179_v3 = vcombine.high %v411_v60, %v415_v61  ;;  %v419_v4 = vld [vmem:[#allocation5 + $0x980] sm:$0xff] }
  0xbc   :  { %4055 = vmatpush1.bf16.msra.mxu0 %v7066_v13  ;;  %4270 = vmatpush1.bf16.msra.mxu1 %v7068_v14  ;;  %v372_v13 = vld [vmem:[#allocation5 + $0x808] sm:$0xff] }
  0xbd   :  { %4056 = vmatprep.subr.bf16.mxu0 %v7075_v16  ;;  %4271 = vmatprep.subr.bf16.mxu1 %v7077_v20  ;;  %v376_v14 = vld [vmem:[#allocation5 + $0x828] sm:$0xff]  ;;  %v7133_v16 = vcombine.high %v364_v5, %v368_v7  ;;  %v379_v20 = vld [vmem:[#allocation5 + $0x840] sm:$0xff] }
  0xbe   :  { %v7141_v28 = vcombine.high %v372_v13, %v376_v14 }
  0xc0   :  { %4057 = vmatpush1.bf16.msra.mxu0 %v7074_v22  ;;  %4272 = vmatpush1.bf16.msra.mxu1 %v7076_v23  ;;  %v7132_v22 = vcombine.low %v364_v5, %v368_v7  ;;  %v7139_v23 = vcombine.high %v371_v9, %v375_v12  ;;  %v423_v5 = vld [vmem:[#allocation5 + $0x9a0] sm:$0xff] }
  0xc1   :  { %4058 = vmatprep.subr.bf16.mxu0 %v7083_v24  ;;  %4273 = vmatprep.subr.bf16.mxu1 %v7085_v29  ;;  %v380_v24 = vld [vmem:[#allocation5 + $0x848] sm:$0xff]  ;;  %v100_v29 = vld [vmem:[#allocation2 + $0x78] sm:$0xff]  ;;  %v7186_v18 = vcombine.low %v419_v4, %v423_v5 }
  0xc2   :  { %v7149_v34 = vcombine.high %v380_v24, %v384_v26 }
  0xc4   :  { %4059 = vmatpush1.bf16.msra.mxu0 %v7082_v31  ;;  %4274 = vmatpush1.bf16.msra.mxu1 %v7084_v32  ;;  %v7138_v31 = vcombine.low %v371_v9, %v375_v12  ;;  %v7140_v32 = vcombine.low %v372_v13, %v376_v14  ;;  %v7178_v9 = vcombine.low %v411_v60, %v415_v61  ;;  %v427_v12 = vld [vmem:[#allocation5 + $0x9c0] sm:$0xff]  ;;  %v428_v14 = vld [vmem:[#allocation5 + $0x9c8] sm:$0xff] }
  0xc5   :  { %4060 = vmatprep.subr.bf16.mxu0 %v7091_v33  ;;  %4275 = vmatprep.subr.bf16.mxu1 %v7093_v37  ;;  %v7147_v33 = vcombine.high %v379_v20, %v383_v21  ;;  %v8578_v37 = vpack.c.bf16 %v100_v29, %v90_v27  ;;  %v431_v13 = vld [vmem:[#allocation5 + $0x9e0] sm:$0xff]  ;;  %v472_v61 = vld [vmem:[#allocation5 + $0xb28] sm:$0xff] }
  0xc6   :  { %v7194_v27 = vcombine.low %v427_v12, %v431_v13 }
  0xc8   :  { %4061 = vmatpush1.bf16.msra.mxu0 %v7090_v39  ;;  %4276 = vmatpush1.bf16.msra.mxu1 %v7092_v40  ;;  %v392_v39 = vld [vmem:[#allocation5 + $0x8a8] sm:$0xff]  ;;  %v7146_v40 = vcombine.low %v379_v20, %v383_v21  ;;  %v7195_v20 = vcombine.high %v427_v12, %v431_v13  ;;  %v435_v21 = vld [vmem:[#allocation5 + $0xa00] sm:$0xff] }
  0xc9   :  { %4062 = vmatprep.subr.bf16.mxu0 %v7099_v41  ;;  %4277 = vmatprep.subr.bf16.mxu1 %v7101_v45  ;;  %v7148_v41 = vcombine.low %v380_v24, %v384_v26  ;;  %v396_v45 = vld [vmem:[#allocation5 + $0x8c8] sm:$0xff]  ;;  %v7157_v46 = vcombine.high %v388_v38, %v392_v39  ;;  %v7197_v24 = vcombine.high %v428_v14, %v432_v17 }
  0xca   :  { %v440_v26 = vld [vmem:[#allocation5 + $0xa28] sm:$0xff] }
  0xcb   :  { %v488_v13 = vld [vmem:[#allocation5 + $0xba8] sm:$0xff] }
  0xcc   :  { %4063 = vmatpush1.bf16.msra.mxu0 %v7098_v47  ;;  %4278 = vmatpush1.bf16.msra.mxu1 %v7100_v48  ;;  %v400_v47 = vld [vmem:[#allocation5 + $0x8e8] sm:$0xff]  ;;  %v7154_v48 = vcombine.low %v387_v35, %v391_v36 }
  0xcd   :  { %4064 = vmatprep.subr.bf16.mxu0 %v7107_v49  ;;  %4279 = vmatprep.subr.bf16.mxu1 %v7109_v53  ;;  %v7156_v49 = vcombine.low %v388_v38, %v392_v39  ;;  %v404_v53 = vld [vmem:[#allocation5 + $0x908] sm:$0xff]  ;;  %v7165_v54 = vcombine.high %v396_v45, %v400_v47 }
  0xce   :  { %v448_v35 = vld [vmem:[#allocation5 + $0xa68] sm:$0xff] }
  0xd0   :  { %4065 = vmatpush1.bf16.msra.mxu0 %v7106_v55  ;;  %4280 = vmatpush1.bf16.msra.mxu1 %v7108_v56  ;;  %v408_v55 = vld [vmem:[#allocation5 + $0x928] sm:$0xff]  ;;  %v7162_v56 = vcombine.low %v395_v43, %v399_v44 }
  0xd1   :  { %4066 = vmatprep.subr.bf16.mxu0 %v7115_v57  ;;  %4281 = vmatprep.subr.bf16.mxu1 %v7117_v62  ;;  %v7164_v57 = vcombine.low %v396_v45, %v400_v47  ;;  %v412_v62 = vld [vmem:[#allocation5 + $0x948] sm:$0xff]  ;;  %v7173_v63 = vcombine.high %v404_v53, %v408_v55 }
  0xd2   :  { %v456_v44 = vld [vmem:[#allocation5 + $0xaa8] sm:$0xff] }
  0xd4   :  { %4067 = vmatpush1.bf16.msra.mxu0 %v7114_v0  ;;  %4282 = vmatpush1.bf16.msra.mxu1 %v7116_v1  ;;  %v416_v0 = vld [vmem:[#allocation5 + $0x968] sm:$0xff]  ;;  %v7170_v1 = vcombine.low %v403_v51, %v407_v52 }
  0xd5   :  { %4068 = vmatprep.subr.bf16.mxu0 %v7123_v2  ;;  %4283 = vmatprep.subr.bf16.mxu1 %v7125_v6  ;;  %v7172_v2 = vcombine.low %v404_v53, %v408_v55  ;;  %v420_v6 = vld [vmem:[#allocation5 + $0x988] sm:$0xff]  ;;  %v7181_v7 = vcombine.high %v412_v62, %v416_v0 }
  0xd6   :  { %v464_v52 = vld [vmem:[#allocation5 + $0xae8] sm:$0xff] }
  0xd8   :  { %4069 = vmatpush1.bf16.msra.mxu0 %v7122_v8  ;;  %4284 = vmatpush1.bf16.msra.mxu1 %v7124_v10  ;;  %v424_v8 = vld [vmem:[#allocation5 + $0x9a8] sm:$0xff]  ;;  %v7180_v10 = vcombine.low %v412_v62, %v416_v0 }
  0xd9   :  { %4070 = vmatprep.subr.bf16.mxu0 %v7131_v11  ;;  %4285 = vmatprep.subr.bf16.mxu1 %v7133_v16  ;;  %v7187_v11 = vcombine.high %v419_v4, %v423_v5  ;;  %v7189_v16 = vcombine.high %v420_v6, %v424_v8  ;;  %v480_v5 = vld [vmem:[#allocation5 + $0xb68] sm:$0xff] }
  0xdc   :  { %4071 = vmatpush1.bf16.msra.mxu0 %v7130_v19  ;;  %4286 = vmatpush1.bf16.msra.mxu1 %v7132_v22  ;;  %v7188_v19 = vcombine.low %v420_v6, %v424_v8  ;;  %v439_v22 = vld [vmem:[#allocation5 + $0xa20] sm:$0xff] }
  0xdd   :  { %4083 = vmatprep.subr.bf16.mxu0 %v7139_v23  ;;  %4298 = vmatprep.subr.bf16.mxu1 %v7141_v28  ;;  %v436_v23 = vld [vmem:[#allocation5 + $0xa08] sm:$0xff]  ;;  %v7196_v28 = vcombine.low %v428_v14, %v432_v17  ;;  %v7203_v29 = vcombine.high %v435_v21, %v439_v22  ;;  %v7202_v36 = vcombine.low %v435_v21, %v439_v22 }
  0xde   :  { %v7204_v38 = vcombine.low %v436_v23, %v440_v26  ;;  %v496_v22 = vld [vmem:[#allocation5 + $0xbe8] sm:$0xff] }
  0xdf   :  { %4073 = vmatmul.mubr.bf16.vlgmr.msra.gmra.mrb[0].mxu0 %v8576_v30  ;;  %4288 = vmatmul.mubr.bf16.vlgmr.msra.gmra.mrb[0].mxu1 %v8576_v30 }
  0xe0   :  { %4084 = vmatpush1.bf16.msra.mxu0 %v7138_v31  ;;  %4299 = vmatpush1.bf16.msra.mxu1 %v7140_v32  ;;  %v443_v31 = vld [vmem:[#allocation5 + $0xa40] sm:$0xff] }
  0xe1   :  { %4085 = vmatprep.subr.bf16.mxu0 %v7147_v33  ;;  %4300 = vmatprep.subr.bf16.mxu1 %v7149_v34  ;;  %v447_v32 = vld [vmem:[#allocation5 + $0xa60] sm:$0xff]  ;;  %v444_v33 = vld [vmem:[#allocation5 + $0xa48] sm:$0xff]  ;;  %v7205_v34 = vcombine.high %v436_v23, %v440_v26 }
  0xe2   :  { %4115 = vmatprep.mubr.bf16.mxu0 %v8578_v37  ;;  %4330 = vmatprep.mubr.bf16.mxu1 %v8578_v37  ;;  %v7211_v39 = vcombine.high %v443_v31, %v447_v32  ;;  %v7213_v43 = vcombine.high %v444_v33, %v448_v35  ;;  %v7210_v45 = vcombine.low %v443_v31, %v447_v32  ;;  %v504_v31 = vld [vmem:[#allocation5 + $0xc28] sm:$0xff] }
  0xe4   :  { %4086 = vmatpush1.bf16.msra.mxu0 %v7146_v40  ;;  %4301 = vmatpush1.bf16.msra.mxu1 %v7148_v41  ;;  %v451_v40 = vld [vmem:[#allocation5 + $0xa80] sm:$0xff] }
  0xe5   :  { %4087 = vmatprep.subr.bf16.mxu0 %v7155_v42  ;;  %4302 = vmatprep.subr.bf16.mxu1 %v7157_v46  ;;  %v455_v41 = vld [vmem:[#allocation5 + $0xaa0] sm:$0xff]  ;;  %v452_v42 = vld [vmem:[#allocation5 + $0xa88] sm:$0xff]  ;;  %v7212_v46 = vcombine.low %v444_v33, %v448_v35 }
  0xe6   :  { %v7219_v47 = vcombine.high %v451_v40, %v455_v41  ;;  %v7221_v51 = vcombine.high %v452_v42, %v456_v44  ;;  %v7218_v53 = vcombine.low %v451_v40, %v455_v41  ;;  %v89_v33 = vld [vmem:[#allocation2 + $0x20] sm:$0xff]  ;;  %v508_v41 = vld [vmem:[#allocation5 + $0xc48] sm:$0xff] }
  0xe8   :  { %4088 = vmatpush1.bf16.msra.mxu0 %v7154_v48  ;;  %4303 = vmatpush1.bf16.msra.mxu1 %v7156_v49  ;;  %v459_v48 = vld [vmem:[#allocation5 + $0xac0] sm:$0xff] }
  0xe9   :  { %4089 = vmatprep.subr.bf16.mxu0 %v7163_v50  ;;  %4304 = vmatprep.subr.bf16.mxu1 %v7165_v54  ;;  %v463_v49 = vld [vmem:[#allocation5 + $0xae0] sm:$0xff]  ;;  %v460_v50 = vld [vmem:[#allocation5 + $0xac8] sm:$0xff]  ;;  %v7220_v54 = vcombine.low %v452_v42, %v456_v44 }
  0xea   :  { %v7227_v55 = vcombine.high %v459_v48, %v463_v49  ;;  %v7229_v60 = vcombine.high %v460_v50, %v464_v52  ;;  %v7226_v62 = vcombine.low %v459_v48, %v463_v49  ;;  %v512_v42 = vld [vmem:[#allocation5 + $0xc68] sm:$0xff] }
  0xec   :  { %4090 = vmatpush1.bf16.msra.mxu0 %v7162_v56  ;;  %4305 = vmatpush1.bf16.msra.mxu1 %v7164_v57  ;;  %v467_v56 = vld [vmem:[#allocation5 + $0xb00] sm:$0xff] }
  0xed   :  { %4091 = vmatprep.subr.bf16.mxu0 %v7171_v59  ;;  %4306 = vmatprep.subr.bf16.mxu1 %v7173_v63  ;;  %v471_v57 = vld [vmem:[#allocation5 + $0xb20] sm:$0xff]  ;;  %v468_v59 = vld [vmem:[#allocation5 + $0xb08] sm:$0xff]  ;;  %v7228_v63 = vcombine.low %v460_v50, %v464_v52 }
  0xee   :  { %v7235_v0 = vcombine.high %v467_v56, %v471_v57  ;;  %v7237_v4 = vcombine.high %v468_v59, %v472_v61  ;;  %v7234_v6 = vcombine.low %v467_v56, %v471_v57  ;;  %v515_v50 = vld [vmem:[#allocation5 + $0xc80] sm:$0xff]  ;;  %v7276_v57 = vcombine.low %v508_v41, %v512_v42 }
  0xef   :  { %v519_v52 = vld [vmem:[#allocation5 + $0xca0] sm:$0xff] }
  0xf0   :  { %4092 = vmatpush1.bf16.msra.mxu0 %v7170_v1  ;;  %4307 = vmatpush1.bf16.msra.mxu1 %v7172_v2  ;;  %v475_v1 = vld [vmem:[#allocation5 + $0xb40] sm:$0xff] }
  0xf1   :  { %4093 = vmatprep.subr.bf16.mxu0 %v7179_v3  ;;  %4308 = vmatprep.subr.bf16.mxu1 %v7181_v7  ;;  %v479_v2 = vld [vmem:[#allocation5 + $0xb60] sm:$0xff]  ;;  %v476_v3 = vld [vmem:[#allocation5 + $0xb48] sm:$0xff]  ;;  %v7236_v7 = vcombine.low %v468_v59, %v472_v61  ;;  %v7283_v59 = vcombine.high %v515_v50, %v519_v52 }
  0xf2   :  { %v7243_v8 = vcombine.high %v475_v1, %v479_v2  ;;  %v7245_v12 = vcombine.high %v476_v3, %v480_v5  ;;  %v7242_v14 = vcombine.low %v475_v1, %v479_v2  ;;  %v527_v61 = vld [vmem:[#allocation5 + $0xce0] sm:$0xff]  ;;  %v7282_v1 = vcombine.low %v515_v50, %v519_v52  ;;  %v572_v52 = vld [vmem:[#allocation5 + $0xe48] sm:$0xff] }
  0xf3   :  { %v571_v50 = vld [vmem:[#allocation5 + $0xe40] sm:$0xff] }
  0xf4   :  { %4094 = vmatpush1.bf16.msra.mxu0 %v7178_v9  ;;  %4309 = vmatpush1.bf16.msra.mxu1 %v7180_v10  ;;  %v483_v9 = vld [vmem:[#allocation5 + $0xb80] sm:$0xff] }
  0xf5   :  { %4095 = vmatprep.subr.bf16.mxu0 %v7187_v11  ;;  %4310 = vmatprep.subr.bf16.mxu1 %v7189_v16  ;;  %v487_v10 = vld [vmem:[#allocation5 + $0xba0] sm:$0xff]  ;;  %v484_v11 = vld [vmem:[#allocation5 + $0xb88] sm:$0xff]  ;;  %v7244_v16 = vcombine.low %v476_v3, %v480_v5 }
  0xf6   :  { %v7251_v17 = vcombine.high %v483_v9, %v487_v10  ;;  %v7253_v21 = vcombine.high %v484_v11, %v488_v13  ;;  %v7250_v23 = vcombine.low %v483_v9, %v487_v10  ;;  %v7252_v26 = vcombine.low %v484_v11, %v488_v13  ;;  %v531_v5 = vld [vmem:[#allocation5 + $0xd00] sm:$0xff] }
  0xf7   :  { %v539_v13 = vld [vmem:[#allocation5 + $0xd40] sm:$0xff] }
  0xf8   :  { %4096 = vmatpush1.bf16.msra.mxu0 %v7186_v18  ;;  %4311 = vmatpush1.bf16.msra.mxu1 %v7188_v19  ;;  %v491_v18 = vld [vmem:[#allocation5 + $0xbc0] sm:$0xff] }
  0xf9   :  { %4097 = vmatprep.subr.bf16.mxu0 %v7195_v20  ;;  %4312 = vmatprep.subr.bf16.mxu1 %v7197_v24  ;;  %v495_v19 = vld [vmem:[#allocation5 + $0xbe0] sm:$0xff]  ;;  %v492_v20 = vld [vmem:[#allocation5 + $0xbc8] sm:$0xff] }
  0xfa   :  { %v499_v24 = vld [vmem:[#allocation5 + $0xc00] sm:$0xff]  ;;  %v7261_v32 = vcombine.high %v492_v20, %v496_v22  ;;  %v7258_v35 = vcombine.low %v491_v18, %v495_v19 }
  0xfc   :  { %4098 = vmatpush1.bf16.msra.mxu0 %v7194_v27  ;;  %4313 = vmatpush1.bf16.msra.mxu1 %v7196_v28  ;;  %v7259_v27 = vcombine.high %v491_v18, %v495_v19  ;;  %v503_v28 = vld [vmem:[#allocation5 + $0xc20] sm:$0xff] }
  0xfd   :  { %4099 = vmatprep.subr.bf16.mxu0 %v7203_v29  ;;  %4314 = vmatprep.subr.bf16.mxu1 %v7205_v34  ;;  %v500_v29 = vld [vmem:[#allocation5 + $0xc08] sm:$0xff]  ;;  %v99_v34 = vld [vmem:[#allocation2 + $0x70] sm:$0xff]  ;;  %v7267_v40 = vcombine.high %v499_v24, %v503_v28 }
  0xfe   :  { %v7269_v44 = vcombine.high %v500_v29, %v504_v31  ;;  %v7268_v48 = vcombine.low %v500_v29, %v504_v31 }
 0x100   :  { %4100 = vmatpush1.bf16.msra.mxu0 %v7202_v36  ;;  %4315 = vmatpush1.bf16.msra.mxu1 %v7204_v38  ;;  %v507_v36 = vld [vmem:[#allocation5 + $0xc40] sm:$0xff] }
 0x101   :  { %4101 = vmatprep.subr.bf16.mxu0 %v7211_v39  ;;  %4316 = vmatprep.subr.bf16.mxu1 %v7213_v43  ;;  %v511_v38 = vld [vmem:[#allocation5 + $0xc60] sm:$0xff]  ;;  %v7260_v39 = vcombine.low %v492_v20, %v496_v22  ;;  %v92_v43 = vld [vmem:[#allocation2 + $0x38] sm:$0xff] }
 0x102   :  { %v7275_v49 = vcombine.high %v507_v36, %v511_v38  ;;  %v7274_v56 = vcombine.low %v507_v36, %v511_v38  ;;  %v547_v22 = vld [vmem:[#allocation5 + $0xd80] sm:$0xff] }
 0x104   :  { %4102 = vmatpush1.bf16.msra.mxu0 %v7210_v45  ;;  %4317 = vmatpush1.bf16.msra.mxu1 %v7212_v46  ;;  %v102_v45 = vld [vmem:[#allocation2 + $0x88] sm:$0xff]  ;;  %v8584_v46 = vpack.c.bf16 %v99_v34, %v89_v33  ;;  %v559_v33 = vld [vmem:[#allocation5 + $0xde0] sm:$0xff] }
 0x105   :  { %4103 = vmatprep.subr.bf16.mxu0 %v7219_v47  ;;  %4318 = vmatprep.subr.bf16.mxu1 %v7221_v51  ;;  %v7266_v47 = vcombine.low %v499_v24, %v503_v28  ;;  %v7277_v51 = vcombine.high %v508_v41, %v512_v42  ;;  %v548_v24 = vld [vmem:[#allocation5 + $0xd88] sm:$0xff]  ;;  %v563_v41 = vld [vmem:[#allocation5 + $0xe00] sm:$0xff] }
 0x106   :  { %v556_v34 = vld [vmem:[#allocation5 + $0xdc8] sm:$0xff]  ;;  %v567_v42 = vld [vmem:[#allocation5 + $0xe20] sm:$0xff] }
 0x108   :  { %4104 = vmatpush1.bf16.msra.mxu0 %v7218_v53  ;;  %4319 = vmatpush1.bf16.msra.mxu1 %v7220_v54  ;;  %v516_v53 = vld [vmem:[#allocation5 + $0xc88] sm:$0xff] }
 0x109   :  { %4105 = vmatprep.subr.bf16.mxu0 %v7227_v55  ;;  %4320 = vmatprep.subr.bf16.mxu1 %v7229_v60  ;;  %v520_v54 = vld [vmem:[#allocation5 + $0xca8] sm:$0xff]  ;;  %v8586_v55 = vpack.c.bf16 %v102_v45, %v92_v43  ;;  %v523_v60 = vld [vmem:[#allocation5 + $0xcc0] sm:$0xff] }
 0x10a   :  { %v7284_v2 = vcombine.low %v516_v53, %v520_v54  ;;  %v7291_v3 = vcombine.high %v523_v60, %v527_v61  ;;  %v7290_v9 = vcombine.low %v523_v60, %v527_v61  ;;  %v564_v43 = vld [vmem:[#allocation5 + $0xe08] sm:$0xff]  ;;  %v579_v60 = vld [vmem:[#allocation5 + $0xe80] sm:$0xff] }
 0x10b   :  { %v583_v61 = vld [vmem:[#allocation5 + $0xea0] sm:$0xff] }
 0x10c   :  { %4106 = vmatpush1.bf16.msra.mxu0 %v7226_v62  ;;  %4321 = vmatpush1.bf16.msra.mxu1 %v7228_v63  ;;  %v524_v62 = vld [vmem:[#allocation5 + $0xcc8] sm:$0xff]  ;;  %v7285_v63 = vcombine.high %v516_v53, %v520_v54  ;;  %v7330_v54 = vcombine.low %v563_v41, %v567_v42 }
 0x10d   :  { %4107 = vmatprep.subr.bf16.mxu0 %v7235_v0  ;;  %4322 = vmatprep.subr.bf16.mxu1 %v7237_v4  ;;  %v528_v0 = vld [vmem:[#allocation5 + $0xce8] sm:$0xff] }
 0x10e   :  { %v7293_v4 = vcombine.high %v524_v62, %v528_v0  ;;  %v7292_v10 = vcombine.low %v524_v62, %v528_v0  ;;  %v576_v53 = vld [vmem:[#allocation5 + $0xe68] sm:$0xff] }
 0x10f   :  { %v580_v62 = vld [vmem:[#allocation5 + $0xe88] sm:$0xff] }
 0x110   :  { %4108 = vmatpush1.bf16.msra.mxu0 %v7234_v6  ;;  %4323 = vmatpush1.bf16.msra.mxu1 %v7236_v7  ;;  %v535_v6 = vld [vmem:[#allocation5 + $0xd20] sm:$0xff]  ;;  %v532_v7 = vld [vmem:[#allocation5 + $0xd08] sm:$0xff] }
 0x111   :  { %4109 = vmatprep.subr.bf16.mxu0 %v7243_v8  ;;  %4324 = vmatprep.subr.bf16.mxu1 %v7245_v12  ;;  %v536_v8 = vld [vmem:[#allocation5 + $0xd28] sm:$0xff]  ;;  %v7299_v11 = vcombine.high %v531_v5, %v535_v6  ;;  %v7298_v18 = vcombine.low %v531_v5, %v535_v6  ;;  %v591_v5 = vld [vmem:[#allocation5 + $0xee0] sm:$0xff] }
 0x112   :  { %v7301_v12 = vcombine.high %v532_v7, %v536_v8  ;;  %v7300_v19 = vcombine.low %v532_v7, %v536_v8  ;;  %v588_v6 = vld [vmem:[#allocation5 + $0xec8] sm:$0xff]  ;;  %v7346_v8 = vcombine.low %v579_v60, %v583_v61 }
 0x113   :  { %v592_v7 = vld [vmem:[#allocation5 + $0xee8] sm:$0xff] }
 0x114   :  { %4110 = vmatpush1.bf16.msra.mxu0 %v7242_v14  ;;  %4325 = vmatpush1.bf16.msra.mxu1 %v7244_v16  ;;  %v543_v14 = vld [vmem:[#allocation5 + $0xd60] sm:$0xff]  ;;  %v540_v16 = vld [vmem:[#allocation5 + $0xd48] sm:$0xff] }
 0x115   :  { %4111 = vmatprep.subr.bf16.mxu0 %v7251_v17  ;;  %4326 = vmatprep.subr.bf16.mxu1 %v7253_v21  ;;  %v544_v17 = vld [vmem:[#allocation5 + $0xd68] sm:$0xff]  ;;  %v7307_v20 = vcombine.high %v539_v13, %v543_v14 }
 0x116   :  { %v7309_v21 = vcombine.high %v540_v16, %v544_v17  ;;  %v7308_v28 = vcombine.low %v540_v16, %v544_v17  ;;  %v600_v16 = vld [vmem:[#allocation5 + $0xf28] sm:$0xff] }
 0x118   :  { %4112 = vmatpush1.bf16.msra.mxu0 %v7250_v23  ;;  %4327 = vmatpush1.bf16.msra.mxu1 %v7252_v26  ;;  %v551_v23 = vld [vmem:[#allocation5 + $0xda0] sm:$0xff]  ;;  %v552_v26 = vld [vmem:[#allocation5 + $0xda8] sm:$0xff] }
 0x119   :  { %4113 = vmatprep.subr.bf16.mxu0 %v7259_v27  ;;  %4328 = vmatprep.subr.bf16.mxu1 %v7261_v32  ;;  %v7306_v27 = vcombine.low %v539_v13, %v543_v14  ;;  %v7315_v29 = vcombine.high %v547_v22, %v551_v23  ;;  %v7317_v31 = vcombine.high %v548_v24, %v552_v26  ;;  %v555_v32 = vld [vmem:[#allocation5 + $0xdc0] sm:$0xff]  ;;  %v596_v14 = vld [vmem:[#allocation5 + $0xf08] sm:$0xff] }
 0x11a   :  { %v7314_v36 = vcombine.low %v547_v22, %v551_v23  ;;  %v7316_v38 = vcombine.low %v548_v24, %v552_v26  ;;  %v7322_v45 = vcombine.low %v555_v32, %v559_v33  ;;  %v599_v13 = vld [vmem:[#allocation5 + $0xf20] sm:$0xff]  ;;  %v604_v23 = vld [vmem:[#allocation5 + $0xf48] sm:$0xff] }
 0x11b   :  { %v607_v22 = vld [vmem:[#allocation5 + $0xf60] sm:$0xff]  ;;  %v608_v24 = vld [vmem:[#allocation5 + $0xf68] sm:$0xff] }
 0x11c   :  { %4114 = vmatpush1.bf16.msra.mxu0 %v7258_v35  ;;  %4329 = vmatpush1.bf16.msra.mxu1 %v7260_v39  ;;  %v560_v35 = vld [vmem:[#allocation5 + $0xde8] sm:$0xff]  ;;  %v7323_v39 = vcombine.high %v555_v32, %v559_v33  ;;  %v615_v32 = vld [vmem:[#allocation5 + $0xfa0] sm:$0xff] }
 0x11d   :  { %4126 = vmatprep.subr.bf16.mxu0 %v7267_v40  ;;  %4341 = vmatprep.subr.bf16.mxu1 %v7269_v44  ;;  %v7325_v40 = vcombine.high %v556_v34, %v560_v35  ;;  %v568_v44 = vld [vmem:[#allocation5 + $0xe28] sm:$0xff] }
 0x11e   :  { %v612_v33 = vld [vmem:[#allocation5 + $0xf88] sm:$0xff] }
 0x11f   :  { %4116 = vmatmul.mubr.bf16.vlgmr.msra.gmra.mrb[0].mxu0 %v8584_v46  ;;  %4331 = vmatmul.mubr.bf16.vlgmr.msra.gmra.mrb[0].mxu1 %v8584_v46 }
 0x120   :  { %4127 = vmatpush1.bf16.msra.mxu0 %v7266_v47  ;;  %4342 = vmatpush1.bf16.msra.mxu1 %v7268_v48  ;;  %v7324_v47 = vcombine.low %v556_v34, %v560_v35  ;;  %v7331_v48 = vcombine.high %v563_v41, %v567_v42  ;;  %v616_v34 = vld [vmem:[#allocation5 + $0xfa8] sm:$0xff]  ;;  %v623_v41 = vld [vmem:[#allocation5 + $0xfe0] sm:$0xff] }
 0x121   :  { %4128 = vmatprep.subr.bf16.mxu0 %v7275_v49  ;;  %4343 = vmatprep.subr.bf16.mxu1 %v7277_v51  ;;  %v7333_v49 = vcombine.high %v564_v43, %v568_v44  ;;  %v575_v51 = vld [vmem:[#allocation5 + $0xe60] sm:$0xff]  ;;  %v620_v42 = vld [vmem:[#allocation5 + $0xfc8] sm:$0xff] }
 0x122   :  { %4158 = vmatprep.mubr.bf16.mxu0 %v8586_v55  ;;  %4373 = vmatprep.mubr.bf16.mxu1 %v8586_v55  ;;  %v7338_v0 = vcombine.low %v571_v50, %v575_v51 }
 0x124   :  { %4129 = vmatpush1.bf16.msra.mxu0 %v7274_v56  ;;  %4344 = vmatpush1.bf16.msra.mxu1 %v7276_v57  ;;  %v7332_v56 = vcombine.low %v564_v43, %v568_v44  ;;  %v7339_v57 = vcombine.high %v571_v50, %v575_v51  ;;  %v624_v43 = vld [vmem:[#allocation5 + $0xfe8] sm:$0xff]  ;;  %v631_v50 = vld [vmem:[#allocation5 + $0x1020] sm:$0xff] }
 0x125   :  { %4130 = vmatprep.subr.bf16.mxu0 %v7283_v59  ;;  %4345 = vmatprep.subr.bf16.mxu1 %v7285_v63  ;;  %v7341_v59 = vcombine.high %v572_v52, %v576_v53  ;;  %v584_v63 = vld [vmem:[#allocation5 + $0xea8] sm:$0xff] }
 0x126   :  { %v628_v51 = vld [vmem:[#allocation5 + $0x1008] sm:$0xff] }
 0x128   :  { %4131 = vmatpush1.bf16.msra.mxu0 %v7282_v1  ;;  %4346 = vmatpush1.bf16.msra.mxu1 %v7284_v2  ;;  %v7340_v1 = vcombine.low %v572_v52, %v576_v53  ;;  %v7347_v2 = vcombine.high %v579_v60, %v583_v61  ;;  %v632_v52 = vld [vmem:[#allocation5 + $0x1028] sm:$0xff]  ;;  %v635_v61 = vld [vmem:[#allocation5 + $0x1040] sm:$0xff] }
 0x129   :  { %4132 = vmatprep.subr.bf16.mxu0 %v7291_v3  ;;  %4347 = vmatprep.subr.bf16.mxu1 %v7293_v4  ;;  %v7349_v3 = vcombine.high %v580_v62, %v584_v63  ;;  %v587_v4 = vld [vmem:[#allocation5 + $0xec0] sm:$0xff]  ;;  %v7397_v60 = vcombine.high %v628_v51, %v632_v52 }
 0x12a   :  { %v7354_v17 = vcombine.low %v587_v4, %v591_v5 }
 0x12c   :  { %4133 = vmatpush1.bf16.msra.mxu0 %v7290_v9  ;;  %4348 = vmatpush1.bf16.msra.mxu1 %v7292_v10  ;;  %v7348_v9 = vcombine.low %v580_v62, %v584_v63  ;;  %v7355_v10 = vcombine.high %v587_v4, %v591_v5  ;;  %v639_v62 = vld [vmem:[#allocation5 + $0x1060] sm:$0xff]  ;;  %v636_v63 = vld [vmem:[#allocation5 + $0x1048] sm:$0xff]  ;;  %v7396_v5 = vcombine.low %v628_v51, %v632_v52 }
 0x12d   :  { %4134 = vmatprep.subr.bf16.mxu0 %v7299_v11  ;;  %4349 = vmatprep.subr.bf16.mxu1 %v7301_v12  ;;  %v7357_v11 = vcombine.high %v588_v6, %v592_v7  ;;  %v595_v12 = vld [vmem:[#allocation5 + $0xf00] sm:$0xff] }
 0x12e   :  { %v7362_v26 = vcombine.low %v595_v12, %v599_v13 }
 0x130   :  { %4135 = vmatpush1.bf16.msra.mxu0 %v7298_v18  ;;  %4350 = vmatpush1.bf16.msra.mxu1 %v7300_v19  ;;  %v7356_v18 = vcombine.low %v588_v6, %v592_v7  ;;  %v7363_v19 = vcombine.high %v595_v12, %v599_v13  ;;  %v7403_v6 = vcombine.high %v635_v61, %v639_v62  ;;  %v648_v12 = vld [vmem:[#allocation5 + $0x10a8] sm:$0xff] }
 0x131   :  { %4136 = vmatprep.subr.bf16.mxu0 %v7307_v20  ;;  %4351 = vmatprep.subr.bf16.mxu1 %v7309_v21  ;;  %v7365_v20 = vcombine.high %v596_v14, %v600_v16  ;;  %v603_v21 = vld [vmem:[#allocation5 + $0xf40] sm:$0xff]  ;;  %v7402_v13 = vcombine.low %v635_v61, %v639_v62 }
 0x132   :  { %v7370_v35 = vcombine.low %v603_v21, %v607_v22 }
 0x134   :  { %4137 = vmatpush1.bf16.msra.mxu0 %v7306_v27  ;;  %4352 = vmatpush1.bf16.msra.mxu1 %v7308_v28  ;;  %v7364_v27 = vcombine.low %v596_v14, %v600_v16  ;;  %v7371_v28 = vcombine.high %v603_v21, %v607_v22  ;;  %v656_v21 = vld [vmem:[#allocation5 + $0x10e8] sm:$0xff] }
 0x135   :  { %4138 = vmatprep.subr.bf16.mxu0 %v7315_v29  ;;  %4353 = vmatprep.subr.bf16.mxu1 %v7317_v31  ;;  %v7373_v29 = vcombine.high %v604_v23, %v608_v24  ;;  %v611_v31 = vld [vmem:[#allocation5 + $0xf80] sm:$0xff] }
 0x136   :  { %v7378_v44 = vcombine.low %v611_v31, %v615_v32 }
 0x138   :  { %4139 = vmatpush1.bf16.msra.mxu0 %v7314_v36  ;;  %4354 = vmatpush1.bf16.msra.mxu1 %v7316_v38  ;;  %v7372_v36 = vcombine.low %v604_v23, %v608_v24  ;;  %v7379_v38 = vcombine.high %v611_v31, %v615_v32  ;;  %v664_v31 = vld [vmem:[#allocation5 + $0x1128] sm:$0xff] }
 0x139   :  { %4140 = vmatprep.subr.bf16.mxu0 %v7323_v39  ;;  %4355 = vmatprep.subr.bf16.mxu1 %v7325_v40  ;;  %v7381_v39 = vcombine.high %v612_v33, %v616_v34  ;;  %v619_v40 = vld [vmem:[#allocation5 + $0xfc0] sm:$0xff] }
 0x13a   :  { %v7386_v53 = vcombine.low %v619_v40, %v623_v41 }
 0x13c   :  { %4141 = vmatpush1.bf16.msra.mxu0 %v7322_v45  ;;  %4356 = vmatpush1.bf16.msra.mxu1 %v7324_v47  ;;  %v7380_v45 = vcombine.low %v612_v33, %v616_v34  ;;  %v7387_v47 = vcombine.high %v619_v40, %v623_v41  ;;  %v672_v40 = vld [vmem:[#allocation5 + $0x1168] sm:$0xff] }
 0x13d   :  { %4142 = vmatprep.subr.bf16.mxu0 %v7331_v48  ;;  %4357 = vmatprep.subr.bf16.mxu1 %v7333_v49  ;;  %v7389_v48 = vcombine.high %v620_v42, %v624_v43  ;;  %v627_v49 = vld [vmem:[#allocation5 + $0x1000] sm:$0xff] }
 0x13e   :  { %v7394_v4 = vcombine.low %v627_v49, %v631_v50 }
 0x140   :  { %4143 = vmatpush1.bf16.msra.mxu0 %v7330_v54  ;;  %4358 = vmatpush1.bf16.msra.mxu1 %v7332_v56  ;;  %v91_v54 = vld [vmem:[#allocation2 + $0x30] sm:$0xff]  ;;  %v101_v56 = vld [vmem:[#allocation2 + $0x80] sm:$0xff] }
 0x141   :  { %4144 = vmatprep.subr.bf16.mxu0 %v7339_v57  ;;  %4359 = vmatprep.subr.bf16.mxu1 %v7341_v59  ;;  %v7388_v57 = vcombine.low %v620_v42, %v624_v43  ;;  %v7395_v59 = vcombine.high %v627_v49, %v631_v50  ;;  %v680_v49 = vld [vmem:[#allocation5 + $0x11a8] sm:$0xff] }
 0x144   :  { %4145 = vmatpush1.bf16.msra.mxu0 %v7338_v0  ;;  %4360 = vmatpush1.bf16.msra.mxu1 %v7340_v1  ;;  %v8592_v0 = vpack.c.bf16 %v101_v56, %v91_v54  ;;  %v640_v1 = vld [vmem:[#allocation5 + $0x1068] sm:$0xff]  ;;  %v683_v54 = vld [vmem:[#allocation5 + $0x11c0] sm:$0xff] }
 0x145   :  { %4146 = vmatprep.subr.bf16.mxu0 %v7347_v2  ;;  %4361 = vmatprep.subr.bf16.mxu1 %v7349_v3  ;;  %v94_v2 = vld [vmem:[#allocation2 + $0x48] sm:$0xff]  ;;  %v104_v3 = vld [vmem:[#allocation2 + $0x98] sm:$0xff]  ;;  %v7405_v7 = vcombine.high %v636_v63, %v640_v1  ;;  %v7404_v14 = vcombine.low %v636_v63, %v640_v1  ;;  %v687_v56 = vld [vmem:[#allocation5 + $0x11e0] sm:$0xff] }
 0x146   :  { %v7451_v62 = vcombine.high %v683_v54, %v687_v56  ;;  %v691_v1 = vld [vmem:[#allocation5 + $0x1200] sm:$0xff] }
 0x148   :  { %4147 = vmatpush1.bf16.msra.mxu0 %v7346_v8  ;;  %4362 = vmatpush1.bf16.msra.mxu1 %v7348_v9  ;;  %v643_v8 = vld [vmem:[#allocation5 + $0x1080] sm:$0xff] }
 0x149   :  { %4148 = vmatprep.subr.bf16.mxu0 %v7355_v10  ;;  %4363 = vmatprep.subr.bf16.mxu1 %v7357_v11  ;;  %v647_v9 = vld [vmem:[#allocation5 + $0x10a0] sm:$0xff]  ;;  %v8594_v10 = vpack.c.bf16 %v104_v3, %v94_v2  ;;  %v644_v11 = vld [vmem:[#allocation5 + $0x1088] sm:$0xff] }
 0x14a   :  { %v7411_v16 = vcombine.high %v643_v8, %v647_v9  ;;  %v7410_v22 = vcombine.low %v643_v8, %v647_v9  ;;  %v7412_v23 = vcombine.low %v644_v11, %v648_v12  ;;  %v695_v2 = vld [vmem:[#allocation5 + $0x1220] sm:$0xff]  ;;  %v692_v3 = vld [vmem:[#allocation5 + $0x1208] sm:$0xff] }
 0x14b   :  { %v699_v9 = vld [vmem:[#allocation5 + $0x1240] sm:$0xff] }
 0x14c   :  { %4149 = vmatpush1.bf16.msra.mxu0 %v7354_v17  ;;  %4364 = vmatpush1.bf16.msra.mxu1 %v7356_v18  ;;  %v7413_v17 = vcombine.high %v644_v11, %v648_v12  ;;  %v651_v18 = vld [vmem:[#allocation5 + $0x10c0] sm:$0xff]  ;;  %v700_v12 = vld [vmem:[#allocation5 + $0x1248] sm:$0xff] }
 0x14d   :  { %4150 = vmatprep.subr.bf16.mxu0 %v7363_v19  ;;  %4365 = vmatprep.subr.bf16.mxu1 %v7365_v20  ;;  %v655_v19 = vld [vmem:[#allocation5 + $0x10e0] sm:$0xff]  ;;  %v652_v20 = vld [vmem:[#allocation5 + $0x10c8] sm:$0xff] }
 0x14e   :  { %v7419_v24 = vcombine.high %v651_v18, %v655_v19  ;;  %v7418_v32 = vcombine.low %v651_v18, %v655_v19  ;;  %v7420_v33 = vcombine.low %v652_v20, %v656_v21  ;;  %v703_v11 = vld [vmem:[#allocation5 + $0x1260] sm:$0xff] }
 0x14f   :  { %v707_v19 = vld [vmem:[#allocation5 + $0x1280] sm:$0xff] }
 0x150   :  { %4151 = vmatpush1.bf16.msra.mxu0 %v7362_v26  ;;  %4366 = vmatpush1.bf16.msra.mxu1 %v7364_v27  ;;  %v7421_v26 = vcombine.high %v652_v20, %v656_v21  ;;  %v659_v27 = vld [vmem:[#allocation5 + $0x1100] sm:$0xff]  ;;  %v708_v21 = vld [vmem:[#allocation5 + $0x1288] sm:$0xff] }
 0x151   :  { %4152 = vmatprep.subr.bf16.mxu0 %v7371_v28  ;;  %4367 = vmatprep.subr.bf16.mxu1 %v7373_v29  ;;  %v663_v28 = vld [vmem:[#allocation5 + $0x1120] sm:$0xff]  ;;  %v660_v29 = vld [vmem:[#allocation5 + $0x1108] sm:$0xff] }
 0x152   :  { %v7427_v34 = vcombine.high %v659_v27, %v663_v28  ;;  %v7426_v41 = vcombine.low %v659_v27, %v663_v28  ;;  %v7428_v42 = vcombine.low %v660_v29, %v664_v31  ;;  %v711_v20 = vld [vmem:[#allocation5 + $0x12a0] sm:$0xff] }
 0x153   :  { %v715_v28 = vld [vmem:[#allocation5 + $0x12c0] sm:$0xff] }
 0x154   :  { %4153 = vmatpush1.bf16.msra.mxu0 %v7370_v35  ;;  %4368 = vmatpush1.bf16.msra.mxu1 %v7372_v36  ;;  %v7429_v35 = vcombine.high %v660_v29, %v664_v31  ;;  %v667_v36 = vld [vmem:[#allocation5 + $0x1140] sm:$0xff]  ;;  %v716_v31 = vld [vmem:[#allocation5 + $0x12c8] sm:$0xff] }
 0x155   :  { %4154 = vmatprep.subr.bf16.mxu0 %v7379_v38  ;;  %4369 = vmatprep.subr.bf16.mxu1 %v7381_v39  ;;  %v671_v38 = vld [vmem:[#allocation5 + $0x1160] sm:$0xff]  ;;  %v668_v39 = vld [vmem:[#allocation5 + $0x1148] sm:$0xff] }
 0x156   :  { %v7435_v43 = vcombine.high %v667_v36, %v671_v38  ;;  %v7434_v50 = vcombine.low %v667_v36, %v671_v38  ;;  %v7436_v51 = vcombine.low %v668_v39, %v672_v40  ;;  %v719_v29 = vld [vmem:[#allocation5 + $0x12e0] sm:$0xff] }
 0x157   :  { %v723_v38 = vld [vmem:[#allocation5 + $0x1300] sm:$0xff] }
 0x158   :  { %4155 = vmatpush1.bf16.msra.mxu0 %v7378_v44  ;;  %4370 = vmatpush1.bf16.msra.mxu1 %v7380_v45  ;;  %v7437_v44 = vcombine.high %v668_v39, %v672_v40  ;;  %v675_v45 = vld [vmem:[#allocation5 + $0x1180] sm:$0xff]  ;;  %v724_v40 = vld [vmem:[#allocation5 + $0x1308] sm:$0xff] }
 0x159   :  { %4156 = vmatprep.subr.bf16.mxu0 %v7387_v47  ;;  %4371 = vmatprep.subr.bf16.mxu1 %v7389_v48  ;;  %v679_v47 = vld [vmem:[#allocation5 + $0x11a0] sm:$0xff]  ;;  %v676_v48 = vld [vmem:[#allocation5 + $0x1188] sm:$0xff] }
 0x15a   :  { %v7443_v52 = vcombine.high %v675_v45, %v679_v47  ;;  %v7444_v61 = vcombine.low %v676_v48, %v680_v49  ;;  %v727_v39 = vld [vmem:[#allocation5 + $0x1320] sm:$0xff] }
 0x15c   :  { %4157 = vmatpush1.bf16.msra.mxu0 %v7386_v53  ;;  %4372 = vmatpush1.bf16.msra.mxu1 %v7388_v57  ;;  %v7445_v53 = vcombine.high %v676_v48, %v680_v49  ;;  %v684_v57 = vld [vmem:[#allocation5 + $0x11c8] sm:$0xff]  ;;  %v735_v48 = vld [vmem:[#allocation5 + $0x1360] sm:$0xff] }
 0x15d   :  { %4169 = vmatprep.subr.bf16.mxu0 %v7395_v59  ;;  %4384 = vmatprep.subr.bf16.mxu1 %v7397_v60  ;;  %v688_v59 = vld [vmem:[#allocation5 + $0x11e8] sm:$0xff]  ;;  %v7442_v60 = vcombine.low %v675_v45, %v679_v47  ;;  %v731_v47 = vld [vmem:[#allocation5 + $0x1340] sm:$0xff] }
 0x15e   :  { %v7453_v63 = vcombine.high %v684_v57, %v688_v59  ;;  %v732_v49 = vld [vmem:[#allocation5 + $0x1348] sm:$0xff] }
 0x15f   :  { %4159 = vmatmul.mubr.bf16.vlgmr.msra.gmra.mrb[0].mxu0 %v8592_v0  ;;  %4374 = vmatmul.mubr.bf16.vlgmr.msra.gmra.mrb[0].mxu1 %v8592_v0 }
 0x160   :  { %4170 = vmatpush1.bf16.msra.mxu0 %v7394_v4  ;;  %4385 = vmatpush1.bf16.msra.mxu1 %v7396_v5  ;;  %v696_v4 = vld [vmem:[#allocation5 + $0x1228] sm:$0xff]  ;;  %v7450_v5 = vcombine.low %v683_v54, %v687_v56  ;;  %v739_v56 = vld [vmem:[#allocation5 + $0x1380] sm:$0xff] }
 0x161   :  { %4171 = vmatprep.subr.bf16.mxu0 %v7403_v6  ;;  %4386 = vmatprep.subr.bf16.mxu1 %v7405_v7  ;;  %v7452_v6 = vcombine.low %v684_v57, %v688_v59  ;;  %v7459_v7 = vcombine.high %v691_v1, %v695_v2  ;;  %v7461_v8 = vcombine.high %v692_v3, %v696_v4  ;;  %v743_v57 = vld [vmem:[#allocation5 + $0x13a0] sm:$0xff]  ;;  %v740_v59 = vld [vmem:[#allocation5 + $0x1388] sm:$0xff] }
 0x162   :  { %4201 = vmatprep.mubr.bf16.mxu0 %v8594_v10  ;;  %4416 = vmatprep.mubr.bf16.mxu1 %v8594_v10 }
 0x164   :  { %4172 = vmatpush1.bf16.msra.mxu0 %v7402_v13  ;;  %4387 = vmatpush1.bf16.msra.mxu1 %v7404_v14  ;;  %v704_v13 = vld [vmem:[#allocation5 + $0x1268] sm:$0xff]  ;;  %v7458_v14 = vcombine.low %v691_v1, %v695_v2  ;;  %v747_v2 = vld [vmem:[#allocation5 + $0x13c0] sm:$0xff] }
 0x165   :  { %4173 = vmatprep.subr.bf16.mxu0 %v7411_v16  ;;  %4388 = vmatprep.subr.bf16.mxu1 %v7413_v17  ;;  %v7460_v16 = vcombine.low %v692_v3, %v696_v4  ;;  %v7467_v17 = vcombine.high %v699_v9, %v703_v11  ;;  %v7469_v18 = vcombine.high %v700_v12, %v704_v13  ;;  %v751_v3 = vld [vmem:[#allocation5 + $0x13e0] sm:$0xff]  ;;  %v748_v4 = vld [vmem:[#allocation5 + $0x13c8] sm:$0xff] }
 0x168   :  { %4174 = vmatpush1.bf16.msra.mxu0 %v7410_v22  ;;  %4389 = vmatpush1.bf16.msra.mxu1 %v7412_v23  ;;  %v712_v22 = vld [vmem:[#allocation5 + $0x12a8] sm:$0xff]  ;;  %v7466_v23 = vcombine.low %v699_v9, %v703_v11  ;;  %v117_v11 = vld [vmem:[#allocation5 + $0x10] sm:$0xff] }
 0x169   :  { %4175 = vmatprep.subr.bf16.mxu0 %v7419_v24  ;;  %4390 = vmatprep.subr.bf16.mxu1 %v7421_v26  ;;  %v7468_v24 = vcombine.low %v700_v12, %v704_v13  ;;  %v7475_v26 = vcombine.high %v707_v19, %v711_v20  ;;  %v7477_v27 = vcombine.high %v708_v21, %v712_v22  ;;  %v121_v12 = vld [vmem:[#allocation5 + $0x30] sm:$0xff]  ;;  %v118_v13 = vld [vmem:[#allocation5 + $0x18] sm:$0xff] }
 0x16c   :  { %4176 = vmatpush1.bf16.msra.mxu0 %v7418_v32  ;;  %4391 = vmatpush1.bf16.msra.mxu1 %v7420_v33  ;;  %v720_v32 = vld [vmem:[#allocation5 + $0x12e8] sm:$0xff]  ;;  %v7474_v33 = vcombine.low %v707_v19, %v711_v20  ;;  %v6887_v20 = vcombine.high %v117_v11, %v121_v12 }
 0x16d   :  { %4177 = vmatprep.subr.bf16.mxu0 %v7427_v34  ;;  %4392 = vmatprep.subr.bf16.mxu1 %v7429_v35  ;;  %v7476_v34 = vcombine.low %v708_v21, %v712_v22  ;;  %v7483_v35 = vcombine.high %v715_v28, %v719_v29  ;;  %v7485_v36 = vcombine.high %v716_v31, %v720_v32  ;;  %v125_v22 = vld [vmem:[#allocation5 + $0x50] sm:$0xff] }
 0x170   :  { %4178 = vmatpush1.bf16.msra.mxu0 %v7426_v41  ;;  %4393 = vmatpush1.bf16.msra.mxu1 %v7428_v42  ;;  %v728_v41 = vld [vmem:[#allocation5 + $0x1328] sm:$0xff]  ;;  %v7482_v42 = vcombine.low %v715_v28, %v719_v29  ;;  %v6886_v28 = vcombine.low %v117_v11, %v121_v12 }
 0x171   :  { %4179 = vmatprep.subr.bf16.mxu0 %v7435_v43  ;;  %4394 = vmatprep.subr.bf16.mxu1 %v7437_v44  ;;  %v7484_v43 = vcombine.low %v716_v31, %v720_v32  ;;  %v7491_v44 = vcombine.high %v723_v38, %v727_v39  ;;  %v7493_v45 = vcombine.high %v724_v40, %v728_v41 }
 0x174   :  { %4180 = vmatpush1.bf16.msra.mxu0 %v7434_v50  ;;  %4395 = vmatpush1.bf16.msra.mxu1 %v7436_v51  ;;  %v736_v50 = vld [vmem:[#allocation5 + $0x1368] sm:$0xff]  ;;  %v7490_v51 = vcombine.low %v723_v38, %v727_v39 }
 0x175   :  { %4181 = vmatprep.subr.bf16.mxu0 %v7443_v52  ;;  %4396 = vmatprep.subr.bf16.mxu1 %v7445_v53  ;;  %v7492_v52 = vcombine.low %v724_v40, %v728_v41  ;;  %v7499_v53 = vcombine.high %v731_v47, %v735_v48  ;;  %v7501_v54 = vcombine.high %v732_v49, %v736_v50 }
 0x178   :  { %4182 = vmatpush1.bf16.msra.mxu0 %v7442_v60  ;;  %4397 = vmatpush1.bf16.msra.mxu1 %v7444_v61  ;;  %v744_v60 = vld [vmem:[#allocation5 + $0x13a8] sm:$0xff]  ;;  %v7498_v61 = vcombine.low %v731_v47, %v735_v48 }
 0x179   :  { %4183 = vmatprep.subr.bf16.mxu0 %v7451_v62  ;;  %4398 = vmatprep.subr.bf16.mxu1 %v7453_v63  ;;  %v7500_v62 = vcombine.low %v732_v49, %v736_v50  ;;  %v7507_v63 = vcombine.high %v739_v56, %v743_v57  ;;  %v7509_v1 = vcombine.high %v740_v59, %v744_v60 }
 0x17c   :  { %4184 = vmatpush1.bf16.msra.mxu0 %v7450_v5  ;;  %4399 = vmatpush1.bf16.msra.mxu1 %v7452_v6  ;;  %v752_v5 = vld [vmem:[#allocation5 + $0x13e8] sm:$0xff]  ;;  %v7506_v6 = vcombine.low %v739_v56, %v743_v57 }
 0x17d   :  { %4185 = vmatprep.subr.bf16.mxu0 %v7459_v7  ;;  %4400 = vmatprep.subr.bf16.mxu1 %v7461_v8  ;;  %v7508_v7 = vcombine.low %v740_v59, %v744_v60  ;;  %v7515_v8 = vcombine.high %v747_v2, %v751_v3  ;;  %v7517_v9 = vcombine.high %v748_v4, %v752_v5  ;;  %v157_v60 = vld [vmem:[#allocation5 + $0x150] sm:$0xff] }
 0x17e   :  { %v7516_v19 = vcombine.low %v748_v4, %v752_v5  ;;  %v165_v5 = vld [vmem:[#allocation5 + $0x190] sm:$0xff] }
 0x180   :  { %4186 = vmatpush1.bf16.msra.mxu0 %v7458_v14  ;;  %4401 = vmatpush1.bf16.msra.mxu1 %v7460_v16  ;;  %v122_v14 = vld [vmem:[#allocation5 + $0x38] sm:$0xff]  ;;  %v7514_v16 = vcombine.low %v747_v2, %v751_v3 }
 0x181   :  { %4187 = vmatprep.subr.bf16.mxu0 %v7467_v17  ;;  %4402 = vmatprep.subr.bf16.mxu1 %v7469_v18  ;;  %v93_v17 = vld [vmem:[#allocation2 + $0x40] sm:$0xff]  ;;  %v103_v18 = vld [vmem:[#allocation2 + $0x90] sm:$0xff]  ;;  %v6889_v21 = vcombine.high %v118_v13, %v122_v14  ;;  %v6888_v29 = vcombine.low %v118_v13, %v122_v14 }
 0x182   :  { %v173_v14 = vld [vmem:[#allocation5 + $0x1d0] sm:$0xff] }
 0x184   :  { %4188 = vmatpush1.bf16.msra.mxu0 %v7466_v23  ;;  %4403 = vmatpush1.bf16.msra.mxu1 %v7468_v24  ;;  %v129_v23 = vld [vmem:[#allocation5 + $0x70] sm:$0xff]  ;;  %v8600_v24 = vpack.c.bf16 %v103_v18, %v93_v17  ;;  %v174_v17 = vld [vmem:[#allocation5 + $0x1d8] sm:$0xff] }
 0x185   :  { %4189 = vmatprep.subr.bf16.mxu0 %v7475_v26  ;;  %4404 = vmatprep.subr.bf16.mxu1 %v7477_v27  ;;  %v126_v26 = vld [vmem:[#allocation5 + $0x58] sm:$0xff]  ;;  %v6895_v31 = vcombine.high %v125_v22, %v129_v23  ;;  %v6894_v38 = vcombine.low %v125_v22, %v129_v23  ;;  %v181_v23 = vld [vmem:[#allocation5 + $0x210] sm:$0xff] }
 0x186   :  { %v130_v27 = vld [vmem:[#allocation5 + $0x78] sm:$0xff] }
 0x187   :  { %v6897_v32 = vcombine.high %v126_v26, %v130_v27  ;;  %v6896_v39 = vcombine.low %v126_v26, %v130_v27  ;;  %v178_v18 = vld [vmem:[#allocation5 + $0x1f8] sm:$0xff]  ;;  %v185_v26 = vld [vmem:[#allocation5 + $0x230] sm:$0xff] }
 0x188   :  { %4190 = vmatpush1.bf16.msra.mxu0 %v7474_v33  ;;  %4405 = vmatpush1.bf16.msra.mxu1 %v7476_v34  ;;  %v133_v33 = vld [vmem:[#allocation5 + $0x90] sm:$0xff]  ;;  %v6945_v22 = vcombine.high %v174_v17, %v178_v18  ;;  %v182_v27 = vld [vmem:[#allocation5 + $0x218] sm:$0xff] }
 0x189   :  { %4191 = vmatprep.subr.bf16.mxu0 %v7483_v35  ;;  %4406 = vmatprep.subr.bf16.mxu1 %v7485_v36  ;;  %v137_v34 = vld [vmem:[#allocation5 + $0xb0] sm:$0xff]  ;;  %v134_v35 = vld [vmem:[#allocation5 + $0x98] sm:$0xff] }
 0x18a   :  { %v138_v36 = vld [vmem:[#allocation5 + $0xb8] sm:$0xff]  ;;  %v6903_v40 = vcombine.high %v133_v33, %v137_v34  ;;  %v6902_v47 = vcombine.low %v133_v33, %v137_v34  ;;  %v189_v34 = vld [vmem:[#allocation5 + $0x250] sm:$0xff] }
 0x18b   :  { %v6905_v41 = vcombine.high %v134_v35, %v138_v36  ;;  %v6904_v48 = vcombine.low %v134_v35, %v138_v36  ;;  %v193_v35 = vld [vmem:[#allocation5 + $0x270] sm:$0xff]  ;;  %v190_v36 = vld [vmem:[#allocation5 + $0x258] sm:$0xff] }
 0x18c   :  { %4192 = vmatpush1.bf16.msra.mxu0 %v7482_v42  ;;  %4407 = vmatpush1.bf16.msra.mxu1 %v7484_v43  ;;  %v141_v42 = vld [vmem:[#allocation5 + $0xd0] sm:$0xff] }
 0x18d   :  { %4193 = vmatprep.subr.bf16.mxu0 %v7491_v44  ;;  %4408 = vmatprep.subr.bf16.mxu1 %v7493_v45  ;;  %v145_v43 = vld [vmem:[#allocation5 + $0xf0] sm:$0xff]  ;;  %v142_v44 = vld [vmem:[#allocation5 + $0xd8] sm:$0xff] }
 0x18e   :  { %v146_v45 = vld [vmem:[#allocation5 + $0xf8] sm:$0xff]  ;;  %v6911_v49 = vcombine.high %v141_v42, %v145_v43  ;;  %v6910_v56 = vcombine.low %v141_v42, %v145_v43  ;;  %v197_v43 = vld [vmem:[#allocation5 + $0x290] sm:$0xff] }
 0x18f   :  { %v6913_v50 = vcombine.high %v142_v44, %v146_v45  ;;  %v6912_v57 = vcombine.low %v142_v44, %v146_v45  ;;  %v201_v44 = vld [vmem:[#allocation5 + $0x2b0] sm:$0xff]  ;;  %v198_v45 = vld [vmem:[#allocation5 + $0x298] sm:$0xff] }
 0x190   :  { %4194 = vmatpush1.bf16.msra.mxu0 %v7490_v51  ;;  %4409 = vmatpush1.bf16.msra.mxu1 %v7492_v52  ;;  %v149_v51 = vld [vmem:[#allocation5 + $0x110] sm:$0xff] }
 0x191   :  { %4195 = vmatprep.subr.bf16.mxu0 %v7499_v53  ;;  %4410 = vmatprep.subr.bf16.mxu1 %v7501_v54  ;;  %v153_v52 = vld [vmem:[#allocation5 + $0x130] sm:$0xff]  ;;  %v150_v53 = vld [vmem:[#allocation5 + $0x118] sm:$0xff] }
 0x192   :  { %v154_v54 = vld [vmem:[#allocation5 + $0x138] sm:$0xff]  ;;  %v6919_v59 = vcombine.high %v149_v51, %v153_v52 }
 0x193   :  { %v6920_v2 = vcombine.low %v150_v53, %v154_v54 }
 0x194   :  { %4196 = vmatpush1.bf16.msra.mxu0 %v7498_v61  ;;  %4411 = vmatpush1.bf16.msra.mxu1 %v7500_v62  ;;  %v161_v61 = vld [vmem:[#allocation5 + $0x170] sm:$0xff]  ;;  %v158_v62 = vld [vmem:[#allocation5 + $0x158] sm:$0xff] }
 0x195   :  { %4197 = vmatprep.subr.bf16.mxu0 %v7507_v63  ;;  %4412 = vmatprep.subr.bf16.mxu1 %v7509_v1  ;;  %v162_v63 = vld [vmem:[#allocation5 + $0x178] sm:$0xff]  ;;  %v6918_v1 = vcombine.low %v149_v51, %v153_v52  ;;  %v6927_v3 = vcombine.high %v157_v60, %v161_v61  ;;  %v205_v52 = vld [vmem:[#allocation5 + $0x2d0] sm:$0xff] }
 0x196   :  { %v6929_v4 = vcombine.high %v158_v62, %v162_v63  ;;  %v6928_v11 = vcombine.low %v158_v62, %v162_v63  ;;  %v217_v62 = vld [vmem:[#allocation5 + $0x330] sm:$0xff]  ;;  %v214_v63 = vld [vmem:[#allocation5 + $0x318] sm:$0xff] }
 0x198   :  { %4198 = vmatpush1.bf16.msra.mxu0 %v7506_v6  ;;  %4413 = vmatpush1.bf16.msra.mxu1 %v7508_v7  ;;  %v169_v6 = vld [vmem:[#allocation5 + $0x1b0] sm:$0xff]  ;;  %v166_v7 = vld [vmem:[#allocation5 + $0x198] sm:$0xff] }
 0x199   :  { %4199 = vmatprep.subr.bf16.mxu0 %v7515_v8  ;;  %4414 = vmatprep.subr.bf16.mxu1 %v7517_v9  ;;  %v170_v8 = vld [vmem:[#allocation5 + $0x1b8] sm:$0xff]  ;;  %v6926_v9 = vcombine.low %v157_v60, %v161_v61  ;;  %v6935_v12 = vcombine.high %v165_v5, %v169_v6  ;;  %v213_v61 = vld [vmem:[#allocation5 + $0x310] sm:$0xff] }
 0x19a   :  { %v6937_v13 = vcombine.high %v166_v7, %v170_v8 }
 0x19c   :  { %4200 = vmatpush1.bf16.msra.mxu0 %v7514_v16  ;;  %4415 = vmatpush1.bf16.msra.mxu1 %v7516_v19  ;;  %v177_v16 = vld [vmem:[#allocation5 + $0x1f0] sm:$0xff]  ;;  %v6934_v19 = vcombine.low %v165_v5, %v169_v6 }
 0x19d   :  { %4427 = vmatprep.subr.bf16.mxu0 %v6887_v20  ;;  %4642 = vmatprep.subr.bf16.mxu1 %v6889_v21  ;;  %v6936_v20 = vcombine.low %v166_v7, %v170_v8  ;;  %v6943_v21 = vcombine.high %v173_v14, %v177_v16  ;;  %v221_v6 = vld [vmem:[#allocation5 + $0x350] sm:$0xff]  ;;  %v222_v8 = vld [vmem:[#allocation5 + $0x358] sm:$0xff] }
 0x19e   :  { %v225_v7 = vld [vmem:[#allocation5 + $0x370] sm:$0xff] }
 0x19f   :  { %4202 = vmatmul.mubr.bf16.vlgmr.msra.gmra.mrb[0].mxu0 %v8600_v24  ;;  %4417 = vmatmul.mubr.bf16.vlgmr.msra.gmra.mrb[0].mxu1 %v8600_v24 }
 0x1a0   :  { %4428 = vmatpush1.bf16.msra.mxu0 %v6886_v28  ;;  %4643 = vmatpush1.bf16.msra.mxu1 %v6888_v29  ;;  %v186_v28 = vld [vmem:[#allocation5 + $0x238] sm:$0xff]  ;;  %v6942_v29 = vcombine.low %v173_v14, %v177_v16  ;;  %v229_v16 = vld [vmem:[#allocation5 + $0x390] sm:$0xff] }
 0x1a1   :  { %4429 = vmatprep.subr.bf16.mxu0 %v6895_v31  ;;  %4644 = vmatprep.subr.bf16.mxu1 %v6897_v32  ;;  %v6944_v31 = vcombine.low %v174_v17, %v178_v18  ;;  %v6951_v32 = vcombine.high %v181_v23, %v185_v26  ;;  %v6953_v33 = vcombine.high %v182_v27, %v186_v28  ;;  %v233_v17 = vld [vmem:[#allocation5 + $0x3b0] sm:$0xff]  ;;  %v230_v18 = vld [vmem:[#allocation5 + $0x398] sm:$0xff] }
 0x1a2   :  { %4459 = vmatprep.mubr.bf16.mxu0 %v8564_v58  ;;  %4674 = vmatprep.mubr.bf16.mxu1 %v8564_v58  ;;  %v6921_v58 = vcombine.high %v150_v53, %v154_v54  ;;  %v209_v53 = vld [vmem:[#allocation5 + $0x2f0] sm:$0xff]  ;;  %v206_v54 = vld [vmem:[#allocation5 + $0x2d8] sm:$0xff] }
 0x1a4   :  { %4430 = vmatpush1.bf16.msra.mxu0 %v6894_v38  ;;  %4645 = vmatpush1.bf16.msra.mxu1 %v6896_v39  ;;  %v194_v38 = vld [vmem:[#allocation5 + $0x278] sm:$0xff]  ;;  %v6950_v39 = vcombine.low %v181_v23, %v185_v26  ;;  %v237_v26 = vld [vmem:[#allocation5 + $0x3d0] sm:$0xff] }
 0x1a5   :  { %4431 = vmatprep.subr.bf16.mxu0 %v6903_v40  ;;  %4646 = vmatprep.subr.bf16.mxu1 %v6905_v41  ;;  %v6952_v40 = vcombine.low %v182_v27, %v186_v28  ;;  %v6959_v41 = vcombine.high %v189_v34, %v193_v35  ;;  %v6961_v42 = vcombine.high %v190_v36, %v194_v38  ;;  %v241_v27 = vld [vmem:[#allocation5 + $0x3f0] sm:$0xff]  ;;  %v238_v28 = vld [vmem:[#allocation5 + $0x3d8] sm:$0xff] }
 0x1a8   :  { %4432 = vmatpush1.bf16.msra.mxu0 %v6902_v47  ;;  %4647 = vmatpush1.bf16.msra.mxu1 %v6904_v48  ;;  %v202_v47 = vld [vmem:[#allocation5 + $0x2b8] sm:$0xff]  ;;  %v6958_v48 = vcombine.low %v189_v34, %v193_v35  ;;  %v245_v35 = vld [vmem:[#allocation5 + $0x410] sm:$0xff] }
 0x1a9   :  { %4433 = vmatprep.subr.bf16.mxu0 %v6911_v49  ;;  %4648 = vmatprep.subr.bf16.mxu1 %v6913_v50  ;;  %v6960_v49 = vcombine.low %v190_v36, %v194_v38  ;;  %v6967_v50 = vcombine.high %v197_v43, %v201_v44  ;;  %v6969_v51 = vcombine.high %v198_v45, %v202_v47  ;;  %v249_v36 = vld [vmem:[#allocation5 + $0x430] sm:$0xff]  ;;  %v246_v38 = vld [vmem:[#allocation5 + $0x418] sm:$0xff] }
 0x1ac   :  { %4434 = vmatpush1.bf16.msra.mxu0 %v6910_v56  ;;  %4649 = vmatpush1.bf16.msra.mxu1 %v6912_v57  ;;  %v210_v56 = vld [vmem:[#allocation5 + $0x2f8] sm:$0xff]  ;;  %v6966_v57 = vcombine.low %v197_v43, %v201_v44  ;;  %v253_v44 = vld [vmem:[#allocation5 + $0x450] sm:$0xff] }
 0x1ad   :  { %4435 = vmatprep.subr.bf16.mxu0 %v6919_v59  ;;  %4650 = vmatprep.subr.bf16.mxu1 %v6921_v58  ;;  %v6968_v59 = vcombine.low %v198_v45, %v202_v47  ;;  %v6975_v58 = vcombine.high %v205_v52, %v209_v53  ;;  %v6977_v60 = vcombine.high %v206_v54, %v210_v56  ;;  %v257_v45 = vld [vmem:[#allocation5 + $0x470] sm:$0xff]  ;;  %v254_v47 = vld [vmem:[#allocation5 + $0x458] sm:$0xff] }
 0x1b0   :  { %4436 = vmatpush1.bf16.msra.mxu0 %v6918_v1  ;;  %4651 = vmatpush1.bf16.msra.mxu1 %v6920_v2  ;;  %v218_v1 = vld [vmem:[#allocation5 + $0x338] sm:$0xff]  ;;  %v6974_v2 = vcombine.low %v205_v52, %v209_v53  ;;  %v261_v53 = vld [vmem:[#allocation5 + $0x490] sm:$0xff] }
 0x1b1   :  { %4437 = vmatprep.subr.bf16.mxu0 %v6927_v3  ;;  %4652 = vmatprep.subr.bf16.mxu1 %v6929_v4  ;;  %v6976_v3 = vcombine.low %v206_v54, %v210_v56  ;;  %v6983_v4 = vcombine.high %v213_v61, %v217_v62  ;;  %v6985_v5 = vcombine.high %v214_v63, %v218_v1  ;;  %v265_v54 = vld [vmem:[#allocation5 + $0x4b0] sm:$0xff]  ;;  %v262_v56 = vld [vmem:[#allocation5 + $0x498] sm:$0xff] }
 0x1b4   :  { %4438 = vmatpush1.bf16.msra.mxu0 %v6926_v9  ;;  %4653 = vmatpush1.bf16.msra.mxu1 %v6928_v11  ;;  %v226_v9 = vld [vmem:[#allocation5 + $0x378] sm:$0xff]  ;;  %v6982_v11 = vcombine.low %v213_v61, %v217_v62  ;;  %v269_v62 = vld [vmem:[#allocation5 + $0x4d0] sm:$0xff] }
 0x1b5   :  { %4439 = vmatprep.subr.bf16.mxu0 %v6935_v12  ;;  %4654 = vmatprep.subr.bf16.mxu1 %v6937_v13  ;;  %v6984_v12 = vcombine.low %v214_v63, %v218_v1  ;;  %v6991_v13 = vcombine.high %v221_v6, %v225_v7  ;;  %v6993_v14 = vcombine.high %v222_v8, %v226_v9  ;;  %v273_v63 = vld [vmem:[#allocation5 + $0x4f0] sm:$0xff]  ;;  %v270_v1 = vld [vmem:[#allocation5 + $0x4d8] sm:$0xff] }
 0x1b8   :  { %4440 = vmatpush1.bf16.msra.mxu0 %v6934_v19  ;;  %4655 = vmatpush1.bf16.msra.mxu1 %v6936_v20  ;;  %v234_v19 = vld [vmem:[#allocation5 + $0x3b8] sm:$0xff]  ;;  %v6990_v20 = vcombine.low %v221_v6, %v225_v7  ;;  %v277_v6 = vld [vmem:[#allocation5 + $0x510] sm:$0xff] }
 0x1b9   :  { %4441 = vmatprep.subr.bf16.mxu0 %v6943_v21  ;;  %4656 = vmatprep.subr.bf16.mxu1 %v6945_v22  ;;  %v6992_v21 = vcombine.low %v222_v8, %v226_v9  ;;  %v6999_v22 = vcombine.high %v229_v16, %v233_v17  ;;  %v7001_v23 = vcombine.high %v230_v18, %v234_v19  ;;  %v281_v7 = vld [vmem:[#allocation5 + $0x530] sm:$0xff]  ;;  %v278_v8 = vld [vmem:[#allocation5 + $0x518] sm:$0xff] }
 0x1ba   :  { %v282_v9 = vld [vmem:[#allocation5 + $0x538] sm:$0xff] }
 0x1bc   :  { %4442 = vmatpush1.bf16.msra.mxu0 %v6942_v29  ;;  %4657 = vmatpush1.bf16.msra.mxu1 %v6944_v31  ;;  %v242_v29 = vld [vmem:[#allocation5 + $0x3f8] sm:$0xff]  ;;  %v6998_v31 = vcombine.low %v229_v16, %v233_v17  ;;  %v289_v16 = vld [vmem:[#allocation5 + $0x570] sm:$0xff] }
 0x1bd   :  { %4443 = vmatprep.subr.bf16.mxu0 %v6951_v32  ;;  %4658 = vmatprep.subr.bf16.mxu1 %v6953_v33  ;;  %v7000_v32 = vcombine.low %v230_v18, %v234_v19  ;;  %v7007_v33 = vcombine.high %v237_v26, %v241_v27  ;;  %v7009_v34 = vcombine.high %v238_v28, %v242_v29  ;;  %v286_v17 = vld [vmem:[#allocation5 + $0x558] sm:$0xff] }
 0x1be   :  { %v290_v18 = vld [vmem:[#allocation5 + $0x578] sm:$0xff]  ;;  %v7046_v19 = vcombine.low %v277_v6, %v281_v7 }
 0x1c0   :  { %4444 = vmatpush1.bf16.msra.mxu0 %v6950_v39  ;;  %4659 = vmatpush1.bf16.msra.mxu1 %v6952_v40  ;;  %v250_v39 = vld [vmem:[#allocation5 + $0x438] sm:$0xff]  ;;  %v7006_v40 = vcombine.low %v237_v26, %v241_v27  ;;  %v297_v26 = vld [vmem:[#allocation5 + $0x5b0] sm:$0xff] }
 0x1c1   :  { %4445 = vmatprep.subr.bf16.mxu0 %v6959_v41  ;;  %4660 = vmatprep.subr.bf16.mxu1 %v6961_v42  ;;  %v7008_v41 = vcombine.low %v238_v28, %v242_v29  ;;  %v7015_v42 = vcombine.high %v245_v35, %v249_v36  ;;  %v7017_v43 = vcombine.high %v246_v38, %v250_v39  ;;  %v294_v27 = vld [vmem:[#allocation5 + $0x598] sm:$0xff] }
 0x1c2   :  { %v298_v28 = vld [vmem:[#allocation5 + $0x5b8] sm:$0xff] }
 0x1c4   :  { %4446 = vmatpush1.bf16.msra.mxu0 %v6958_v48  ;;  %4661 = vmatpush1.bf16.msra.mxu1 %v6960_v49  ;;  %v258_v48 = vld [vmem:[#allocation5 + $0x478] sm:$0xff]  ;;  %v7014_v49 = vcombine.low %v245_v35, %v249_v36  ;;  %v305_v35 = vld [vmem:[#allocation5 + $0x5f0] sm:$0xff] }
 0x1c5   :  { %4447 = vmatprep.subr.bf16.mxu0 %v6967_v50  ;;  %4662 = vmatprep.subr.bf16.mxu1 %v6969_v51  ;;  %v7016_v50 = vcombine.low %v246_v38, %v250_v39  ;;  %v7023_v51 = vcombine.high %v253_v44, %v257_v45  ;;  %v7025_v52 = vcombine.high %v254_v47, %v258_v48  ;;  %v302_v36 = vld [vmem:[#allocation5 + $0x5d8] sm:$0xff] }
 0x1c6   :  { %v306_v38 = vld [vmem:[#allocation5 + $0x5f8] sm:$0xff] }
 0x1c8   :  { %4448 = vmatpush1.bf16.msra.mxu0 %v6966_v57  ;;  %4663 = vmatpush1.bf16.msra.mxu1 %v6968_v59  ;;  %v266_v57 = vld [vmem:[#allocation5 + $0x4b8] sm:$0xff]  ;;  %v7022_v59 = vcombine.low %v253_v44, %v257_v45  ;;  %v313_v44 = vld [vmem:[#allocation5 + $0x630] sm:$0xff] }
 0x1c9   :  { %4449 = vmatprep.subr.bf16.mxu0 %v6975_v58  ;;  %4664 = vmatprep.subr.bf16.mxu1 %v6977_v60  ;;  %v7024_v58 = vcombine.low %v254_v47, %v258_v48  ;;  %v7031_v60 = vcombine.high %v261_v53, %v265_v54  ;;  %v7033_v61 = vcombine.high %v262_v56, %v266_v57  ;;  %v310_v45 = vld [vmem:[#allocation5 + $0x618] sm:$0xff] }
 0x1ca   :  { %v314_v47 = vld [vmem:[#allocation5 + $0x638] sm:$0xff] }
 0x1cc   :  { %4450 = vmatpush1.bf16.msra.mxu0 %v6974_v2  ;;  %4665 = vmatpush1.bf16.msra.mxu1 %v6976_v3  ;;  %v274_v2 = vld [vmem:[#allocation5 + $0x4f8] sm:$0xff]  ;;  %v7030_v3 = vcombine.low %v261_v53, %v265_v54  ;;  %v321_v53 = vld [vmem:[#allocation5 + $0x670] sm:$0xff] }
 0x1cd   :  { %4451 = vmatprep.subr.bf16.mxu0 %v6983_v4  ;;  %4666 = vmatprep.subr.bf16.mxu1 %v6985_v5  ;;  %v7039_v4 = vcombine.high %v269_v62, %v273_v63  ;;  %v7041_v5 = vcombine.high %v270_v1, %v274_v2  ;;  %v318_v54 = vld [vmem:[#allocation5 + $0x658] sm:$0xff] }
 0x1d0   :  { %4452 = vmatpush1.bf16.msra.mxu0 %v6982_v11  ;;  %4667 = vmatpush1.bf16.msra.mxu1 %v6984_v12  ;;  %v7038_v11 = vcombine.low %v269_v62, %v273_v63  ;;  %v7040_v12 = vcombine.low %v270_v1, %v274_v2  ;;  %v329_v62 = vld [vmem:[#allocation5 + $0x6b0] sm:$0xff]  ;;  %v326_v63 = vld [vmem:[#allocation5 + $0x698] sm:$0xff] }
 0x1d1   :  { %4453 = vmatprep.subr.bf16.mxu0 %v6991_v13  ;;  %4668 = vmatprep.subr.bf16.mxu1 %v6993_v14  ;;  %v7047_v13 = vcombine.high %v277_v6, %v281_v7  ;;  %v285_v14 = vld [vmem:[#allocation5 + $0x550] sm:$0xff]  ;;  %v330_v1 = vld [vmem:[#allocation5 + $0x6b8] sm:$0xff] }
 0x1d2   :  { %v7054_v29 = vcombine.low %v285_v14, %v289_v16  ;;  %v337_v6 = vld [vmem:[#allocation5 + $0x6f0] sm:$0xff]  ;;  %v334_v7 = vld [vmem:[#allocation5 + $0x6d8] sm:$0xff] }
 0x1d4   :  { %4454 = vmatpush1.bf16.msra.mxu0 %v6990_v20  ;;  %4669 = vmatpush1.bf16.msra.mxu1 %v6992_v21  ;;  %v7048_v20 = vcombine.low %v278_v8, %v282_v9  ;;  %v7055_v21 = vcombine.high %v285_v14, %v289_v16  ;;  %v345_v14 = vld [vmem:[#allocation5 + $0x730] sm:$0xff]  ;;  %v342_v16 = vld [vmem:[#allocation5 + $0x718] sm:$0xff] }
 0x1d5   :  { %4455 = vmatprep.subr.bf16.mxu0 %v6999_v22  ;;  %4670 = vmatprep.subr.bf16.mxu1 %v7001_v23  ;;  %v7057_v22 = vcombine.high %v286_v17, %v290_v18  ;;  %v293_v23 = vld [vmem:[#allocation5 + $0x590] sm:$0xff] }
 0x1d6   :  { %v7062_v39 = vcombine.low %v293_v23, %v297_v26 }
 0x1d8   :  { %4456 = vmatpush1.bf16.msra.mxu0 %v6998_v31  ;;  %4671 = vmatpush1.bf16.msra.mxu1 %v7000_v32  ;;  %v7056_v31 = vcombine.low %v286_v17, %v290_v18  ;;  %v7063_v32 = vcombine.high %v293_v23, %v297_v26  ;;  %v346_v17 = vld [vmem:[#allocation5 + $0x738] sm:$0xff]  ;;  %v353_v23 = vld [vmem:[#allocation5 + $0x770] sm:$0xff] }
 0x1d9   :  { %4457 = vmatprep.subr.bf16.mxu0 %v7007_v33  ;;  %4672 = vmatprep.subr.bf16.mxu1 %v7009_v34  ;;  %v7065_v33 = vcombine.high %v294_v27, %v298_v28  ;;  %v301_v34 = vld [vmem:[#allocation5 + $0x5d0] sm:$0xff]  ;;  %v350_v26 = vld [vmem:[#allocation5 + $0x758] sm:$0xff] }
 0x1da   :  { %v7070_v48 = vcombine.low %v301_v34, %v305_v35 }
 0x1dc   :  { %4458 = vmatpush1.bf16.msra.mxu0 %v7006_v40  ;;  %4673 = vmatpush1.bf16.msra.mxu1 %v7008_v41  ;;  %v7064_v40 = vcombine.low %v294_v27, %v298_v28  ;;  %v7071_v41 = vcombine.high %v301_v34, %v305_v35  ;;  %v354_v27 = vld [vmem:[#allocation5 + $0x778] sm:$0xff]  ;;  %v361_v34 = vld [vmem:[#allocation5 + $0x7b0] sm:$0xff] }
 0x1dd   :  { %4470 = vmatprep.subr.bf16.mxu0 %v7015_v42  ;;  %4685 = vmatprep.subr.bf16.mxu1 %v7017_v43  ;;  %v7073_v42 = vcombine.high %v302_v36, %v306_v38  ;;  %v309_v43 = vld [vmem:[#allocation5 + $0x610] sm:$0xff]  ;;  %v358_v35 = vld [vmem:[#allocation5 + $0x798] sm:$0xff] }
 0x1df   :  { %4460 = vmatmul.mubr.bf16.vlgmr.msra.gmra.mrb[4].mxu0 %v8568_v15  ;;  %4675 = vmatmul.mubr.bf16.vlgmr.msra.gmra.mrb[4].mxu1 %v8568_v15  ;;  %v7032_v15 = vcombine.low %v262_v56, %v266_v57  ;;  %v322_v56 = vld [vmem:[#allocation5 + $0x678] sm:$0xff]  ;;  %v7078_v57 = vcombine.low %v309_v43, %v313_v44 }
 0x1e0   :  { %4471 = vmatpush1.bf16.msra.mxu0 %v7014_v49  ;;  %4686 = vmatpush1.bf16.msra.mxu1 %v7016_v50  ;;  %v7072_v49 = vcombine.low %v302_v36, %v306_v38  ;;  %v7079_v50 = vcombine.high %v309_v43, %v313_v44  ;;  %v362_v36 = vld [vmem:[#allocation5 + $0x7b8] sm:$0xff]  ;;  %v369_v43 = vld [vmem:[#allocation5 + $0x7f0] sm:$0xff] }
 0x1e1   :  { %4472 = vmatprep.subr.bf16.mxu0 %v7023_v51  ;;  %4687 = vmatprep.subr.bf16.mxu1 %v7025_v52  ;;  %v7081_v51 = vcombine.high %v310_v45, %v314_v47  ;;  %v317_v52 = vld [vmem:[#allocation5 + $0x650] sm:$0xff]  ;;  %v366_v44 = vld [vmem:[#allocation5 + $0x7d8] sm:$0xff] }
 0x1e2   :  { %4502 = vmatprep.mubr.bf16.mxu0 %v8570_v25  ;;  %4717 = vmatprep.mubr.bf16.mxu1 %v8570_v25  ;;  %v7049_v25 = vcombine.high %v278_v8, %v282_v9  ;;  %v7086_v2 = vcombine.low %v317_v52, %v321_v53  ;;  %v338_v8 = vld [vmem:[#allocation5 + $0x6f8] sm:$0xff] }
 0x1e4   :  { %4473 = vmatpush1.bf16.msra.mxu0 %v7022_v59  ;;  %4688 = vmatpush1.bf16.msra.mxu1 %v7024_v58  ;;  %v7080_v59 = vcombine.low %v310_v45, %v314_v47  ;;  %v7087_v58 = vcombine.high %v317_v52, %v321_v53  ;;  %v370_v45 = vld [vmem:[#allocation5 + $0x7f8] sm:$0xff]  ;;  %v377_v52 = vld [vmem:[#allocation5 + $0x830] sm:$0xff] }
 0x1e5   :  { %4474 = vmatprep.subr.bf16.mxu0 %v7031_v60  ;;  %4689 = vmatprep.subr.bf16.mxu1 %v7033_v61  ;;  %v7089_v60 = vcombine.high %v318_v54, %v322_v56  ;;  %v325_v61 = vld [vmem:[#allocation5 + $0x690] sm:$0xff]  ;;  %v374_v53 = vld [vmem:[#allocation5 + $0x818] sm:$0xff] }
 0x1e6   :  { %v7094_v9 = vcombine.low %v325_v61, %v329_v62 }
 0x1e8   :  { %4475 = vmatpush1.bf16.msra.mxu0 %v7030_v3  ;;  %4690 = vmatpush1.bf16.msra.mxu1 %v7032_v15  ;;  %v7088_v3 = vcombine.low %v318_v54, %v322_v56  ;;  %v7095_v15 = vcombine.high %v325_v61, %v329_v62  ;;  %v378_v54 = vld [vmem:[#allocation5 + $0x838] sm:$0xff]  ;;  %v385_v61 = vld [vmem:[#allocation5 + $0x870] sm:$0xff] }
 0x1e9   :  { %4476 = vmatprep.subr.bf16.mxu0 %v7039_v4  ;;  %4691 = vmatprep.subr.bf16.mxu1 %v7041_v5  ;;  %v7097_v4 = vcombine.high %v326_v63, %v330_v1  ;;  %v333_v5 = vld [vmem:[#allocation5 + $0x6d0] sm:$0xff]  ;;  %v382_v62 = vld [vmem:[#allocation5 + $0x858] sm:$0xff] }
 0x1ea   :  { %v7102_v18 = vcombine.low %v333_v5, %v337_v6 }
 0x1ec   :  { %4477 = vmatpush1.bf16.msra.mxu0 %v7038_v11  ;;  %4692 = vmatpush1.bf16.msra.mxu1 %v7040_v12  ;;  %v7096_v11 = vcombine.low %v326_v63, %v330_v1  ;;  %v7103_v12 = vcombine.high %v333_v5, %v337_v6  ;;  %v386_v63 = vld [vmem:[#allocation5 + $0x878] sm:$0xff]  ;;  %v393_v5 = vld [vmem:[#allocation5 + $0x8b0] sm:$0xff] }
 0x1ed   :  { %4478 = vmatprep.subr.bf16.mxu0 %v7047_v13  ;;  %4693 = vmatprep.subr.bf16.mxu1 %v7049_v25  ;;  %v7105_v13 = vcombine.high %v334_v7, %v338_v8  ;;  %v341_v25 = vld [vmem:[#allocation5 + $0x710] sm:$0xff]  ;;  %v390_v6 = vld [vmem:[#allocation5 + $0x898] sm:$0xff] }
 0x1ee   :  { %v7110_v28 = vcombine.low %v341_v25, %v345_v14 }
 0x1f0   :  { %4479 = vmatpush1.bf16.msra.mxu0 %v7046_v19  ;;  %4694 = vmatpush1.bf16.msra.mxu1 %v7048_v20  ;;  %v7104_v19 = vcombine.low %v334_v7, %v338_v8  ;;  %v7111_v20 = vcombine.high %v341_v25, %v345_v14  ;;  %v394_v7 = vld [vmem:[#allocation5 + $0x8b8] sm:$0xff]  ;;  %v401_v25 = vld [vmem:[#allocation5 + $0x8f0] sm:$0xff] }
 0x1f1   :  { %4480 = vmatprep.subr.bf16.mxu0 %v7055_v21  ;;  %4695 = vmatprep.subr.bf16.mxu1 %v7057_v22  ;;  %v7113_v21 = vcombine.high %v342_v16, %v346_v17  ;;  %v349_v22 = vld [vmem:[#allocation5 + $0x750] sm:$0xff]  ;;  %v398_v14 = vld [vmem:[#allocation5 + $0x8d8] sm:$0xff] }
 0x1f2   :  { %v7118_v38 = vcombine.low %v349_v22, %v353_v23 }
 0x1f4   :  { %4481 = vmatpush1.bf16.msra.mxu0 %v7054_v29  ;;  %4696 = vmatpush1.bf16.msra.mxu1 %v7056_v31  ;;  %v7112_v29 = vcombine.low %v342_v16, %v346_v17  ;;  %v7119_v31 = vcombine.high %v349_v22, %v353_v23  ;;  %v402_v16 = vld [vmem:[#allocation5 + $0x8f8] sm:$0xff] }
 0x1f5   :  { %4482 = vmatprep.subr.bf16.mxu0 %v7063_v32  ;;  %4697 = vmatprep.subr.bf16.mxu1 %v7065_v33  ;;  %v7121_v32 = vcombine.high %v350_v26, %v354_v27  ;;  %v357_v33 = vld [vmem:[#allocation5 + $0x790] sm:$0xff]  ;;  %v406_v22 = vld [vmem:[#allocation5 + $0x918] sm:$0xff] }
 0x1f6   :  { %v7126_v47 = vcombine.low %v357_v33, %v361_v34  ;;  %v410_v23 = vld [vmem:[#allocation5 + $0x938] sm:$0xff] }
 0x1f8   :  { %4483 = vmatpush1.bf16.msra.mxu0 %v7062_v39  ;;  %4698 = vmatpush1.bf16.msra.mxu1 %v7064_v40  ;;  %v7120_v39 = vcombine.low %v350_v26, %v354_v27  ;;  %v7127_v40 = vcombine.high %v357_v33, %v361_v34  ;;  %v7168_v27 = vcombine.low %v398_v14, %v402_v16  ;;  %v418_v33 = vld [vmem:[#allocation5 + $0x978] sm:$0xff] }
 0x1f9   :  { %4484 = vmatprep.subr.bf16.mxu0 %v7071_v41  ;;  %4699 = vmatprep.subr.bf16.mxu1 %v7073_v42  ;;  %v7129_v41 = vcombine.high %v358_v35, %v362_v36  ;;  %v365_v42 = vld [vmem:[#allocation5 + $0x7d0] sm:$0xff] }
 0x1fa   :  { %v7134_v56 = vcombine.low %v365_v42, %v369_v43 }
 0x1fc   :  { %4485 = vmatpush1.bf16.msra.mxu0 %v7070_v48  ;;  %4700 = vmatpush1.bf16.msra.mxu1 %v7072_v49  ;;  %v7128_v48 = vcombine.low %v358_v35, %v362_v36  ;;  %v7135_v49 = vcombine.high %v365_v42, %v369_v43  ;;  %v7176_v35 = vcombine.low %v406_v22, %v410_v23  ;;  %v426_v42 = vld [vmem:[#allocation5 + $0x9b8] sm:$0xff] }
 0x1fd   :  { %4486 = vmatprep.subr.bf16.mxu0 %v7079_v50  ;;  %4701 = vmatprep.subr.bf16.mxu1 %v7081_v51  ;;  %v7137_v50 = vcombine.high %v366_v44, %v370_v45  ;;  %v373_v51 = vld [vmem:[#allocation5 + $0x810] sm:$0xff] }
 0x1fe   :  { %v7142_v1 = vcombine.low %v373_v51, %v377_v52 }
 0x200   :  { %4487 = vmatpush1.bf16.msra.mxu0 %v7078_v57  ;;  %4702 = vmatpush1.bf16.msra.mxu1 %v7080_v59  ;;  %v7136_v57 = vcombine.low %v366_v44, %v370_v45  ;;  %v7143_v59 = vcombine.high %v373_v51, %v377_v52  ;;  %v434_v51 = vld [vmem:[#allocation5 + $0x9f8] sm:$0xff] }
 0x201   :  { %4488 = vmatprep.subr.bf16.mxu0 %v7087_v58  ;;  %4703 = vmatprep.subr.bf16.mxu1 %v7089_v60  ;;  %v7145_v58 = vcombine.high %v374_v53, %v378_v54  ;;  %v381_v60 = vld [vmem:[#allocation5 + $0x850] sm:$0xff] }
 0x202   :  { %v7150_v8 = vcombine.low %v381_v60, %v385_v61 }
 0x204   :  { %4489 = vmatpush1.bf16.msra.mxu0 %v7086_v2  ;;  %4704 = vmatpush1.bf16.msra.mxu1 %v7088_v3  ;;  %v7144_v2 = vcombine.low %v374_v53, %v378_v54  ;;  %v7151_v3 = vcombine.high %v381_v60, %v385_v61  ;;  %v442_v60 = vld [vmem:[#allocation5 + $0xa38] sm:$0xff] }
 0x205   :  { %4490 = vmatprep.subr.bf16.mxu0 %v7095_v15  ;;  %4705 = vmatprep.subr.bf16.mxu1 %v7097_v4  ;;  %v7153_v15 = vcombine.high %v382_v62, %v386_v63  ;;  %v389_v4 = vld [vmem:[#allocation5 + $0x890] sm:$0xff] }
 0x206   :  { %v7158_v17 = vcombine.low %v389_v4, %v393_v5 }
 0x208   :  { %4491 = vmatpush1.bf16.msra.mxu0 %v7094_v9  ;;  %4706 = vmatpush1.bf16.msra.mxu1 %v7096_v11  ;;  %v7152_v9 = vcombine.low %v382_v62, %v386_v63  ;;  %v7159_v11 = vcombine.high %v389_v4, %v393_v5  ;;  %v450_v4 = vld [vmem:[#allocation5 + $0xa78] sm:$0xff] }
 0x209   :  { %4492 = vmatprep.subr.bf16.mxu0 %v7103_v12  ;;  %4707 = vmatprep.subr.bf16.mxu1 %v7105_v13  ;;  %v7161_v12 = vcombine.high %v390_v6, %v394_v7  ;;  %v397_v13 = vld [vmem:[#allocation5 + $0x8d0] sm:$0xff] }
 0x20a   :  { %v7166_v26 = vcombine.low %v397_v13, %v401_v25 }
 0x20c   :  { %4493 = vmatpush1.bf16.msra.mxu0 %v7102_v18  ;;  %4708 = vmatpush1.bf16.msra.mxu1 %v7104_v19  ;;  %v7167_v18 = vcombine.high %v397_v13, %v401_v25  ;;  %v7169_v19 = vcombine.high %v398_v14, %v402_v16  ;;  %v458_v13 = vld [vmem:[#allocation5 + $0xab8] sm:$0xff] }
 0x20d   :  { %4494 = vmatprep.subr.bf16.mxu0 %v7111_v20  ;;  %4709 = vmatprep.subr.bf16.mxu1 %v7113_v21  ;;  %v405_v20 = vld [vmem:[#allocation5 + $0x910] sm:$0xff] }
 0x20e   :  { %v409_v21 = vld [vmem:[#allocation5 + $0x930] sm:$0xff] }
 0x20f   :  { %v7174_v34 = vcombine.low %v405_v20, %v409_v21 }
 0x210   :  { %4495 = vmatpush1.bf16.msra.mxu0 %v7110_v28  ;;  %4710 = vmatpush1.bf16.msra.mxu1 %v7112_v29  ;;  %v7175_v28 = vcombine.high %v405_v20, %v409_v21  ;;  %v413_v29 = vld [vmem:[#allocation5 + $0x950] sm:$0xff]  ;;  %v466_v20 = vld [vmem:[#allocation5 + $0xaf8] sm:$0xff] }
 0x211   :  { %4496 = vmatprep.subr.bf16.mxu0 %v7119_v31  ;;  %4711 = vmatprep.subr.bf16.mxu1 %v7121_v32  ;;  %v417_v31 = vld [vmem:[#allocation5 + $0x970] sm:$0xff]  ;;  %v414_v32 = vld [vmem:[#allocation5 + $0x958] sm:$0xff] }
 0x212   :  { %v7183_v36 = vcombine.high %v413_v29, %v417_v31  ;;  %v7182_v43 = vcombine.low %v413_v29, %v417_v31  ;;  %v7184_v44 = vcombine.low %v414_v32, %v418_v33  ;;  %v474_v29 = vld [vmem:[#allocation5 + $0xb38] sm:$0xff] }
 0x214   :  { %4497 = vmatpush1.bf16.msra.mxu0 %v7118_v38  ;;  %4712 = vmatpush1.bf16.msra.mxu1 %v7120_v39  ;;  %v7185_v38 = vcombine.high %v414_v32, %v418_v33  ;;  %v421_v39 = vld [vmem:[#allocation5 + $0x990] sm:$0xff] }
 0x215   :  { %4498 = vmatprep.subr.bf16.mxu0 %v7127_v40  ;;  %4713 = vmatprep.subr.bf16.mxu1 %v7129_v41  ;;  %v425_v40 = vld [vmem:[#allocation5 + $0x9b0] sm:$0xff]  ;;  %v422_v41 = vld [vmem:[#allocation5 + $0x998] sm:$0xff] }
 0x216   :  { %v7191_v45 = vcombine.high %v421_v39, %v425_v40  ;;  %v7190_v52 = vcombine.low %v421_v39, %v425_v40  ;;  %v7192_v53 = vcombine.low %v422_v41, %v426_v42  ;;  %v482_v39 = vld [vmem:[#allocation5 + $0xb78] sm:$0xff] }
 0x218   :  { %4499 = vmatpush1.bf16.msra.mxu0 %v7126_v47  ;;  %4714 = vmatpush1.bf16.msra.mxu1 %v7128_v48  ;;  %v7193_v47 = vcombine.high %v422_v41, %v426_v42  ;;  %v429_v48 = vld [vmem:[#allocation5 + $0x9d0] sm:$0xff] }
 0x219   :  { %4500 = vmatprep.subr.bf16.mxu0 %v7135_v49  ;;  %4715 = vmatprep.subr.bf16.mxu1 %v7137_v50  ;;  %v433_v49 = vld [vmem:[#allocation5 + $0x9f0] sm:$0xff]  ;;  %v430_v50 = vld [vmem:[#allocation5 + $0x9d8] sm:$0xff] }
 0x21a   :  { %v7199_v54 = vcombine.high %v429_v48, %v433_v49  ;;  %v7198_v61 = vcombine.low %v429_v48, %v433_v49  ;;  %v7200_v62 = vcombine.low %v430_v50, %v434_v51  ;;  %v490_v48 = vld [vmem:[#allocation5 + $0xbb8] sm:$0xff] }
 0x21c   :  { %4501 = vmatpush1.bf16.msra.mxu0 %v7134_v56  ;;  %4716 = vmatpush1.bf16.msra.mxu1 %v7136_v57  ;;  %v7201_v56 = vcombine.high %v430_v50, %v434_v51  ;;  %v437_v57 = vld [vmem:[#allocation5 + $0xa10] sm:$0xff] }
 0x21d   :  { %4513 = vmatprep.subr.bf16.mxu0 %v7143_v59  ;;  %4728 = vmatprep.subr.bf16.mxu1 %v7145_v58  ;;  %v441_v59 = vld [vmem:[#allocation5 + $0xa30] sm:$0xff]  ;;  %v438_v58 = vld [vmem:[#allocation5 + $0xa18] sm:$0xff] }
 0x21e   :  { %v7207_v63 = vcombine.high %v437_v57, %v441_v59  ;;  %v7206_v5 = vcombine.low %v437_v57, %v441_v59  ;;  %v498_v57 = vld [vmem:[#allocation5 + $0xbf8] sm:$0xff] }
 0x21f   :  { %4503 = vmatmul.mubr.bf16.vlgmr.msra.gmra.mrb[4].mxu0 %v8576_v30  ;;  %4718 = vmatmul.mubr.bf16.vlgmr.msra.gmra.mrb[4].mxu1 %v8576_v30  ;;  %v7160_v30 = vcombine.low %v390_v6, %v394_v7  ;;  %v7208_v6 = vcombine.low %v438_v58, %v442_v60 }
 0x220   :  { %4514 = vmatpush1.bf16.msra.mxu0 %v7142_v1  ;;  %4729 = vmatpush1.bf16.msra.mxu1 %v7144_v2  ;;  %v7209_v1 = vcombine.high %v438_v58, %v442_v60  ;;  %v445_v2 = vld [vmem:[#allocation5 + $0xa50] sm:$0xff] }
 0x221   :  { %4515 = vmatprep.subr.bf16.mxu0 %v7151_v3  ;;  %4730 = vmatprep.subr.bf16.mxu1 %v7153_v15  ;;  %v449_v3 = vld [vmem:[#allocation5 + $0xa70] sm:$0xff]  ;;  %v446_v15 = vld [vmem:[#allocation5 + $0xa58] sm:$0xff] }
 0x222   :  { %4545 = vmatprep.mubr.bf16.mxu0 %v8578_v37  ;;  %4760 = vmatprep.mubr.bf16.mxu1 %v8578_v37  ;;  %v7177_v37 = vcombine.high %v406_v22, %v410_v23  ;;  %v7215_v7 = vcombine.high %v445_v2, %v449_v3  ;;  %v7214_v25 = vcombine.low %v445_v2, %v449_v3  ;;  %v506_v2 = vld [vmem:[#allocation5 + $0xc38] sm:$0xff] }
 0x223   :  { %v7216_v14 = vcombine.low %v446_v15, %v450_v4 }
 0x224   :  { %4516 = vmatpush1.bf16.msra.mxu0 %v7150_v8  ;;  %4731 = vmatpush1.bf16.msra.mxu1 %v7152_v9  ;;  %v7217_v8 = vcombine.high %v446_v15, %v450_v4  ;;  %v453_v9 = vld [vmem:[#allocation5 + $0xa90] sm:$0xff] }
 0x225   :  { %4517 = vmatprep.subr.bf16.mxu0 %v7159_v11  ;;  %4732 = vmatprep.subr.bf16.mxu1 %v7161_v12  ;;  %v457_v11 = vld [vmem:[#allocation5 + $0xab0] sm:$0xff]  ;;  %v454_v12 = vld [vmem:[#allocation5 + $0xa98] sm:$0xff] }
 0x226   :  { %v7223_v16 = vcombine.high %v453_v9, %v457_v11  ;;  %v7222_v21 = vcombine.low %v453_v9, %v457_v11  ;;  %v7224_v22 = vcombine.low %v454_v12, %v458_v13  ;;  %v514_v9 = vld [vmem:[#allocation5 + $0xc78] sm:$0xff] }
 0x228   :  { %4518 = vmatpush1.bf16.msra.mxu0 %v7158_v17  ;;  %4733 = vmatpush1.bf16.msra.mxu1 %v7160_v30  ;;  %v7225_v17 = vcombine.high %v454_v12, %v458_v13  ;;  %v461_v30 = vld [vmem:[#allocation5 + $0xad0] sm:$0xff] }
 0x229   :  { %4519 = vmatprep.subr.bf16.mxu0 %v7167_v18  ;;  %4734 = vmatprep.subr.bf16.mxu1 %v7169_v19  ;;  %v465_v18 = vld [vmem:[#allocation5 + $0xaf0] sm:$0xff]  ;;  %v462_v19 = vld [vmem:[#allocation5 + $0xad8] sm:$0xff] }
 0x22a   :  { %v7231_v23 = vcombine.high %v461_v30, %v465_v18  ;;  %v7230_v31 = vcombine.low %v461_v30, %v465_v18  ;;  %v7232_v32 = vcombine.low %v462_v19, %v466_v20  ;;  %v522_v30 = vld [vmem:[#allocation5 + $0xcb8] sm:$0xff] }
 0x22c   :  { %4520 = vmatpush1.bf16.msra.mxu0 %v7166_v26  ;;  %4735 = vmatpush1.bf16.msra.mxu1 %v7168_v27  ;;  %v7233_v26 = vcombine.high %v462_v19, %v466_v20  ;;  %v469_v27 = vld [vmem:[#allocation5 + $0xb10] sm:$0xff] }
 0x22d   :  { %4521 = vmatprep.subr.bf16.mxu0 %v7175_v28  ;;  %4736 = vmatprep.subr.bf16.mxu1 %v7177_v37  ;;  %v473_v28 = vld [vmem:[#allocation5 + $0xb30] sm:$0xff]  ;;  %v470_v37 = vld [vmem:[#allocation5 + $0xb18] sm:$0xff] }
 0x22e   :  { %v7239_v33 = vcombine.high %v469_v27, %v473_v28  ;;  %v7238_v40 = vcombine.low %v469_v27, %v473_v28  ;;  %v7240_v41 = vcombine.low %v470_v37, %v474_v29  ;;  %v530_v27 = vld [vmem:[#allocation5 + $0xcf8] sm:$0xff]  ;;  %v757_v28 = vlaneseq }
 0x230   :  { %4522 = vmatpush1.bf16.msra.mxu0 %v7174_v34  ;;  %4737 = vmatpush1.bf16.msra.mxu1 %v7176_v35  ;;  %v7241_v34 = vcombine.high %v470_v37, %v474_v29  ;;  %v477_v35 = vld [vmem:[#allocation5 + $0xb50] sm:$0xff] }
 0x231   :  { %4523 = vmatprep.subr.bf16.mxu0 %v7183_v36  ;;  %4738 = vmatprep.subr.bf16.mxu1 %v7185_v38  ;;  %v481_v36 = vld [vmem:[#allocation5 + $0xb70] sm:$0xff]  ;;  %v478_v38 = vld [vmem:[#allocation5 + $0xb58] sm:$0xff] }
 0x232   :  { %v7247_v42 = vcombine.high %v477_v35, %v481_v36  ;;  %v7246_v49 = vcombine.low %v477_v35, %v481_v36  ;;  %v7248_v50 = vcombine.low %v478_v38, %v482_v39  ;;  %v538_v35 = vld [vmem:[#allocation5 + $0xd38] sm:$0xff]  ;;  %v8618_v36 = vshrl.u32 %v757_v28, 7 }
 0x234   :  { %4524 = vmatpush1.bf16.msra.mxu0 %v7182_v43  ;;  %4739 = vmatpush1.bf16.msra.mxu1 %v7184_v44  ;;  %v7249_v43 = vcombine.high %v478_v38, %v482_v39  ;;  %v485_v44 = vld [vmem:[#allocation5 + $0xb90] sm:$0xff] }
 0x235   :  { %4525 = vmatprep.subr.bf16.mxu0 %v7191_v45  ;;  %4740 = vmatprep.subr.bf16.mxu1 %v7193_v47  ;;  %v489_v45 = vld [vmem:[#allocation5 + $0xbb0] sm:$0xff]  ;;  %v486_v47 = vld [vmem:[#allocation5 + $0xb98] sm:$0xff] }
 0x236   :  { %v7255_v51 = vcombine.high %v485_v44, %v489_v45  ;;  %v7254_v59 = vcombine.low %v485_v44, %v489_v45  ;;  %v7256_v58 = vcombine.low %v486_v47, %v490_v48  ;;  %v542_v44 = vld [vmem:[#allocation5 + $0xd58] sm:$0xff] }
 0x237   :  { %v546_v45 = vld [vmem:[#allocation5 + $0xd78] sm:$0xff] }
 0x238   :  { %4526 = vmatpush1.bf16.msra.mxu0 %v7190_v52  ;;  %4741 = vmatpush1.bf16.msra.mxu1 %v7192_v53  ;;  %v7257_v52 = vcombine.high %v486_v47, %v490_v48  ;;  %v493_v53 = vld [vmem:[#allocation5 + $0xbd0] sm:$0xff]  ;;  %v755_v48 = vld [vmem:[#allocation7] sm:$0xff] }
 0x239   :  { %4527 = vmatprep.subr.bf16.mxu0 %v7199_v54  ;;  %4742 = vmatprep.subr.bf16.mxu1 %v7201_v56  ;;  %v497_v54 = vld [vmem:[#allocation5 + $0xbf0] sm:$0xff]  ;;  %v494_v56 = vld [vmem:[#allocation5 + $0xbd8] sm:$0xff] }
 0x23a   :  { %v7263_v60 = vcombine.high %v493_v53, %v497_v54  ;;  %v7262_v3 = vcombine.low %v493_v53, %v497_v54  ;;  %v7264_v15 = vcombine.low %v494_v56, %v498_v57  ;;  %v7313_v54 = vcombine.high %v542_v44, %v546_v45 }
 0x23c   :  { %4528 = vmatpush1.bf16.msra.mxu0 %v7198_v61  ;;  %4743 = vmatpush1.bf16.msra.mxu1 %v7200_v62  ;;  %v7265_v61 = vcombine.high %v494_v56, %v498_v57  ;;  %v501_v62 = vld [vmem:[#allocation5 + $0xc10] sm:$0xff] }
 0x23d   :  { %4529 = vmatprep.subr.bf16.mxu0 %v7207_v63  ;;  %4744 = vmatprep.subr.bf16.mxu1 %v7209_v1  ;;  %v505_v63 = vld [vmem:[#allocation5 + $0xc30] sm:$0xff]  ;;  %v502_v1 = vld [vmem:[#allocation5 + $0xc18] sm:$0xff] }
 0x23e   :  { %v7271_v4 = vcombine.high %v501_v62, %v505_v63  ;;  %v7270_v11 = vcombine.low %v501_v62, %v505_v63  ;;  %v7272_v12 = vcombine.low %v502_v1, %v506_v2  ;;  %v549_v56 = vld [vmem:[#allocation5 + $0xd90] sm:$0xff] }
 0x23f   :  { %v553_v57 = vld [vmem:[#allocation5 + $0xdb0] sm:$0xff] }
 0x240   :  { %4530 = vmatpush1.bf16.msra.mxu0 %v7206_v5  ;;  %4745 = vmatpush1.bf16.msra.mxu1 %v7208_v6  ;;  %v7273_v5 = vcombine.high %v502_v1, %v506_v2  ;;  %v509_v6 = vld [vmem:[#allocation5 + $0xc50] sm:$0xff]  ;;  %v7312_v2 = vcombine.low %v542_v44, %v546_v45 }
 0x241   :  { %4531 = vmatprep.subr.bf16.mxu0 %v7215_v7  ;;  %4746 = vmatprep.subr.bf16.mxu1 %v7217_v8  ;;  %v513_v7 = vld [vmem:[#allocation5 + $0xc70] sm:$0xff]  ;;  %v510_v8 = vld [vmem:[#allocation5 + $0xc58] sm:$0xff] }
 0x242   :  { %v7279_v13 = vcombine.high %v509_v6, %v513_v7  ;;  %v7278_v18 = vcombine.low %v509_v6, %v513_v7  ;;  %v7280_v19 = vcombine.low %v510_v8, %v514_v9  ;;  %v561_v6 = vld [vmem:[#allocation5 + $0xdf0] sm:$0xff] }
 0x244   :  { %4532 = vmatpush1.bf16.msra.mxu0 %v7214_v25  ;;  %4747 = vmatpush1.bf16.msra.mxu1 %v7216_v14  ;;  %v7281_v25 = vcombine.high %v510_v8, %v514_v9  ;;  %v517_v14 = vld [vmem:[#allocation5 + $0xc90] sm:$0xff] }
 0x245   :  { %4533 = vmatprep.subr.bf16.mxu0 %v7223_v16  ;;  %4748 = vmatprep.subr.bf16.mxu1 %v7225_v17  ;;  %v521_v16 = vld [vmem:[#allocation5 + $0xcb0] sm:$0xff]  ;;  %v518_v17 = vld [vmem:[#allocation5 + $0xc98] sm:$0xff] }
 0x246   :  { %v7287_v20 = vcombine.high %v517_v14, %v521_v16  ;;  %v7286_v37 = vcombine.low %v517_v14, %v521_v16 }
 0x248   :  { %4534 = vmatpush1.bf16.msra.mxu0 %v7222_v21  ;;  %4749 = vmatpush1.bf16.msra.mxu1 %v7224_v22  ;;  %v7289_v21 = vcombine.high %v518_v17, %v522_v30  ;;  %v525_v22 = vld [vmem:[#allocation5 + $0xcd0] sm:$0xff] }
 0x249   :  { %4535 = vmatprep.subr.bf16.mxu0 %v7231_v23  ;;  %4750 = vmatprep.subr.bf16.mxu1 %v7233_v26  ;;  %v529_v23 = vld [vmem:[#allocation5 + $0xcf0] sm:$0xff]  ;;  %v526_v26 = vld [vmem:[#allocation5 + $0xcd8] sm:$0xff] }
 0x24a   :  { %v7295_v29 = vcombine.high %v525_v22, %v529_v23  ;;  %v7294_v38 = vcombine.low %v525_v22, %v529_v23  ;;  %v7296_v39 = vcombine.low %v526_v26, %v530_v27 }
 0x24c   :  { %4536 = vmatpush1.bf16.msra.mxu0 %v7230_v31  ;;  %4751 = vmatpush1.bf16.msra.mxu1 %v7232_v32  ;;  %v7297_v31 = vcombine.high %v526_v26, %v530_v27  ;;  %v533_v32 = vld [vmem:[#allocation5 + $0xd10] sm:$0xff] }
 0x24d   :  { %4537 = vmatprep.subr.bf16.mxu0 %v7239_v33  ;;  %4752 = vmatprep.subr.bf16.mxu1 %v7241_v34  ;;  %v537_v33 = vld [vmem:[#allocation5 + $0xd30] sm:$0xff]  ;;  %v534_v34 = vld [vmem:[#allocation5 + $0xd18] sm:$0xff] }
 0x24e   :  { %v7302_v47 = vcombine.low %v533_v32, %v537_v33 }
 0x250   :  { %4538 = vmatpush1.bf16.msra.mxu0 %v7238_v40  ;;  %4753 = vmatpush1.bf16.msra.mxu1 %v7240_v41  ;;  %v7305_v40 = vcombine.high %v534_v34, %v538_v35  ;;  %v541_v41 = vld [vmem:[#allocation5 + $0xd50] sm:$0xff] }
 0x251   :  { %4539 = vmatprep.subr.bf16.mxu0 %v7247_v42  ;;  %4754 = vmatprep.subr.bf16.mxu1 %v7249_v43  ;;  %v545_v42 = vld [vmem:[#allocation5 + $0xd70] sm:$0xff]  ;;  %v759_v43 = vsub.s32 0, %v8618_v36 }
 0x252   :  { %v7311_v53 = vcombine.high %v541_v41, %v545_v42  ;;  %v7310_v63 = vcombine.low %v541_v41, %v545_v42 }
 0x254   :  { %4540 = vmatpush1.bf16.msra.mxu0 %v7246_v49  ;;  %4755 = vmatpush1.bf16.msra.mxu1 %v7248_v50  ;;  %v767_v49 = vsub.s32 2, %v8618_v36  ;;  %v763_v50 = vsub.s32 1, %v8618_v36 }
 0x255   :  { %4541 = vmatprep.subr.bf16.mxu0 %v7255_v51  ;;  %4756 = vmatprep.subr.bf16.mxu1 %v7257_v52  ;;  %v7304_v51 = vcombine.low %v534_v34, %v538_v35  ;;  %v771_v52 = vsub.s32 3, %v8618_v36  ;;  %v566_v35 = vld [vmem:[#allocation5 + $0xe18] sm:$0xff] }
 0x256   :  { %v764_v62 = vrot.slane %v755_v48, %v763_v50 }
 0x257   :  { %v772_v1 = vrot.slane %v755_v48, %v771_v52 }
 0x258   :  { %4542 = vmatpush1.bf16.msra.mxu0 %v7254_v59  ;;  %4757 = vmatpush1.bf16.msra.mxu1 %v7256_v58  ;;  %v760_v59 = vrot.slane %v755_v48, %v759_v43  ;;  %v550_v58 = vld [vmem:[#allocation5 + $0xd98] sm:$0xff] }
 0x259   :  { %4543 = vmatprep.subr.bf16.mxu0 %v7263_v60  ;;  %4758 = vmatprep.subr.bf16.mxu1 %v7265_v61  ;;  %v554_v60 = vld [vmem:[#allocation5 + $0xdb8] sm:$0xff]  ;;  %v768_v61 = vrot.slane %v755_v48, %v767_v49 }
 0x25c   :  { %4544 = vmatpush1.bf16.msra.mxu0 %v7262_v3  ;;  %4759 = vmatpush1.bf16.msra.mxu1 %v7264_v15  ;;  %v7319_v3 = vcombine.high %v549_v56, %v553_v57 }
 0x25d   :  { %4556 = vmatprep.subr.bf16.mxu0 %v7271_v4  ;;  %4771 = vmatprep.subr.bf16.mxu1 %v7273_v5  ;;  %v7321_v4 = vcombine.high %v550_v58, %v554_v60  ;;  %v557_v5 = vld [vmem:[#allocation5 + $0xdd0] sm:$0xff] }
 0x25e   :  { %v7327_v22 = vcombine.high %v557_v5, %v561_v6  ;;  %v7326_v28 = vcombine.low %v557_v5, %v561_v6 }
 0x25f   :  { %4546 = vmatmul.mubr.bf16.vlgmr.msra.gmra.mrb[4].mxu0 %v8584_v46  ;;  %4761 = vmatmul.mubr.bf16.vlgmr.msra.gmra.mrb[4].mxu1 %v8584_v46  ;;  %v7288_v46 = vcombine.low %v518_v17, %v522_v30  ;;  %v7318_v17 = vcombine.low %v549_v56, %v553_v57  ;;  %v7320_v30 = vcombine.low %v550_v58, %v554_v60  ;;  %v577_v56 = vld [vmem:[#allocation5 + $0xe70] sm:$0xff]  ;;  %v578_v58 = vld [vmem:[#allocation5 + $0xe78] sm:$0xff] }
 0x260   :  { %4557 = vmatpush1.bf16.msra.mxu0 %v7270_v11  ;;  %4772 = vmatpush1.bf16.msra.mxu1 %v7272_v12  ;;  %v558_v11 = vld [vmem:[#allocation5 + $0xdd8] sm:$0xff] }
 0x261   :  { %4558 = vmatprep.subr.bf16.mxu0 %v7279_v13  ;;  %4773 = vmatprep.subr.bf16.mxu1 %v7281_v25  ;;  %v562_v12 = vld [vmem:[#allocation5 + $0xdf8] sm:$0xff] }
 0x262   :  { %4588 = vmatprep.mubr.bf16.mxu0 %v8586_v55  ;;  %4803 = vmatprep.mubr.bf16.mxu1 %v8586_v55  ;;  %v7303_v55 = vcombine.high %v533_v32, %v537_v33  ;;  %v7328_v34 = vcombine.low %v558_v11, %v562_v12 }
 0x264   :  { %4559 = vmatpush1.bf16.msra.mxu0 %v7278_v18  ;;  %4774 = vmatpush1.bf16.msra.mxu1 %v7280_v19 }
 0x265   :  { %4560 = vmatprep.subr.bf16.mxu0 %v7287_v20  ;;  %4775 = vmatprep.subr.bf16.mxu1 %v7289_v21 }
 0x268   :  { %4561 = vmatpush1.bf16.msra.mxu0 %v7286_v37  ;;  %4776 = vmatpush1.bf16.msra.mxu1 %v7288_v46  ;;  %v7329_v37 = vcombine.high %v558_v11, %v562_v12  ;;  %v565_v46 = vld [vmem:[#allocation5 + $0xe10] sm:$0xff]  ;;  %v590_v11 = vld [vmem:[#allocation5 + $0xed8] sm:$0xff] }
 0x269   :  { %4562 = vmatprep.subr.bf16.mxu0 %v7295_v29  ;;  %4777 = vmatprep.subr.bf16.mxu1 %v7297_v31  ;;  %v569_v29 = vld [vmem:[#allocation5 + $0xe30] sm:$0xff]  ;;  %v594_v12 = vld [vmem:[#allocation5 + $0xef8] sm:$0xff] }
 0x26a   :  { %v7334_v60 = vcombine.low %v565_v46, %v569_v29 }
 0x26c   :  { %4563 = vmatpush1.bf16.msra.mxu0 %v7294_v38  ;;  %4778 = vmatpush1.bf16.msra.mxu1 %v7296_v39  ;;  %v570_v38 = vld [vmem:[#allocation5 + $0xe38] sm:$0xff] }
 0x26d   :  { %4564 = vmatprep.subr.bf16.mxu0 %v7303_v55  ;;  %4779 = vmatprep.subr.bf16.mxu1 %v7305_v40 }
 0x270   :  { %4565 = vmatpush1.bf16.msra.mxu0 %v7302_v47  ;;  %4780 = vmatpush1.bf16.msra.mxu1 %v7304_v51  ;;  %v7335_v47 = vcombine.high %v565_v46, %v569_v29 }
 0x271   :  { %4566 = vmatprep.subr.bf16.mxu0 %v7311_v53  ;;  %4781 = vmatprep.subr.bf16.mxu1 %v7313_v54  ;;  %v7337_v53 = vcombine.high %v566_v35, %v570_v38  ;;  %v573_v54 = vld [vmem:[#allocation5 + $0xe50] sm:$0xff] }
 0x272   :  { %v4203_v15 = vpop.f32.mrb[0].mxu0  ;;  %v4418_v8 = vpop.f32.mrb[0].mxu1 }
 0x273   :  { %v7778_v7 = vadd.f32 %v4203_v15, %v760_v59  ;;  %v4205_v9 = vpop.f32.mrb[1].mxu0  ;;  %v7782_v13 = vadd.f32 %v4418_v8, %v768_v61  ;;  %v4420_v14 = vpop.f32.mrb[1].mxu1  ;;  %v586_v15 = vld [vmem:[#allocation5 + $0xeb8] sm:$0xff]  ;;  %v589_v8 = vld [vmem:[#allocation5 + $0xed0] sm:$0xff] }
 0x274   :  { %v7779_v25 = vadd.f32 %v4205_v9, %v764_v62  ;;  %v4207_v16 = vpop.f32.mrb[2].mxu0  ;;  %4567 = vmatpush1.bf16.msra.mxu0 %v7310_v63  ;;  %v7783_v18 = vadd.f32 %v4420_v14, %v772_v1  ;;  %v4422_v20 = vpop.f32.mrb[2].mxu1  ;;  %4782 = vmatpush1.bf16.msra.mxu1 %v7312_v2  ;;  %v585_v2 = vld [vmem:[#allocation5 + $0xeb0] sm:$0xff] }
 0x275   :  { %v7780_v19 = vadd.f32 %v4207_v16, %v760_v59  ;;  %v4209_v21 = vpop.f32.mrb[3].mxu0  ;;  %4568 = vmatprep.subr.bf16.mxu0 %v7319_v3  ;;  %v7784_v23 = vadd.f32 %v4422_v20, %v768_v61  ;;  %v4424_v27 = vpop.f32.mrb[3].mxu1  ;;  %4783 = vmatprep.subr.bf16.mxu1 %v7321_v4  ;;  %v4857_v31 = vmax.f32 %v7778_v7, 0.0  ;;  %v4859_v39 = vmax.f32 %v7782_v13, 0.0  ;;  %v574_v59 = vld [vmem:[#allocation5 + $0xe58] sm:$0xff]  ;;  %v593_v9 = vld [vmem:[#allocation5 + $0xef0] sm:$0xff] }
 0x276   :  { %v7781_v26 = vadd.f32 %v4209_v21, %v764_v62  ;;  %v7785_v33 = vadd.f32 %v4424_v27, %v772_v1  ;;  %v4858_v55 = vmax.f32 %v7779_v25, 0.0  ;;  %v4860_v42 = vmax.f32 %v7783_v18, 0.0  ;;  %v581_v1 = vld [vmem:[#allocation5 + $0xe90] sm:$0xff]  ;;  %v582_v3 = vld [vmem:[#allocation5 + $0xe98] sm:$0xff] }
 0x277   :  { %v4865_v32 = vmax.f32 %v7780_v19, 0.0  ;;  %v4867_v40 = vmax.f32 %v7784_v23, 0.0  ;;  %v7336_v61 = vcombine.low %v566_v35, %v570_v38  ;;  %v7343_v62 = vcombine.high %v573_v54, %v577_v56  ;;  %v598_v18 = vld [vmem:[#allocation5 + $0xf18] sm:$0xff]  ;;  %v609_v27 = vld [vmem:[#allocation5 + $0xf70] sm:$0xff] }
 0x278   :  { %v4866_v41 = vmax.f32 %v7781_v26, 0.0  ;;  %4569 = vmatpush1.bf16.msra.mxu0 %v7318_v17  ;;  %v4868_v45 = vmax.f32 %v7785_v33, 0.0  ;;  %4784 = vmatpush1.bf16.msra.mxu1 %v7320_v30  ;;  %v7345_v63 = vcombine.high %v574_v59, %v578_v58  ;;  %v7342_v4 = vcombine.low %v573_v54, %v577_v56  ;;  %v597_v17 = vld [vmem:[#allocation5 + $0xf10] sm:$0xff]  ;;  %v602_v19 = vld [vmem:[#allocation5 + $0xf38] sm:$0xff] }
 0x279   :  { %v8632_v44 = vpack.c.bf16 %v4865_v32, %v4857_v31  ;;  %4570 = vmatprep.subr.bf16.mxu0 %v7327_v22  ;;  %v8634_v48 = vpack.c.bf16 %v4867_v40, %v4859_v39  ;;  %4785 = vmatprep.subr.bf16.mxu1 %v7329_v37  ;;  %v7344_v5 = vcombine.low %v574_v59, %v578_v58  ;;  %v601_v30 = vld [vmem:[#allocation5 + $0xf30] sm:$0xff]  ;;  %v610_v37 = vld [vmem:[#allocation5 + $0xf78] sm:$0xff] }
 0x27a   :  { %v8636_v51 = vpack.c.bf16 %v4866_v41, %v4858_v55  ;;  %v8638_v57 = vpack.c.bf16 %v4868_v45, %v4860_v42  ;;  %v7351_v6 = vcombine.high %v581_v1, %v585_v2  ;;  %v7353_v7 = vcombine.high %v582_v3, %v586_v15  ;;  %v605_v26 = vld [vmem:[#allocation5 + $0xf50] sm:$0xff]  ;;  %v614_v35 = vld [vmem:[#allocation5 + $0xf98] sm:$0xff] }
 0x27b   :  { %v7350_v13 = vcombine.low %v581_v1, %v585_v2  ;;  %v7352_v25 = vcombine.low %v582_v3, %v586_v15  ;;  %v7359_v14 = vcombine.high %v589_v8, %v593_v9  ;;  %v7361_v16 = vcombine.high %v590_v11, %v594_v12  ;;  %v613_v33 = vld [vmem:[#allocation5 + $0xf90] sm:$0xff]  ;;  %v618_v38 = vld [vmem:[#allocation5 + $0xfb8] sm:$0xff] }
 0x27c   :  { %4571 = vmatpush1.bf16.msra.mxu0 %v7326_v28  ;;  %4786 = vmatpush1.bf16.msra.mxu1 %v7328_v34  ;;  %v7358_v20 = vcombine.low %v589_v8, %v593_v9  ;;  %v7360_v21 = vcombine.low %v590_v11, %v594_v12  ;;  %v7367_v22 = vcombine.high %v597_v17, %v601_v30  ;;  %v606_v28 = vld [vmem:[#allocation5 + $0xf58] sm:$0xff]  ;;  %v617_v34 = vld [vmem:[#allocation5 + $0xfb0] sm:$0xff] }
 0x27d   :  { %4572 = vmatprep.subr.bf16.mxu0 %v7335_v47  ;;  %4787 = vmatprep.subr.bf16.mxu1 %v7337_v53  ;;  %v7369_v23 = vcombine.high %v598_v18, %v602_v19  ;;  %v7366_v46 = vcombine.low %v597_v17, %v601_v30  ;;  %v7368_v29 = vcombine.low %v598_v18, %v602_v19  ;;  %v621_v42 = vld [vmem:[#allocation5 + $0xfd0] sm:$0xff]  ;;  %v622_v47 = vld [vmem:[#allocation5 + $0xfd8] sm:$0xff] }
 0x27e   :  { %v7375_v31 = vcombine.high %v605_v26, %v609_v27  ;;  %v7377_v32 = vcombine.high %v606_v28, %v610_v37  ;;  %v7374_v39 = vcombine.low %v605_v26, %v609_v27  ;;  %v7376_v55 = vcombine.low %v606_v28, %v610_v37  ;;  %v625_v45 = vld [vmem:[#allocation5 + $0xff0] sm:$0xff]  ;;  %v626_v53 = vld [vmem:[#allocation5 + $0xff8] sm:$0xff] }
 0x27f   :  { %v7383_v40 = vcombine.high %v613_v33, %v617_v34  ;;  %v7385_v41 = vcombine.high %v614_v35, %v618_v38  ;;  %v7382_v54 = vcombine.low %v613_v33, %v617_v34  ;;  %v7384_v56 = vcombine.low %v614_v35, %v618_v38  ;;  %v661_v37 = vld [vmem:[#allocation5 + $0x1110] sm:$0xff] }
 0x280   :  { %4573 = vmatpush1.bf16.msra.mxu0 %v7334_v60  ;;  %4788 = vmatpush1.bf16.msra.mxu1 %v7336_v61  ;;  %v7391_v59 = vcombine.high %v621_v42, %v625_v45  ;;  %v7393_v58 = vcombine.high %v622_v47, %v626_v53  ;;  %v629_v60 = vld [vmem:[#allocation5 + $0x1010] sm:$0xff]  ;;  %v7390_v1 = vcombine.low %v621_v42, %v625_v45 }
 0x281   :  { %4574 = vmatprep.subr.bf16.mxu0 %v7343_v62  ;;  %4789 = vmatprep.subr.bf16.mxu1 %v7345_v63  ;;  %v633_v61 = vld [vmem:[#allocation5 + $0x1030] sm:$0xff]  ;;  %v630_v62 = vld [vmem:[#allocation5 + $0x1018] sm:$0xff]  ;;  %v7392_v2 = vcombine.low %v622_v47, %v626_v53 }
 0x282   :  { %v634_v63 = vld [vmem:[#allocation5 + $0x1038] sm:$0xff]  ;;  %v7399_v3 = vcombine.high %v629_v60, %v633_v61  ;;  %v7398_v8 = vcombine.low %v629_v60, %v633_v61  ;;  %v669_v35 = vld [vmem:[#allocation5 + $0x1150] sm:$0xff] }
 0x283   :  { %v7401_v15 = vcombine.high %v630_v62, %v634_v63  ;;  %v7400_v9 = vcombine.low %v630_v62, %v634_v63  ;;  %v673_v38 = vld [vmem:[#allocation5 + $0x1170] sm:$0xff] }
 0x284   :  { %4575 = vmatpush1.bf16.msra.mxu0 %v7342_v4  ;;  %4790 = vmatpush1.bf16.msra.mxu1 %v7344_v5  ;;  %v637_v4 = vld [vmem:[#allocation5 + $0x1050] sm:$0xff]  ;;  %v7439_v42 = vcombine.high %v669_v35, %v673_v38 }
 0x285   :  { %4576 = vmatprep.subr.bf16.mxu0 %v7351_v6  ;;  %4791 = vmatprep.subr.bf16.mxu1 %v7353_v7  ;;  %v641_v5 = vld [vmem:[#allocation5 + $0x1070] sm:$0xff]  ;;  %v638_v6 = vld [vmem:[#allocation5 + $0x1058] sm:$0xff] }
 0x286   :  { %v642_v7 = vld [vmem:[#allocation5 + $0x1078] sm:$0xff]  ;;  %v7407_v11 = vcombine.high %v637_v4, %v641_v5  ;;  %v7406_v17 = vcombine.low %v637_v4, %v641_v5  ;;  %v677_v47 = vld [vmem:[#allocation5 + $0x1190] sm:$0xff] }
 0x287   :  { %v7409_v12 = vcombine.high %v638_v6, %v642_v7  ;;  %v7408_v30 = vcombine.low %v638_v6, %v642_v7  ;;  %v681_v53 = vld [vmem:[#allocation5 + $0x11b0] sm:$0xff] }
 0x288   :  { %4577 = vmatpush1.bf16.msra.mxu0 %v7350_v13  ;;  %4792 = vmatpush1.bf16.msra.mxu1 %v7352_v25  ;;  %v645_v13 = vld [vmem:[#allocation5 + $0x1090] sm:$0xff]  ;;  %v7447_v60 = vcombine.high %v677_v47, %v681_v53 }
 0x289   :  { %4578 = vmatprep.subr.bf16.mxu0 %v7359_v14  ;;  %4793 = vmatprep.subr.bf16.mxu1 %v7361_v16  ;;  %v649_v25 = vld [vmem:[#allocation5 + $0x10b0] sm:$0xff]  ;;  %v646_v14 = vld [vmem:[#allocation5 + $0x1098] sm:$0xff] }
 0x28a   :  { %v650_v16 = vld [vmem:[#allocation5 + $0x10b8] sm:$0xff]  ;;  %v7415_v18 = vcombine.high %v645_v13, %v649_v25  ;;  %v7414_v26 = vcombine.low %v645_v13, %v649_v25  ;;  %v685_v62 = vld [vmem:[#allocation5 + $0x11d0] sm:$0xff] }
 0x28b   :  { %v7417_v19 = vcombine.high %v646_v14, %v650_v16  ;;  %v689_v63 = vld [vmem:[#allocation5 + $0x11f0] sm:$0xff] }
 0x28c   :  { %4579 = vmatpush1.bf16.msra.mxu0 %v7358_v20  ;;  %4794 = vmatpush1.bf16.msra.mxu1 %v7360_v21  ;;  %v653_v20 = vld [vmem:[#allocation5 + $0x10d0] sm:$0xff]  ;;  %v7455_v4 = vcombine.high %v685_v62, %v689_v63 }
 0x28d   :  { %4580 = vmatprep.subr.bf16.mxu0 %v7367_v22  ;;  %4795 = vmatprep.subr.bf16.mxu1 %v7369_v23  ;;  %v657_v21 = vld [vmem:[#allocation5 + $0x10f0] sm:$0xff]  ;;  %v654_v22 = vld [vmem:[#allocation5 + $0x10d8] sm:$0xff] }
 0x28e   :  { %v658_v23 = vld [vmem:[#allocation5 + $0x10f8] sm:$0xff]  ;;  %v7423_v27 = vcombine.high %v653_v20, %v657_v21  ;;  %v693_v6 = vld [vmem:[#allocation5 + $0x1210] sm:$0xff] }
 0x28f   :  { %v7425_v28 = vcombine.high %v654_v22, %v658_v23  ;;  %v7424_v33 = vcombine.low %v654_v22, %v658_v23  ;;  %v697_v7 = vld [vmem:[#allocation5 + $0x1230] sm:$0xff] }
 0x290   :  { %4581 = vmatpush1.bf16.msra.mxu0 %v7366_v46  ;;  %4796 = vmatpush1.bf16.msra.mxu1 %v7368_v29  ;;  %v665_v46 = vld [vmem:[#allocation5 + $0x1130] sm:$0xff]  ;;  %v662_v29 = vld [vmem:[#allocation5 + $0x1118] sm:$0xff]  ;;  %v7463_v13 = vcombine.high %v693_v6, %v697_v7 }
 0x291   :  { %4582 = vmatprep.subr.bf16.mxu0 %v7375_v31  ;;  %4797 = vmatprep.subr.bf16.mxu1 %v7377_v32  ;;  %v666_v31 = vld [vmem:[#allocation5 + $0x1138] sm:$0xff]  ;;  %v7422_v32 = vcombine.low %v653_v20, %v657_v21  ;;  %v7431_v34 = vcombine.high %v661_v37, %v665_v46  ;;  %v709_v22 = vld [vmem:[#allocation5 + $0x1290] sm:$0xff] }
 0x292   :  { %v713_v23 = vld [vmem:[#allocation5 + $0x12b0] sm:$0xff] }
 0x294   :  { %4583 = vmatpush1.bf16.msra.mxu0 %v7374_v39  ;;  %4798 = vmatpush1.bf16.msra.mxu1 %v7376_v55  ;;  %v670_v39 = vld [vmem:[#allocation5 + $0x1158] sm:$0xff] }
 0x295   :  { %4584 = vmatprep.subr.bf16.mxu0 %v7383_v40  ;;  %4799 = vmatprep.subr.bf16.mxu1 %v7385_v41  ;;  %v674_v55 = vld [vmem:[#allocation5 + $0x1178] sm:$0xff]  ;;  %v7430_v40 = vcombine.low %v661_v37, %v665_v46  ;;  %v7432_v41 = vcombine.low %v662_v29, %v666_v31  ;;  %v7479_v37 = vcombine.high %v709_v22, %v713_v23 }
 0x296   :  { %v7441_v45 = vcombine.high %v670_v39, %v674_v55 }
 0x298   :  { %4585 = vmatpush1.bf16.msra.mxu0 %v7382_v54  ;;  %4800 = vmatpush1.bf16.msra.mxu1 %v7384_v56  ;;  %v678_v54 = vld [vmem:[#allocation5 + $0x1198] sm:$0xff] }
 0x299   :  { %4586 = vmatprep.subr.bf16.mxu0 %v7391_v59  ;;  %4801 = vmatprep.subr.bf16.mxu1 %v7393_v58  ;;  %v682_v56 = vld [vmem:[#allocation5 + $0x11b8] sm:$0xff]  ;;  %v7438_v59 = vcombine.low %v669_v35, %v673_v38  ;;  %v7440_v58 = vcombine.low %v670_v39, %v674_v55  ;;  %v725_v39 = vld [vmem:[#allocation5 + $0x1310] sm:$0xff] }
 0x29a   :  { %v7449_v61 = vcombine.high %v678_v54, %v682_v56  ;;  %v729_v55 = vld [vmem:[#allocation5 + $0x1330] sm:$0xff] }
 0x29c   :  { %4587 = vmatpush1.bf16.msra.mxu0 %v7390_v1  ;;  %4802 = vmatpush1.bf16.msra.mxu1 %v7392_v2  ;;  %v686_v1 = vld [vmem:[#allocation5 + $0x11d8] sm:$0xff] }
 0x29d   :  { %4599 = vmatprep.subr.bf16.mxu0 %v7399_v3  ;;  %4814 = vmatprep.subr.bf16.mxu1 %v7401_v15  ;;  %v690_v2 = vld [vmem:[#allocation5 + $0x11f8] sm:$0xff]  ;;  %v7446_v3 = vcombine.low %v677_v47, %v681_v53  ;;  %v7448_v15 = vcombine.low %v678_v54, %v682_v56  ;;  %v7495_v47 = vcombine.high %v725_v39, %v729_v55  ;;  %v733_v54 = vld [vmem:[#allocation5 + $0x1350] sm:$0xff] }
 0x29e   :  { %v7457_v5 = vcombine.high %v686_v1, %v690_v2  ;;  %v737_v56 = vld [vmem:[#allocation5 + $0x1370] sm:$0xff] }
 0x29f   :  { %4589 = vmatmul.mubr.bf16.vlgmr.msra.gmra.mrb[4].mxu0 %v8592_v0  ;;  %4804 = vmatmul.mubr.bf16.vlgmr.msra.gmra.mrb[4].mxu1 %v8592_v0  ;;  %v7416_v0 = vcombine.low %v646_v14, %v650_v16  ;;  %v701_v14 = vld [vmem:[#allocation5 + $0x1250] sm:$0xff] }
 0x2a0   :  { %4600 = vmatpush1.bf16.msra.mxu0 %v7398_v8  ;;  %4815 = vmatpush1.bf16.msra.mxu1 %v7400_v9  ;;  %v694_v8 = vld [vmem:[#allocation5 + $0x1218] sm:$0xff]  ;;  %v705_v16 = vld [vmem:[#allocation5 + $0x1270] sm:$0xff] }
 0x2a1   :  { %4601 = vmatprep.subr.bf16.mxu0 %v7407_v11  ;;  %4816 = vmatprep.subr.bf16.mxu1 %v7409_v12  ;;  %v698_v9 = vld [vmem:[#allocation5 + $0x1238] sm:$0xff]  ;;  %v7454_v11 = vcombine.low %v685_v62, %v689_v63  ;;  %v7456_v12 = vcombine.low %v686_v1, %v690_v2  ;;  %v7471_v20 = vcombine.high %v701_v14, %v705_v16  ;;  %v741_v1 = vld [vmem:[#allocation5 + $0x1390] sm:$0xff] }
 0x2a2   :  { %4631 = vmatprep.mubr.bf16.mxu0 %v8594_v10  ;;  %4846 = vmatprep.mubr.bf16.mxu1 %v8594_v10  ;;  %v7433_v10 = vcombine.high %v662_v29, %v666_v31  ;;  %v7465_v25 = vcombine.high %v694_v8, %v698_v9  ;;  %v717_v29 = vld [vmem:[#allocation5 + $0x12d0] sm:$0xff]  ;;  %v7503_v62 = vcombine.high %v733_v54, %v737_v56 }
 0x2a3   :  { %v721_v31 = vld [vmem:[#allocation5 + $0x12f0] sm:$0xff] }
 0x2a4   :  { %4602 = vmatpush1.bf16.msra.mxu0 %v7406_v17  ;;  %4817 = vmatpush1.bf16.msra.mxu1 %v7408_v30  ;;  %v702_v17 = vld [vmem:[#allocation5 + $0x1258] sm:$0xff]  ;;  %v7487_v35 = vcombine.high %v717_v29, %v721_v31  ;;  %v745_v2 = vld [vmem:[#allocation5 + $0x13b0] sm:$0xff] }
 0x2a5   :  { %4603 = vmatprep.subr.bf16.mxu0 %v7415_v18  ;;  %4818 = vmatprep.subr.bf16.mxu1 %v7417_v19  ;;  %v706_v30 = vld [vmem:[#allocation5 + $0x1278] sm:$0xff]  ;;  %v7462_v18 = vcombine.low %v693_v6, %v697_v7  ;;  %v7464_v19 = vcombine.low %v694_v8, %v698_v9  ;;  %v7511_v6 = vcombine.high %v741_v1, %v745_v2  ;;  %v749_v8 = vld [vmem:[#allocation5 + $0x13d0] sm:$0xff] }
 0x2a6   :  { %v7473_v21 = vcombine.high %v702_v17, %v706_v30  ;;  %v753_v9 = vld [vmem:[#allocation5 + $0x13f0] sm:$0xff] }
 0x2a8   :  { %4604 = vmatpush1.bf16.msra.mxu0 %v7414_v26  ;;  %4819 = vmatpush1.bf16.msra.mxu1 %v7416_v0  ;;  %v710_v26 = vld [vmem:[#allocation5 + $0x1298] sm:$0xff] }
 0x2a9   :  { %4605 = vmatprep.subr.bf16.mxu0 %v7423_v27  ;;  %4820 = vmatprep.subr.bf16.mxu1 %v7425_v28  ;;  %v714_v0 = vld [vmem:[#allocation5 + $0x12b8] sm:$0xff]  ;;  %v7470_v27 = vcombine.low %v701_v14, %v705_v16  ;;  %v7472_v28 = vcombine.low %v702_v17, %v706_v30  ;;  %v7519_v14 = vcombine.high %v749_v8, %v753_v9 }
 0x2aa   :  { %v7481_v46 = vcombine.high %v710_v26, %v714_v0  ;;  %v7518_v17 = vcombine.low %v749_v8, %v753_v9  ;;  %v7968_v8 = vld [vmem:[#allocation8 + $0x160] ss:$16 sps:$4 sm:$0xff]   ;;  %v7971_v9 = vld [vmem:[#allocation8 + $0x168] ss:$16 sps:$4 sm:$0xff]  }
 0x2ac   :  { %4606 = vmatpush1.bf16.msra.mxu0 %v7422_v32  ;;  %4821 = vmatpush1.bf16.msra.mxu1 %v7424_v33  ;;  %v718_v32 = vld [vmem:[#allocation5 + $0x12d8] sm:$0xff] }
 0x2ad   :  { %4607 = vmatprep.subr.bf16.mxu0 %v7431_v34  ;;  %4822 = vmatprep.subr.bf16.mxu1 %v7433_v10  ;;  %v722_v33 = vld [vmem:[#allocation5 + $0x12f8] sm:$0xff]  ;;  %v7478_v34 = vcombine.low %v709_v22, %v713_v23  ;;  %v7480_v10 = vcombine.low %v710_v26, %v714_v0  ;;  %v7913_v23 = vld [vmem:[#allocation8 + $0x2c] ss:$16 sps:$4 sm:$0xff]   ;;  %v7911_v0 = vld [vmem:[#allocation8 + $0x28] ss:$16 sps:$4 sm:$0xff]  }
 0x2ae   :  { %v7489_v38 = vcombine.high %v718_v32, %v722_v33  ;;  %v7910_v22 = vld [vmem:[#allocation8 + $0x24] ss:$16 sps:$4 sm:$0xff]   ;;  %v7908_v26 = vld [vmem:[#allocation8 + $0x20] ss:$16 sps:$4 sm:$0xff]  }
 0x2b0   :  { %4608 = vmatpush1.bf16.msra.mxu0 %v7430_v40  ;;  %4823 = vmatpush1.bf16.msra.mxu1 %v7432_v41  ;;  %v726_v40 = vld [vmem:[#allocation5 + $0x1318] sm:$0xff] }
 0x2b1   :  { %4609 = vmatprep.subr.bf16.mxu0 %v7439_v42  ;;  %4824 = vmatprep.subr.bf16.mxu1 %v7441_v45  ;;  %v730_v41 = vld [vmem:[#allocation5 + $0x1338] sm:$0xff]  ;;  %v7486_v42 = vcombine.low %v717_v29, %v721_v31  ;;  %v7488_v45 = vcombine.low %v718_v32, %v722_v33  ;;  %v7923_v32 = vld [vmem:[#allocation8 + $0x68] ss:$16 sps:$4 sm:$0xff]  }
 0x2b2   :  { %v7497_v53 = vcombine.high %v726_v40, %v730_v41  ;;  %v7922_v29 = vld [vmem:[#allocation8 + $0x64] ss:$16 sps:$4 sm:$0xff]   ;;  %v7920_v31 = vld [vmem:[#allocation8 + $0x60] ss:$16 sps:$4 sm:$0xff]  }
 0x2b3   :  { %v7928_v33 = vld [vmem:[#allocation8 + $0x84] ss:$16 sps:$4 sm:$0xff]  }
 0x2b4   :  { %4610 = vmatpush1.bf16.msra.mxu0 %v7438_v59  ;;  %4825 = vmatpush1.bf16.msra.mxu1 %v7440_v58  ;;  %v734_v59 = vld [vmem:[#allocation5 + $0x1358] sm:$0xff] }
 0x2b5   :  { %4611 = vmatprep.subr.bf16.mxu0 %v7447_v60  ;;  %4826 = vmatprep.subr.bf16.mxu1 %v7449_v61  ;;  %v738_v58 = vld [vmem:[#allocation5 + $0x1378] sm:$0xff]  ;;  %v7494_v60 = vcombine.low %v725_v39, %v729_v55  ;;  %v7496_v61 = vcombine.low %v726_v40, %v730_v41  ;;  %v7935_v55 = vld [vmem:[#allocation8 + $0xa8] ss:$16 sps:$4 sm:$0xff]   ;;  %v7943_v41 = vld [vmem:[#allocation8 + $0xcc] ss:$16 sps:$4 sm:$0xff]  }
 0x2b6   :  { %v7505_v63 = vcombine.high %v734_v59, %v738_v58  ;;  %v7932_v39 = vld [vmem:[#allocation8 + $0xa0] ss:$16 sps:$4 sm:$0xff]   ;;  %v7940_v40 = vld [vmem:[#allocation8 + $0xc4] ss:$16 sps:$4 sm:$0xff]  }
 0x2b8   :  { %4612 = vmatpush1.bf16.msra.mxu0 %v7446_v3  ;;  %4827 = vmatpush1.bf16.msra.mxu1 %v7448_v15  ;;  %v742_v3 = vld [vmem:[#allocation5 + $0x1398] sm:$0xff] }
 0x2b9   :  { %4613 = vmatprep.subr.bf16.mxu0 %v7455_v4  ;;  %4828 = vmatprep.subr.bf16.mxu1 %v7457_v5  ;;  %v746_v15 = vld [vmem:[#allocation5 + $0x13b8] sm:$0xff]  ;;  %v7502_v4 = vcombine.low %v733_v54, %v737_v56  ;;  %v7504_v5 = vcombine.low %v734_v59, %v738_v58  ;;  %v7947_v56 = vld [vmem:[#allocation8 + $0xe8] ss:$16 sps:$4 sm:$0xff]   ;;  %v7955_v58 = vld [vmem:[#allocation8 + $0x10c] ss:$16 sps:$4 sm:$0xff]  }
 0x2ba   :  { %v7513_v7 = vcombine.high %v742_v3, %v746_v15  ;;  %v7944_v54 = vld [vmem:[#allocation8 + $0xe0] ss:$16 sps:$4 sm:$0xff]   ;;  %v7952_v59 = vld [vmem:[#allocation8 + $0x104] ss:$16 sps:$4 sm:$0xff]  }
 0x2bc   :  { %4614 = vmatpush1.bf16.msra.mxu0 %v7454_v11  ;;  %4829 = vmatpush1.bf16.msra.mxu1 %v7456_v12  ;;  %v750_v11 = vld [vmem:[#allocation5 + $0x13d8] sm:$0xff] }
 0x2bd   :  { %4615 = vmatprep.subr.bf16.mxu0 %v7463_v13  ;;  %4830 = vmatprep.subr.bf16.mxu1 %v7465_v25  ;;  %v754_v12 = vld [vmem:[#allocation5 + $0x13f8] sm:$0xff]  ;;  %v7510_v13 = vcombine.low %v741_v1, %v745_v2  ;;  %v7512_v25 = vcombine.low %v742_v3, %v746_v15  ;;  %v7959_v2 = vld [vmem:[#allocation8 + $0x128] ss:$16 sps:$4 sm:$0xff]   ;;  %v7967_v15 = vld [vmem:[#allocation8 + $0x14c] ss:$16 sps:$4 sm:$0xff]  }
 0x2be   :  { %v7521_v16 = vcombine.high %v750_v11, %v754_v12  ;;  %v7520_v30 = vcombine.low %v750_v11, %v754_v12  ;;  %v7956_v1 = vld [vmem:[#allocation8 + $0x120] ss:$16 sps:$4 sm:$0xff]   ;;  %v7964_v3 = vld [vmem:[#allocation8 + $0x144] ss:$16 sps:$4 sm:$0xff]   ;;  %v7979_v12 = vld [vmem:[#allocation8 + $0x18c] ss:$16 sps:$4 sm:$0xff]  }
 0x2bf   :  { %v7976_v11 = vld [vmem:[#allocation8 + $0x184] ss:$16 sps:$4 sm:$0xff]  }
 0x2c0   :  { %4616 = vmatpush1.bf16.msra.mxu0 %v7462_v18  ;;  %4831 = vmatpush1.bf16.msra.mxu1 %v7464_v19  ;;  %v7904_v18 = vld [vmem:[#allocation8 + $0x4] ss:$16 sps:$4 sm:$0xff]   ;;  %v7907_v19 = vld [vmem:[#allocation8 + $0xc] ss:$16 sps:$4 sm:$0xff]  }
 0x2c1   :  { %4617 = vmatprep.subr.bf16.mxu0 %v7471_v20  ;;  %4832 = vmatprep.subr.bf16.mxu1 %v7473_v21  ;;  %v7902_v20 = vld [vmem:[#allocation8] ss:$16 sps:$4 sm:$0xff]   ;;  %v7905_v21 = vld [vmem:[#allocation8 + $0x8] ss:$16 sps:$4 sm:$0xff]  }
 0x2c4   :  { %4618 = vmatpush1.bf16.msra.mxu0 %v7470_v27  ;;  %4833 = vmatpush1.bf16.msra.mxu1 %v7472_v28  ;;  %v7916_v27 = vld [vmem:[#allocation8 + $0x44] ss:$16 sps:$4 sm:$0xff]   ;;  %v7919_v28 = vld [vmem:[#allocation8 + $0x4c] ss:$16 sps:$4 sm:$0xff]  }
 0x2c5   :  { %4619 = vmatprep.subr.bf16.mxu0 %v7479_v37  ;;  %4834 = vmatprep.subr.bf16.mxu1 %v7481_v46  ;;  %v7914_v37 = vld [vmem:[#allocation8 + $0x40] ss:$16 sps:$4 sm:$0xff]   ;;  %v7917_v46 = vld [vmem:[#allocation8 + $0x48] ss:$16 sps:$4 sm:$0xff]  }
 0x2c8   :  { %4620 = vmatpush1.bf16.msra.mxu0 %v7478_v34  ;;  %4835 = vmatpush1.bf16.msra.mxu1 %v7480_v10  ;;  %v7931_v34 = vld [vmem:[#allocation8 + $0x8c] ss:$16 sps:$4 sm:$0xff]   ;;  %v7929_v10 = vld [vmem:[#allocation8 + $0x88] ss:$16 sps:$4 sm:$0xff]  }
 0x2c9   :  { %4621 = vmatprep.subr.bf16.mxu0 %v7487_v35  ;;  %4836 = vmatprep.subr.bf16.mxu1 %v7489_v38  ;;  %v7934_v35 = vld [vmem:[#allocation8 + $0xa4] ss:$16 sps:$4 sm:$0xff]   ;;  %v7937_v38 = vld [vmem:[#allocation8 + $0xac] ss:$16 sps:$4 sm:$0xff]  }
 0x2cc   :  { %4622 = vmatpush1.bf16.msra.mxu0 %v7486_v42  ;;  %4837 = vmatpush1.bf16.msra.mxu1 %v7488_v45  ;;  %v7938_v42 = vld [vmem:[#allocation8 + $0xc0] ss:$16 sps:$4 sm:$0xff]   ;;  %v7941_v45 = vld [vmem:[#allocation8 + $0xc8] ss:$16 sps:$4 sm:$0xff]  }
 0x2cd   :  { %4623 = vmatprep.subr.bf16.mxu0 %v7495_v47  ;;  %4838 = vmatprep.subr.bf16.mxu1 %v7497_v53  ;;  %v7946_v47 = vld [vmem:[#allocation8 + $0xe4] ss:$16 sps:$4 sm:$0xff]   ;;  %v7949_v53 = vld [vmem:[#allocation8 + $0xec] ss:$16 sps:$4 sm:$0xff]  }
 0x2d0   :  { %4624 = vmatpush1.bf16.msra.mxu0 %v7494_v60  ;;  %4839 = vmatpush1.bf16.msra.mxu1 %v7496_v61  ;;  %v7950_v60 = vld [vmem:[#allocation8 + $0x100] ss:$16 sps:$4 sm:$0xff]   ;;  %v7953_v61 = vld [vmem:[#allocation8 + $0x108] ss:$16 sps:$4 sm:$0xff]  }
 0x2d1   :  { %4625 = vmatprep.subr.bf16.mxu0 %v7503_v62  ;;  %4840 = vmatprep.subr.bf16.mxu1 %v7505_v63  ;;  %v7958_v62 = vld [vmem:[#allocation8 + $0x124] ss:$16 sps:$4 sm:$0xff]   ;;  %v7961_v63 = vld [vmem:[#allocation8 + $0x12c] ss:$16 sps:$4 sm:$0xff]  }
 0x2d4   :  { %4626 = vmatpush1.bf16.msra.mxu0 %v7502_v4  ;;  %4841 = vmatpush1.bf16.msra.mxu1 %v7504_v5  ;;  %v7962_v4 = vld [vmem:[#allocation8 + $0x140] ss:$16 sps:$4 sm:$0xff]   ;;  %v7965_v5 = vld [vmem:[#allocation8 + $0x148] ss:$16 sps:$4 sm:$0xff]  }
 0x2d5   :  { %4627 = vmatprep.subr.bf16.mxu0 %v7511_v6  ;;  %4842 = vmatprep.subr.bf16.mxu1 %v7513_v7  ;;  %v7970_v6 = vld [vmem:[#allocation8 + $0x164] ss:$16 sps:$4 sm:$0xff]   ;;  %v7973_v7 = vld [vmem:[#allocation8 + $0x16c] ss:$16 sps:$4 sm:$0xff]  }
 0x2d8   :  { %4628 = vmatpush1.bf16.msra.mxu0 %v7510_v13  ;;  %4843 = vmatpush1.bf16.msra.mxu1 %v7512_v25  ;;  %v7974_v13 = vld [vmem:[#allocation8 + $0x180] ss:$16 sps:$4 sm:$0xff]   ;;  %v7977_v25 = vld [vmem:[#allocation8 + $0x188] ss:$16 sps:$4 sm:$0xff]  }
 0x2d9   :  { %4629 = vmatprep.subr.bf16.mxu0 %v7519_v14  ;;  %4844 = vmatprep.subr.bf16.mxu1 %v7521_v16  ;;  %v7982_v14 = vld [vmem:[#allocation8 + $0x1a4] ss:$16 sps:$4 sm:$0xff]   ;;  %v7985_v16 = vld [vmem:[#allocation8 + $0x1ac] ss:$16 sps:$4 sm:$0xff]  }
 0x2dc   :  { %4630 = vmatpush1.bf16.msra.mxu0 %v7518_v17  ;;  %4845 = vmatpush1.bf16.msra.mxu1 %v7520_v30  ;;  %v7980_v17 = vld [vmem:[#allocation8 + $0x1a0] ss:$16 sps:$4 sm:$0xff]   ;;  %v7983_v30 = vld [vmem:[#allocation8 + $0x1a8] ss:$16 sps:$4 sm:$0xff]  }
 0x2dd   :  { %6439 = vmatprep.subr.bf16.mxu0 %v7904_v18  ;;  %6611 = vmatprep.subr.bf16.mxu1 %v7907_v19  ;;  %v7988_v18 = vld [vmem:[#allocation8 + $0x1c4] ss:$16 sps:$4 sm:$0xff]   ;;  %v7991_v19 = vld [vmem:[#allocation8 + $0x1cc] ss:$16 sps:$4 sm:$0xff]  }
 0x2df   :  { %4632 = vmatmul.mubr.bf16.vlgmr.msra.gmra.mrb[4].mxu0 %v8600_v24  ;;  %4847 = vmatmul.mubr.bf16.vlgmr.msra.gmra.mrb[4].mxu1 %v8600_v24  ;;  %v7925_v24 = vld [vmem:[#allocation8 + $0x6c] ss:$16 sps:$4 sm:$0xff]  }
 0x2e0   :  { %6440 = vmatpush1.bf16.msra.mxu0 %v7902_v20  ;;  %6471 = vmatprep.mubr.bf16.mxu0 %v8636_v51  ;;  %v7986_v20 = vld [vmem:[#allocation8 + $0x1c0] ss:$16 sps:$4 sm:$0xff]  }
 0x2e1   :  { %6612 = vmatpush1.bf16.msra.mxu1 %v7905_v21  ;;  %6643 = vmatprep.mubr.bf16.mxu1 %v8636_v51  ;;  %v7926_v51 = vld [vmem:[#allocation8 + $0x80] ss:$16 sps:$4 sm:$0xff]   ;;  %v7989_v21 = vld [vmem:[#allocation8 + $0x1c8] ss:$16 sps:$4 sm:$0xff]  }
 0x2e2   :  { %6441 = vmatprep.subr.bf16.mxu0 %v7910_v22  ;;  %6613 = vmatprep.subr.bf16.mxu1 %v7913_v23  ;;  %v7994_v22 = vld [vmem:[#allocation8 + $0x1e4] ss:$16 sps:$4 sm:$0xff]   ;;  %v7997_v23 = vld [vmem:[#allocation8 + $0x1ec] ss:$16 sps:$4 sm:$0xff]  }
 0x2e4   :  { %6442 = vmatpush1.bf16.msra.mxu0 %v7908_v26  ;;  %v7992_v26 = vld [vmem:[#allocation8 + $0x1e0] ss:$16 sps:$4 sm:$0xff]  }
 0x2e5   :  { %6614 = vmatpush1.bf16.msra.mxu1 %v7911_v0  ;;  %6443 = vmatprep.subr.bf16.mxu0 %v7916_v27  ;;  %v7995_v0 = vld [vmem:[#allocation8 + $0x1e8] ss:$16 sps:$4 sm:$0xff]   ;;  %v8000_v27 = vld [vmem:[#allocation8 + $0x204] ss:$16 sps:$4 sm:$0xff]  }
 0x2e6   :  { %6615 = vmatprep.subr.bf16.mxu1 %v7919_v28  ;;  %v8003_v28 = vld [vmem:[#allocation8 + $0x20c] ss:$16 sps:$4 sm:$0xff]  }
 0x2e8   :  { %6444 = vmatpush1.bf16.msra.mxu0 %v7914_v37  ;;  %v7998_v37 = vld [vmem:[#allocation8 + $0x200] ss:$16 sps:$4 sm:$0xff]  }
 0x2e9   :  { %6616 = vmatpush1.bf16.msra.mxu1 %v7917_v46  ;;  %6445 = vmatprep.subr.bf16.mxu0 %v7922_v29  ;;  %v8001_v46 = vld [vmem:[#allocation8 + $0x208] ss:$16 sps:$4 sm:$0xff]   ;;  %v8006_v29 = vld [vmem:[#allocation8 + $0x224] ss:$16 sps:$4 sm:$0xff]  }
 0x2ea   :  { %6617 = vmatprep.subr.bf16.mxu1 %v7925_v24  ;;  %v8009_v24 = vld [vmem:[#allocation8 + $0x22c] ss:$16 sps:$4 sm:$0xff]  }
 0x2ec   :  { %6446 = vmatpush1.bf16.msra.mxu0 %v7920_v31  ;;  %v8004_v31 = vld [vmem:[#allocation8 + $0x220] ss:$16 sps:$4 sm:$0xff]  }
 0x2ed   :  { %6618 = vmatpush1.bf16.msra.mxu1 %v7923_v32  ;;  %6447 = vmatprep.subr.bf16.mxu0 %v7928_v33  ;;  %v8007_v32 = vld [vmem:[#allocation8 + $0x228] ss:$16 sps:$4 sm:$0xff]   ;;  %v8012_v33 = vld [vmem:[#allocation8 + $0x244] ss:$16 sps:$4 sm:$0xff]  }
 0x2ee   :  { %6619 = vmatprep.subr.bf16.mxu1 %v7931_v34  ;;  %v8015_v34 = vld [vmem:[#allocation8 + $0x24c] ss:$16 sps:$4 sm:$0xff]  }
 0x2f0   :  { %6448 = vmatpush1.bf16.msra.mxu0 %v7926_v51  ;;  %v8010_v51 = vld [vmem:[#allocation8 + $0x240] ss:$16 sps:$4 sm:$0xff]  }
 0x2f1   :  { %6620 = vmatpush1.bf16.msra.mxu1 %v7929_v10  ;;  %6449 = vmatprep.subr.bf16.mxu0 %v7934_v35  ;;  %v8013_v10 = vld [vmem:[#allocation8 + $0x248] ss:$16 sps:$4 sm:$0xff]   ;;  %v8018_v35 = vld [vmem:[#allocation8 + $0x264] ss:$16 sps:$4 sm:$0xff]  }
 0x2f2   :  { %6621 = vmatprep.subr.bf16.mxu1 %v7937_v38  ;;  %v8016_v38 = vld [vmem:[#allocation8 + $0x260] ss:$16 sps:$4 sm:$0xff]  }
 0x2f4   :  { %6450 = vmatpush1.bf16.msra.mxu0 %v7932_v39  ;;  %v8019_v39 = vld [vmem:[#allocation8 + $0x268] ss:$16 sps:$4 sm:$0xff]  }
 0x2f5   :  { %6622 = vmatpush1.bf16.msra.mxu1 %v7935_v55  ;;  %6451 = vmatprep.subr.bf16.mxu0 %v7940_v40  ;;  %v8024_v55 = vld [vmem:[#allocation8 + $0x284] ss:$16 sps:$4 sm:$0xff]   ;;  %v8027_v40 = vld [vmem:[#allocation8 + $0x28c] ss:$16 sps:$4 sm:$0xff]  }
 0x2f6   :  { %6623 = vmatprep.subr.bf16.mxu1 %v7943_v41  ;;  %v8025_v41 = vld [vmem:[#allocation8 + $0x288] ss:$16 sps:$4 sm:$0xff]  }
 0x2f8   :  { %6452 = vmatpush1.bf16.msra.mxu0 %v7938_v42  ;;  %v8030_v42 = vld [vmem:[#allocation8 + $0x2a4] ss:$16 sps:$4 sm:$0xff]  }
 0x2f9   :  { %6624 = vmatpush1.bf16.msra.mxu1 %v7941_v45  ;;  %6453 = vmatprep.subr.bf16.mxu0 %v7946_v47  ;;  %v8033_v45 = vld [vmem:[#allocation8 + $0x2ac] ss:$16 sps:$4 sm:$0xff]   ;;  %v8028_v47 = vld [vmem:[#allocation8 + $0x2a0] ss:$16 sps:$4 sm:$0xff]  }
 0x2fa   :  { %6625 = vmatprep.subr.bf16.mxu1 %v7949_v53  ;;  %v8031_v53 = vld [vmem:[#allocation8 + $0x2a8] ss:$16 sps:$4 sm:$0xff]  }
 0x2fc   :  { %6454 = vmatpush1.bf16.msra.mxu0 %v7944_v54  ;;  %v8036_v54 = vld [vmem:[#allocation8 + $0x2c4] ss:$16 sps:$4 sm:$0xff]  }
 0x2fd   :  { %6626 = vmatpush1.bf16.msra.mxu1 %v7947_v56  ;;  %6455 = vmatprep.subr.bf16.mxu0 %v7952_v59  ;;  %v8039_v56 = vld [vmem:[#allocation8 + $0x2cc] ss:$16 sps:$4 sm:$0xff]   ;;  %v8034_v59 = vld [vmem:[#allocation8 + $0x2c0] ss:$16 sps:$4 sm:$0xff]  }
 0x2fe   :  { %6627 = vmatprep.subr.bf16.mxu1 %v7955_v58  ;;  %v8037_v58 = vld [vmem:[#allocation8 + $0x2c8] ss:$16 sps:$4 sm:$0xff]  }
 0x300   :  { %6456 = vmatpush1.bf16.msra.mxu0 %v7950_v60  ;;  %v8042_v60 = vld [vmem:[#allocation8 + $0x2e4] ss:$16 sps:$4 sm:$0xff]  }
 0x301   :  { %6628 = vmatpush1.bf16.msra.mxu1 %v7953_v61  ;;  %6457 = vmatprep.subr.bf16.mxu0 %v7958_v62  ;;  %v8045_v61 = vld [vmem:[#allocation8 + $0x2ec] ss:$16 sps:$4 sm:$0xff]   ;;  %v8040_v62 = vld [vmem:[#allocation8 + $0x2e0] ss:$16 sps:$4 sm:$0xff]  }
 0x302   :  { %6629 = vmatprep.subr.bf16.mxu1 %v7961_v63  ;;  %v8043_v63 = vld [vmem:[#allocation8 + $0x2e8] ss:$16 sps:$4 sm:$0xff]  }
 0x304   :  { %6458 = vmatpush1.bf16.msra.mxu0 %v7956_v1  ;;  %v8048_v1 = vld [vmem:[#allocation8 + $0x304] ss:$16 sps:$4 sm:$0xff]  }
 0x305   :  { %6630 = vmatpush1.bf16.msra.mxu1 %v7959_v2  ;;  %6459 = vmatprep.subr.bf16.mxu0 %v7964_v3  ;;  %v8051_v2 = vld [vmem:[#allocation8 + $0x30c] ss:$16 sps:$4 sm:$0xff]   ;;  %v8046_v3 = vld [vmem:[#allocation8 + $0x300] ss:$16 sps:$4 sm:$0xff]  }
 0x306   :  { %6631 = vmatprep.subr.bf16.mxu1 %v7967_v15  ;;  %v8049_v15 = vld [vmem:[#allocation8 + $0x308] ss:$16 sps:$4 sm:$0xff]  }
 0x308   :  { %6460 = vmatpush1.bf16.msra.mxu0 %v7962_v4  ;;  %v8054_v4 = vld [vmem:[#allocation8 + $0x324] ss:$16 sps:$4 sm:$0xff]  }
 0x309   :  { %6632 = vmatpush1.bf16.msra.mxu1 %v7965_v5  ;;  %6461 = vmatprep.subr.bf16.mxu0 %v7970_v6  ;;  %v8057_v5 = vld [vmem:[#allocation8 + $0x32c] ss:$16 sps:$4 sm:$0xff]   ;;  %v8052_v6 = vld [vmem:[#allocation8 + $0x320] ss:$16 sps:$4 sm:$0xff]  }
 0x30a   :  { %6633 = vmatprep.subr.bf16.mxu1 %v7973_v7  ;;  %v8055_v7 = vld [vmem:[#allocation8 + $0x328] ss:$16 sps:$4 sm:$0xff]  }
 0x30c   :  { %6462 = vmatpush1.bf16.msra.mxu0 %v7968_v8  ;;  %v8060_v8 = vld [vmem:[#allocation8 + $0x344] ss:$16 sps:$4 sm:$0xff]  }
 0x30d   :  { %6634 = vmatpush1.bf16.msra.mxu1 %v7971_v9  ;;  %6463 = vmatprep.subr.bf16.mxu0 %v7976_v11  ;;  %v8063_v9 = vld [vmem:[#allocation8 + $0x34c] ss:$16 sps:$4 sm:$0xff]   ;;  %v8058_v11 = vld [vmem:[#allocation8 + $0x340] ss:$16 sps:$4 sm:$0xff]  }
 0x30e   :  { %6635 = vmatprep.subr.bf16.mxu1 %v7979_v12  ;;  %v8061_v12 = vld [vmem:[#allocation8 + $0x348] ss:$16 sps:$4 sm:$0xff]  }
 0x310   :  { %6464 = vmatpush1.bf16.msra.mxu0 %v7974_v13  ;;  %v8066_v13 = vld [vmem:[#allocation8 + $0x364] ss:$16 sps:$4 sm:$0xff]  }
 0x311   :  { %6636 = vmatpush1.bf16.msra.mxu1 %v7977_v25  ;;  %6465 = vmatprep.subr.bf16.mxu0 %v7982_v14  ;;  %v8069_v25 = vld [vmem:[#allocation8 + $0x36c] ss:$16 sps:$4 sm:$0xff]   ;;  %v8064_v14 = vld [vmem:[#allocation8 + $0x360] ss:$16 sps:$4 sm:$0xff]  }
 0x312   :  { %6637 = vmatprep.subr.bf16.mxu1 %v7985_v16  ;;  %v8067_v16 = vld [vmem:[#allocation8 + $0x368] ss:$16 sps:$4 sm:$0xff]  }
 0x314   :  { %6466 = vmatpush1.bf16.msra.mxu0 %v7980_v17  ;;  %v8072_v17 = vld [vmem:[#allocation8 + $0x384] ss:$16 sps:$4 sm:$0xff]  }
 0x315   :  { %6638 = vmatpush1.bf16.msra.mxu1 %v7983_v30  ;;  %6467 = vmatprep.subr.bf16.mxu0 %v7988_v18  ;;  %v8075_v30 = vld [vmem:[#allocation8 + $0x38c] ss:$16 sps:$4 sm:$0xff]   ;;  %v8070_v18 = vld [vmem:[#allocation8 + $0x380] ss:$16 sps:$4 sm:$0xff]  }
 0x316   :  { %6639 = vmatprep.subr.bf16.mxu1 %v7991_v19  ;;  %v8073_v19 = vld [vmem:[#allocation8 + $0x388] ss:$16 sps:$4 sm:$0xff]  }
 0x318   :  { %6468 = vmatpush1.bf16.msra.mxu0 %v7986_v20  ;;  %v8078_v20 = vld [vmem:[#allocation8 + $0x3a4] ss:$16 sps:$4 sm:$0xff]  }
 0x319   :  { %6640 = vmatpush1.bf16.msra.mxu1 %v7989_v21  ;;  %6469 = vmatprep.subr.bf16.mxu0 %v7994_v22  ;;  %v8081_v21 = vld [vmem:[#allocation8 + $0x3ac] ss:$16 sps:$4 sm:$0xff]   ;;  %v8076_v22 = vld [vmem:[#allocation8 + $0x3a0] ss:$16 sps:$4 sm:$0xff]  }
 0x31a   :  { %6641 = vmatprep.subr.bf16.mxu1 %v7997_v23  ;;  %v8079_v23 = vld [vmem:[#allocation8 + $0x3a8] ss:$16 sps:$4 sm:$0xff]  }
 0x31c   :  { %6470 = vmatpush1.bf16.msra.mxu0 %v7992_v26  ;;  %v8084_v26 = vld [vmem:[#allocation8 + $0x3c4] ss:$16 sps:$4 sm:$0xff]  }
 0x31d   :  { %6642 = vmatpush1.bf16.msra.mxu1 %v7995_v0  ;;  %6482 = vmatprep.subr.bf16.mxu0 %v8000_v27  ;;  %v8087_v0 = vld [vmem:[#allocation8 + $0x3cc] ss:$16 sps:$4 sm:$0xff]   ;;  %v8082_v27 = vld [vmem:[#allocation8 + $0x3c0] ss:$16 sps:$4 sm:$0xff]  }
 0x31e   :  { %6654 = vmatprep.subr.bf16.mxu1 %v8003_v28  ;;  %v8085_v28 = vld [vmem:[#allocation8 + $0x3c8] ss:$16 sps:$4 sm:$0xff]  }
 0x31f   :  { %6472 = vmatmul.mubr.bf16.vlgmr.msra.gmra.mrb[8].mxu0 %v8632_v44 }
 0x320   :  { %6644 = vmatmul.mubr.bf16.vlgmr.msra.gmra.mrb[8].mxu1 %v8632_v44  ;;  %6483 = vmatpush1.bf16.msra.mxu0 %v7998_v37  ;;  %v8021_v44 = vld [vmem:[#allocation8 + $0x26c] ss:$16 sps:$4 sm:$0xff]   ;;  %v8090_v37 = vld [vmem:[#allocation8 + $0x3e4] ss:$16 sps:$4 sm:$0xff]  }
 0x321   :  { %6514 = vmatprep.mubr.bf16.mxu0 %v8638_v57  ;;  %6655 = vmatpush1.bf16.msra.mxu1 %v8001_v46  ;;  %v8093_v46 = vld [vmem:[#allocation8 + $0x3ec] ss:$16 sps:$4 sm:$0xff]  }
 0x322   :  { %6686 = vmatprep.mubr.bf16.mxu1 %v8638_v57  ;;  %6484 = vmatprep.subr.bf16.mxu0 %v8006_v29  ;;  %v8022_v57 = vld [vmem:[#allocation8 + $0x280] ss:$16 sps:$4 sm:$0xff]  }
 0x323   :  { %6656 = vmatprep.subr.bf16.mxu1 %v8009_v24  ;;  %v8088_v29 = vld [vmem:[#allocation8 + $0x3e0] ss:$16 sps:$4 sm:$0xff]   ;;  %v8091_v24 = vld [vmem:[#allocation8 + $0x3e8] ss:$16 sps:$4 sm:$0xff]  }
 0x324   :  { %6485 = vmatpush1.bf16.msra.mxu0 %v8004_v31  ;;  %v8096_v31 = vld [vmem:[#allocation8 + $0x404] ss:$16 sps:$4 sm:$0xff]  }
 0x325   :  { %6657 = vmatpush1.bf16.msra.mxu1 %v8007_v32  ;;  %6486 = vmatprep.subr.bf16.mxu0 %v8012_v33  ;;  %v8099_v32 = vld [vmem:[#allocation8 + $0x40c] ss:$16 sps:$4 sm:$0xff]   ;;  %v8094_v33 = vld [vmem:[#allocation8 + $0x400] ss:$16 sps:$4 sm:$0xff]  }
 0x326   :  { %6658 = vmatprep.subr.bf16.mxu1 %v8015_v34  ;;  %v8097_v34 = vld [vmem:[#allocation8 + $0x408] ss:$16 sps:$4 sm:$0xff]  }
 0x328   :  { %6487 = vmatpush1.bf16.msra.mxu0 %v8010_v51  ;;  %v8102_v51 = vld [vmem:[#allocation8 + $0x424] ss:$16 sps:$4 sm:$0xff]  }
 0x329   :  { %6659 = vmatpush1.bf16.msra.mxu1 %v8013_v10  ;;  %6488 = vmatprep.subr.bf16.mxu0 %v8018_v35  ;;  %v8105_v10 = vld [vmem:[#allocation8 + $0x42c] ss:$16 sps:$4 sm:$0xff]   ;;  %v8100_v35 = vld [vmem:[#allocation8 + $0x420] ss:$16 sps:$4 sm:$0xff]  }
 0x32a   :  { %6660 = vmatprep.subr.bf16.mxu1 %v8021_v44  ;;  %v8103_v44 = vld [vmem:[#allocation8 + $0x428] ss:$16 sps:$4 sm:$0xff]  }
 0x32c   :  { %6489 = vmatpush1.bf16.msra.mxu0 %v8016_v38  ;;  %v8108_v38 = vld [vmem:[#allocation8 + $0x444] ss:$16 sps:$4 sm:$0xff]  }
 0x32d   :  { %6661 = vmatpush1.bf16.msra.mxu1 %v8019_v39  ;;  %6490 = vmatprep.subr.bf16.mxu0 %v8024_v55  ;;  %v8111_v39 = vld [vmem:[#allocation8 + $0x44c] ss:$16 sps:$4 sm:$0xff]   ;;  %v8106_v55 = vld [vmem:[#allocation8 + $0x440] ss:$16 sps:$4 sm:$0xff]  }
 0x32e   :  { %6662 = vmatprep.subr.bf16.mxu1 %v8027_v40  ;;  %v8109_v40 = vld [vmem:[#allocation8 + $0x448] ss:$16 sps:$4 sm:$0xff]  }
 0x330   :  { %6491 = vmatpush1.bf16.msra.mxu0 %v8022_v57  ;;  %v8114_v57 = vld [vmem:[#allocation8 + $0x464] ss:$16 sps:$4 sm:$0xff]  }
 0x331   :  { %6663 = vmatpush1.bf16.msra.mxu1 %v8025_v41  ;;  %6492 = vmatprep.subr.bf16.mxu0 %v8030_v42  ;;  %v8117_v41 = vld [vmem:[#allocation8 + $0x46c] ss:$16 sps:$4 sm:$0xff]   ;;  %v8112_v42 = vld [vmem:[#allocation8 + $0x460] ss:$16 sps:$4 sm:$0xff]  }
 0x332   :  { %6664 = vmatprep.subr.bf16.mxu1 %v8033_v45  ;;  %v8120_v45 = vld [vmem:[#allocation8 + $0x484] ss:$16 sps:$4 sm:$0xff]  }
 0x334   :  { %6493 = vmatpush1.bf16.msra.mxu0 %v8028_v47  ;;  %v8123_v47 = vld [vmem:[#allocation8 + $0x48c] ss:$16 sps:$4 sm:$0xff]  }
 0x335   :  { %6665 = vmatpush1.bf16.msra.mxu1 %v8031_v53  ;;  %6494 = vmatprep.subr.bf16.mxu0 %v8036_v54  ;;  %v8118_v53 = vld [vmem:[#allocation8 + $0x480] ss:$16 sps:$4 sm:$0xff]   ;;  %v8121_v54 = vld [vmem:[#allocation8 + $0x488] ss:$16 sps:$4 sm:$0xff]  }
 0x336   :  { %6666 = vmatprep.subr.bf16.mxu1 %v8039_v56  ;;  %v8126_v56 = vld [vmem:[#allocation8 + $0x4a4] ss:$16 sps:$4 sm:$0xff]  }
 0x338   :  { %6495 = vmatpush1.bf16.msra.mxu0 %v8034_v59  ;;  %v8129_v59 = vld [vmem:[#allocation8 + $0x4ac] ss:$16 sps:$4 sm:$0xff]  }
 0x339   :  { %6667 = vmatpush1.bf16.msra.mxu1 %v8037_v58  ;;  %6496 = vmatprep.subr.bf16.mxu0 %v8042_v60  ;;  %v8124_v58 = vld [vmem:[#allocation8 + $0x4a0] ss:$16 sps:$4 sm:$0xff]   ;;  %v8127_v60 = vld [vmem:[#allocation8 + $0x4a8] ss:$16 sps:$4 sm:$0xff]  }
 0x33a   :  { %6668 = vmatprep.subr.bf16.mxu1 %v8045_v61  ;;  %v8132_v61 = vld [vmem:[#allocation8 + $0x4c4] ss:$16 sps:$4 sm:$0xff]  }
 0x33c   :  { %6497 = vmatpush1.bf16.msra.mxu0 %v8040_v62  ;;  %v8135_v62 = vld [vmem:[#allocation8 + $0x4cc] ss:$16 sps:$4 sm:$0xff]  }
 0x33d   :  { %6669 = vmatpush1.bf16.msra.mxu1 %v8043_v63  ;;  %6498 = vmatprep.subr.bf16.mxu0 %v8048_v1  ;;  %v8130_v63 = vld [vmem:[#allocation8 + $0x4c0] ss:$16 sps:$4 sm:$0xff]   ;;  %v8133_v1 = vld [vmem:[#allocation8 + $0x4c8] ss:$16 sps:$4 sm:$0xff]  }
 0x33e   :  { %6670 = vmatprep.subr.bf16.mxu1 %v8051_v2  ;;  %v8138_v2 = vld [vmem:[#allocation8 + $0x4e4] ss:$16 sps:$4 sm:$0xff]  }
 0x340   :  { %6499 = vmatpush1.bf16.msra.mxu0 %v8046_v3  ;;  %v8141_v3 = vld [vmem:[#allocation8 + $0x4ec] ss:$16 sps:$4 sm:$0xff]  }
 0x341   :  { %6671 = vmatpush1.bf16.msra.mxu1 %v8049_v15  ;;  %6500 = vmatprep.subr.bf16.mxu0 %v8054_v4  ;;  %v8136_v15 = vld [vmem:[#allocation8 + $0x4e0] ss:$16 sps:$4 sm:$0xff]   ;;  %v8139_v4 = vld [vmem:[#allocation8 + $0x4e8] ss:$16 sps:$4 sm:$0xff]  }
 0x342   :  { %6672 = vmatprep.subr.bf16.mxu1 %v8057_v5  ;;  %v8144_v5 = vld [vmem:[#allocation8 + $0x504] ss:$16 sps:$4 sm:$0xff]  }
 0x344   :  { %6501 = vmatpush1.bf16.msra.mxu0 %v8052_v6  ;;  %v8147_v6 = vld [vmem:[#allocation8 + $0x50c] ss:$16 sps:$4 sm:$0xff]  }
 0x345   :  { %6673 = vmatpush1.bf16.msra.mxu1 %v8055_v7  ;;  %6502 = vmatprep.subr.bf16.mxu0 %v8060_v8  ;;  %v8142_v7 = vld [vmem:[#allocation8 + $0x500] ss:$16 sps:$4 sm:$0xff]   ;;  %v8145_v8 = vld [vmem:[#allocation8 + $0x508] ss:$16 sps:$4 sm:$0xff]  }
 0x346   :  { %6674 = vmatprep.subr.bf16.mxu1 %v8063_v9  ;;  %v8150_v9 = vld [vmem:[#allocation8 + $0x524] ss:$16 sps:$4 sm:$0xff]  }
 0x348   :  { %6503 = vmatpush1.bf16.msra.mxu0 %v8058_v11  ;;  %v8153_v11 = vld [vmem:[#allocation8 + $0x52c] ss:$16 sps:$4 sm:$0xff]  }
 0x349   :  { %6675 = vmatpush1.bf16.msra.mxu1 %v8061_v12  ;;  %6504 = vmatprep.subr.bf16.mxu0 %v8066_v13  ;;  %v8148_v12 = vld [vmem:[#allocation8 + $0x520] ss:$16 sps:$4 sm:$0xff]   ;;  %v8151_v13 = vld [vmem:[#allocation8 + $0x528] ss:$16 sps:$4 sm:$0xff]  }
 0x34a   :  { %6676 = vmatprep.subr.bf16.mxu1 %v8069_v25  ;;  %v8156_v25 = vld [vmem:[#allocation8 + $0x544] ss:$16 sps:$4 sm:$0xff]  }
 0x34c   :  { %6505 = vmatpush1.bf16.msra.mxu0 %v8064_v14  ;;  %v8159_v14 = vld [vmem:[#allocation8 + $0x54c] ss:$16 sps:$4 sm:$0xff]  }
 0x34d   :  { %6677 = vmatpush1.bf16.msra.mxu1 %v8067_v16  ;;  %6506 = vmatprep.subr.bf16.mxu0 %v8072_v17  ;;  %v8154_v16 = vld [vmem:[#allocation8 + $0x540] ss:$16 sps:$4 sm:$0xff]   ;;  %v8157_v17 = vld [vmem:[#allocation8 + $0x548] ss:$16 sps:$4 sm:$0xff]  }
 0x34e   :  { %6678 = vmatprep.subr.bf16.mxu1 %v8075_v30  ;;  %v8162_v30 = vld [vmem:[#allocation8 + $0x564] ss:$16 sps:$4 sm:$0xff]  }
 0x350   :  { %6507 = vmatpush1.bf16.msra.mxu0 %v8070_v18  ;;  %v8165_v18 = vld [vmem:[#allocation8 + $0x56c] ss:$16 sps:$4 sm:$0xff]  }
 0x351   :  { %6679 = vmatpush1.bf16.msra.mxu1 %v8073_v19  ;;  %6508 = vmatprep.subr.bf16.mxu0 %v8078_v20  ;;  %v8160_v19 = vld [vmem:[#allocation8 + $0x560] ss:$16 sps:$4 sm:$0xff]   ;;  %v8163_v20 = vld [vmem:[#allocation8 + $0x568] ss:$16 sps:$4 sm:$0xff]  }
 0x352   :  { %6680 = vmatprep.subr.bf16.mxu1 %v8081_v21  ;;  %v8168_v21 = vld [vmem:[#allocation8 + $0x584] ss:$16 sps:$4 sm:$0xff]  }
 0x354   :  { %6509 = vmatpush1.bf16.msra.mxu0 %v8076_v22  ;;  %v8171_v22 = vld [vmem:[#allocation8 + $0x58c] ss:$16 sps:$4 sm:$0xff]  }
 0x355   :  { %6681 = vmatpush1.bf16.msra.mxu1 %v8079_v23  ;;  %6510 = vmatprep.subr.bf16.mxu0 %v8084_v26  ;;  %v8166_v23 = vld [vmem:[#allocation8 + $0x580] ss:$16 sps:$4 sm:$0xff]   ;;  %v8169_v26 = vld [vmem:[#allocation8 + $0x588] ss:$16 sps:$4 sm:$0xff]  }
 0x356   :  { %6682 = vmatprep.subr.bf16.mxu1 %v8087_v0  ;;  %v8174_v0 = vld [vmem:[#allocation8 + $0x5a4] ss:$16 sps:$4 sm:$0xff]  }
 0x358   :  { %6511 = vmatpush1.bf16.msra.mxu0 %v8082_v27  ;;  %v8177_v27 = vld [vmem:[#allocation8 + $0x5ac] ss:$16 sps:$4 sm:$0xff]  }
 0x359   :  { %6683 = vmatpush1.bf16.msra.mxu1 %v8085_v28  ;;  %6512 = vmatprep.subr.bf16.mxu0 %v8090_v37  ;;  %v8172_v28 = vld [vmem:[#allocation8 + $0x5a0] ss:$16 sps:$4 sm:$0xff]   ;;  %v8175_v37 = vld [vmem:[#allocation8 + $0x5a8] ss:$16 sps:$4 sm:$0xff]  }
 0x35a   :  { %6684 = vmatprep.subr.bf16.mxu1 %v8093_v46  ;;  %v8180_v46 = vld [vmem:[#allocation8 + $0x5c4] ss:$16 sps:$4 sm:$0xff]  }
 0x35c   :  { %6513 = vmatpush1.bf16.msra.mxu0 %v8088_v29  ;;  %v8183_v29 = vld [vmem:[#allocation8 + $0x5cc] ss:$16 sps:$4 sm:$0xff]  }
 0x35d   :  { %6685 = vmatpush1.bf16.msra.mxu1 %v8091_v24  ;;  %6525 = vmatprep.subr.bf16.mxu0 %v8096_v31  ;;  %v8178_v24 = vld [vmem:[#allocation8 + $0x5c0] ss:$16 sps:$4 sm:$0xff]   ;;  %v8181_v31 = vld [vmem:[#allocation8 + $0x5c8] ss:$16 sps:$4 sm:$0xff]  }
 0x35e   :  { %6697 = vmatprep.subr.bf16.mxu1 %v8099_v32  ;;  %v8186_v32 = vld [vmem:[#allocation8 + $0x5e4] ss:$16 sps:$4 sm:$0xff]  }
 0x35f   :  { %6515 = vmatmul.mubr.bf16.vlgmr.msra.gmra.mrb[8].mxu0 %v8634_v48 }
 0x360   :  { %6687 = vmatmul.mubr.bf16.vlgmr.msra.gmra.mrb[8].mxu1 %v8634_v48  ;;  %6526 = vmatpush1.bf16.msra.mxu0 %v8094_v33  ;;  %v8115_v48 = vld [vmem:[#allocation8 + $0x468] ss:$16 sps:$4 sm:$0xff]   ;;  %v8189_v33 = vld [vmem:[#allocation8 + $0x5ec] ss:$16 sps:$4 sm:$0xff]  }
 0x361   :  { %6698 = vmatpush1.bf16.msra.mxu1 %v8097_v34  ;;  %6527 = vmatprep.subr.bf16.mxu0 %v8102_v51  ;;  %v8184_v34 = vld [vmem:[#allocation8 + $0x5e0] ss:$16 sps:$4 sm:$0xff]   ;;  %v8187_v51 = vld [vmem:[#allocation8 + $0x5e8] ss:$16 sps:$4 sm:$0xff]  }
 0x362   :  { %6699 = vmatprep.subr.bf16.mxu1 %v8105_v10  ;;  %v8192_v10 = vld [vmem:[#allocation8 + $0x604] ss:$16 sps:$4 sm:$0xff]  }
 0x364   :  { %6528 = vmatpush1.bf16.msra.mxu0 %v8100_v35  ;;  %v8195_v35 = vld [vmem:[#allocation8 + $0x60c] ss:$16 sps:$4 sm:$0xff]  }
 0x365   :  { %6700 = vmatpush1.bf16.msra.mxu1 %v8103_v44  ;;  %6529 = vmatprep.subr.bf16.mxu0 %v8108_v38  ;;  %v775_v44 = vsub.s32 4, %v8618_v36  ;;  %v783_v38 = vsub.s32 6, %v8618_v36 }
 0x366   :  { %6701 = vmatprep.subr.bf16.mxu1 %v8111_v39  ;;  %v779_v39 = vsub.s32 5, %v8618_v36 }
 0x368   :  { %6530 = vmatpush1.bf16.msra.mxu0 %v8106_v55  ;;  %v787_v55 = vsub.s32 7, %v8618_v36 }
 0x369   :  { %6702 = vmatpush1.bf16.msra.mxu1 %v8109_v40  ;;  %6531 = vmatprep.subr.bf16.mxu0 %v8114_v57  ;;  %v8318_v40 = vld [vmem:[#allocation7] sm:$0xff] }
 0x36a   :  { %6703 = vmatprep.subr.bf16.mxu1 %v8117_v41  ;;  %v776_v57 = vrot.slane %v8318_v40, %v775_v44  ;;  %v784_v41 = vrot.slane %v8318_v40, %v783_v38  ;;  %v8228_v44 = vld [vmem:[#allocation8 + $0x6c4] ss:$16 sps:$4 sm:$0xff]   ;;  %v8231_v38 = vld [vmem:[#allocation8 + $0x6cc] ss:$16 sps:$4 sm:$0xff]  }
 0x36c   :  { %6532 = vmatpush1.bf16.msra.mxu0 %v8112_v42  ;;  %v780_v42 = vrot.slane %v8318_v40, %v779_v39  ;;  %v8226_v39 = vld [vmem:[#allocation8 + $0x6c0] ss:$16 sps:$4 sm:$0xff]  }
 0x36d   :  { %6704 = vmatpush1.bf16.msra.mxu1 %v8115_v48  ;;  %6533 = vmatprep.subr.bf16.mxu0 %v8120_v45  ;;  %v788_v48 = vrot.slane %v8318_v40, %v787_v55  ;;  %v8229_v55 = vld [vmem:[#allocation8 + $0x6c8] ss:$16 sps:$4 sm:$0xff]   ;;  %v8234_v40 = vld [vmem:[#allocation8 + $0x6e4] ss:$16 sps:$4 sm:$0xff]  }
 0x36e   :  { %6705 = vmatprep.subr.bf16.mxu1 %v8123_v47 }
 0x370   :  { %6534 = vmatpush1.bf16.msra.mxu0 %v8118_v53 }
 0x371   :  { %6706 = vmatpush1.bf16.msra.mxu1 %v8121_v54  ;;  %6535 = vmatprep.subr.bf16.mxu0 %v8126_v56 }
 0x372   :  { %6707 = vmatprep.subr.bf16.mxu1 %v8129_v59 }
 0x374   :  { %6536 = vmatpush1.bf16.msra.mxu0 %v8124_v58 }
 0x375   :  { %6708 = vmatpush1.bf16.msra.mxu1 %v8127_v60  ;;  %6537 = vmatprep.subr.bf16.mxu0 %v8132_v61 }
 0x376   :  { %6709 = vmatprep.subr.bf16.mxu1 %v8135_v62 }
 0x378   :  { %6538 = vmatpush1.bf16.msra.mxu0 %v8130_v63 }
 0x379   :  { %6710 = vmatpush1.bf16.msra.mxu1 %v8133_v1  ;;  %6539 = vmatprep.subr.bf16.mxu0 %v8138_v2 }
 0x37a   :  { %6711 = vmatprep.subr.bf16.mxu1 %v8141_v3 }
 0x37c   :  { %6540 = vmatpush1.bf16.msra.mxu0 %v8136_v15 }
 0x37d   :  { %6712 = vmatpush1.bf16.msra.mxu1 %v8139_v4  ;;  %6541 = vmatprep.subr.bf16.mxu0 %v8144_v5 }
 0x37e   :  { %6713 = vmatprep.subr.bf16.mxu1 %v8147_v6 }
 0x380   :  { %6542 = vmatpush1.bf16.msra.mxu0 %v8142_v7 }
 0x381   :  { %6714 = vmatpush1.bf16.msra.mxu1 %v8145_v8  ;;  %6543 = vmatprep.subr.bf16.mxu0 %v8150_v9 }
 0x382   :  { %6715 = vmatprep.subr.bf16.mxu1 %v8153_v11 }
 0x384   :  { %6544 = vmatpush1.bf16.msra.mxu0 %v8148_v12 }
 0x385   :  { %6716 = vmatpush1.bf16.msra.mxu1 %v8151_v13  ;;  %6545 = vmatprep.subr.bf16.mxu0 %v8156_v25 }
 0x386   :  { %6717 = vmatprep.subr.bf16.mxu1 %v8159_v14 }
 0x388   :  { %6546 = vmatpush1.bf16.msra.mxu0 %v8154_v16 }
 0x389   :  { %6718 = vmatpush1.bf16.msra.mxu1 %v8157_v17  ;;  %6547 = vmatprep.subr.bf16.mxu0 %v8162_v30  ;;  %v8190_v17 = vld [vmem:[#allocation8 + $0x600] ss:$16 sps:$4 sm:$0xff]   ;;  %v8193_v30 = vld [vmem:[#allocation8 + $0x608] ss:$16 sps:$4 sm:$0xff]  }
 0x38a   :  { %6719 = vmatprep.subr.bf16.mxu1 %v8165_v18 }
 0x38c   :  { %6548 = vmatpush1.bf16.msra.mxu0 %v8160_v19  ;;  %v8198_v19 = vld [vmem:[#allocation8 + $0x624] ss:$16 sps:$4 sm:$0xff]  }
 0x38d   :  { %6720 = vmatpush1.bf16.msra.mxu1 %v8163_v20  ;;  %6549 = vmatprep.subr.bf16.mxu0 %v8168_v21  ;;  %v8201_v20 = vld [vmem:[#allocation8 + $0x62c] ss:$16 sps:$4 sm:$0xff]   ;;  %v8196_v21 = vld [vmem:[#allocation8 + $0x620] ss:$16 sps:$4 sm:$0xff]  }
 0x38e   :  { %6721 = vmatprep.subr.bf16.mxu1 %v8171_v22  ;;  %v8199_v22 = vld [vmem:[#allocation8 + $0x628] ss:$16 sps:$4 sm:$0xff]  }
 0x390   :  { %6550 = vmatpush1.bf16.msra.mxu0 %v8166_v23  ;;  %v8204_v23 = vld [vmem:[#allocation8 + $0x644] ss:$16 sps:$4 sm:$0xff]  }
 0x391   :  { %6722 = vmatpush1.bf16.msra.mxu1 %v8169_v26  ;;  %6551 = vmatprep.subr.bf16.mxu0 %v8174_v0  ;;  %v8207_v26 = vld [vmem:[#allocation8 + $0x64c] ss:$16 sps:$4 sm:$0xff]   ;;  %v8202_v0 = vld [vmem:[#allocation8 + $0x640] ss:$16 sps:$4 sm:$0xff]  }
 0x392   :  { %6723 = vmatprep.subr.bf16.mxu1 %v8177_v27  ;;  %v8205_v27 = vld [vmem:[#allocation8 + $0x648] ss:$16 sps:$4 sm:$0xff]  }
 0x394   :  { %6552 = vmatpush1.bf16.msra.mxu0 %v8172_v28  ;;  %v8210_v28 = vld [vmem:[#allocation8 + $0x664] ss:$16 sps:$4 sm:$0xff]  }
 0x395   :  { %6724 = vmatpush1.bf16.msra.mxu1 %v8175_v37  ;;  %6553 = vmatprep.subr.bf16.mxu0 %v8180_v46  ;;  %v8213_v37 = vld [vmem:[#allocation8 + $0x66c] ss:$16 sps:$4 sm:$0xff]   ;;  %v8208_v46 = vld [vmem:[#allocation8 + $0x660] ss:$16 sps:$4 sm:$0xff]  }
 0x396   :  { %6725 = vmatprep.subr.bf16.mxu1 %v8183_v29  ;;  %v8211_v29 = vld [vmem:[#allocation8 + $0x668] ss:$16 sps:$4 sm:$0xff]  }
 0x398   :  { %6554 = vmatpush1.bf16.msra.mxu0 %v8178_v24  ;;  %v8216_v24 = vld [vmem:[#allocation8 + $0x684] ss:$16 sps:$4 sm:$0xff]  }
 0x399   :  { %6726 = vmatpush1.bf16.msra.mxu1 %v8181_v31  ;;  %6555 = vmatprep.subr.bf16.mxu0 %v8186_v32  ;;  %v8219_v31 = vld [vmem:[#allocation8 + $0x68c] ss:$16 sps:$4 sm:$0xff]   ;;  %v8214_v32 = vld [vmem:[#allocation8 + $0x680] ss:$16 sps:$4 sm:$0xff]  }
 0x39a   :  { %6727 = vmatprep.subr.bf16.mxu1 %v8189_v33  ;;  %v8217_v33 = vld [vmem:[#allocation8 + $0x688] ss:$16 sps:$4 sm:$0xff]  }
 0x39c   :  { %6556 = vmatpush1.bf16.msra.mxu0 %v8184_v34  ;;  %v8222_v34 = vld [vmem:[#allocation8 + $0x6a4] ss:$16 sps:$4 sm:$0xff]  }
 0x39d   :  { %6728 = vmatpush1.bf16.msra.mxu1 %v8187_v51  ;;  %6568 = vmatprep.subr.bf16.mxu0 %v8192_v10  ;;  %v8225_v51 = vld [vmem:[#allocation8 + $0x6ac] ss:$16 sps:$4 sm:$0xff]   ;;  %v8220_v10 = vld [vmem:[#allocation8 + $0x6a0] ss:$16 sps:$4 sm:$0xff]  }
 0x39e   :  { %6740 = vmatprep.subr.bf16.mxu1 %v8195_v35  ;;  %v8223_v35 = vld [vmem:[#allocation8 + $0x6a8] ss:$16 sps:$4 sm:$0xff]  }
 0x3b2   :  { %v4633_v45 = vpop.f32.mrb[4].mxu0  ;;  %v4848_v53 = vpop.f32.mrb[4].mxu1 }
 0x3b3   :  { %v7786_v47 = vadd.f32 %v4633_v45, %v776_v57  ;;  %v4635_v54 = vpop.f32.mrb[5].mxu0  ;;  %v7790_v56 = vadd.f32 %v4848_v53, %v784_v41  ;;  %v4850_v58 = vpop.f32.mrb[5].mxu1  ;;  %v8243_v45 = vld [vmem:[#allocation8 + $0x70c] ss:$16 sps:$4 sm:$0xff]   ;;  %v8241_v53 = vld [vmem:[#allocation8 + $0x708] ss:$16 sps:$4 sm:$0xff]  }
 0x3b4   :  { %v7787_v59 = vadd.f32 %v4635_v54, %v780_v42  ;;  %v4637_v60 = vpop.f32.mrb[6].mxu0  ;;  %v7791_v61 = vadd.f32 %v4850_v58, %v788_v48  ;;  %v4852_v63 = vpop.f32.mrb[6].mxu1  ;;  %v8246_v54 = vld [vmem:[#allocation8 + $0x724] ss:$16 sps:$4 sm:$0xff]   ;;  %v8247_v58 = vld [vmem:[#allocation8 + $0x728] ss:$16 sps:$4 sm:$0xff]  }
 0x3b5   :  { %v7788_v62 = vadd.f32 %v4637_v60, %v776_v57  ;;  %v4639_v1 = vpop.f32.mrb[7].mxu0  ;;  %v7792_v2 = vadd.f32 %v4852_v63, %v784_v41  ;;  %v4854_v15 = vpop.f32.mrb[7].mxu1  ;;  %v4861_v4 = vmax.f32 %v7786_v47, 0.0  ;;  %v4863_v7 = vmax.f32 %v7790_v56, 0.0  ;;  %v8237_v57 = vld [vmem:[#allocation8 + $0x6ec] ss:$16 sps:$4 sm:$0xff]  }
 0x3b6   :  { %v7789_v3 = vadd.f32 %v4639_v1, %v780_v42  ;;  %v7793_v6 = vadd.f32 %v4854_v15, %v788_v48  ;;  %v4862_v8 = vmax.f32 %v7787_v59, 0.0  ;;  %v4864_v12 = vmax.f32 %v7791_v61, 0.0  ;;  %v8232_v41 = vld [vmem:[#allocation8 + $0x6e0] ss:$16 sps:$4 sm:$0xff]   ;;  %v8235_v42 = vld [vmem:[#allocation8 + $0x6e8] ss:$16 sps:$4 sm:$0xff]  }
 0x3b7   :  { %v4869_v5 = vmax.f32 %v7788_v62, 0.0  ;;  %v4871_v9 = vmax.f32 %v7792_v2, 0.0  ;;  %v8240_v48 = vld [vmem:[#allocation8 + $0x704] ss:$16 sps:$4 sm:$0xff]   ;;  %v8238_v47 = vld [vmem:[#allocation8 + $0x700] ss:$16 sps:$4 sm:$0xff]  }
 0x3b8   :  { %v4870_v11 = vmax.f32 %v7789_v3, 0.0  ;;  %v4872_v25 = vmax.f32 %v7793_v6, 0.0  ;;  %v8249_v56 = vld [vmem:[#allocation8 + $0x72c] ss:$16 sps:$4 sm:$0xff]   ;;  %v8244_v59 = vld [vmem:[#allocation8 + $0x720] ss:$16 sps:$4 sm:$0xff]  }
 0x3b9   :  { %v4877_v13 = vpack.c.bf16 %v4869_v5, %v4861_v4  ;;  %v8658_v14 = vpack.c.bf16 %v4871_v9, %v4863_v7  ;;  %v8252_v60 = vld [vmem:[#allocation8 + $0x744] ss:$16 sps:$4 sm:$0xff]   ;;  %v8255_v61 = vld [vmem:[#allocation8 + $0x74c] ss:$16 sps:$4 sm:$0xff]   ;;  %v8250_v62 = vld [vmem:[#allocation8 + $0x740] ss:$16 sps:$4 sm:$0xff]  }
 0x3ba   :  { %v4878_v16 = vpack.c.bf16 %v4870_v11, %v4862_v8  ;;  %v4880_v18 = vpack.c.bf16 %v4872_v25, %v4864_v12  ;;  %v8253_v63 = vld [vmem:[#allocation8 + $0x748] ss:$16 sps:$4 sm:$0xff]   ;;  %v8258_v1 = vld [vmem:[#allocation8 + $0x764] ss:$16 sps:$4 sm:$0xff]   ;;  %v8261_v2 = vld [vmem:[#allocation8 + $0x76c] ss:$16 sps:$4 sm:$0xff]  }
 0x3bb   :  { %v8256_v3 = vld [vmem:[#allocation8 + $0x760] ss:$16 sps:$4 sm:$0xff]   ;;  %v8259_v15 = vld [vmem:[#allocation8 + $0x768] ss:$16 sps:$4 sm:$0xff]   ;;  %v8264_v4 = vld [vmem:[#allocation8 + $0x784] ss:$16 sps:$4 sm:$0xff]  }
 0x3bc   :  { %6557 = vmatprep.mubr.bf16.mxu0 %v4878_v16  ;;  %6729 = vmatprep.mubr.bf16.mxu1 %v4878_v16  ;;  %v8267_v5 = vld [vmem:[#allocation8 + $0x78c] ss:$16 sps:$4 sm:$0xff]   ;;  %v8262_v6 = vld [vmem:[#allocation8 + $0x780] ss:$16 sps:$4 sm:$0xff]   ;;  %v8265_v7 = vld [vmem:[#allocation8 + $0x788] ss:$16 sps:$4 sm:$0xff]  }
 0x3bd   :  { %6558 = vmatmul.mubr.bf16.vlgmr.msra.gmra.mrb[8].mxu0 %v4877_v13  ;;  %6730 = vmatmul.mubr.bf16.vlgmr.msra.gmra.mrb[8].mxu1 %v4877_v13  ;;  %v8270_v8 = vld [vmem:[#allocation8 + $0x7a4] ss:$16 sps:$4 sm:$0xff]   ;;  %v8273_v9 = vld [vmem:[#allocation8 + $0x7ac] ss:$16 sps:$4 sm:$0xff]   ;;  %v8268_v11 = vld [vmem:[#allocation8 + $0x7a0] ss:$16 sps:$4 sm:$0xff]  }
 0x3be   :  { %6569 = vmatpush1.bf16.msra.mxu0 %v8190_v17  ;;  %6741 = vmatpush1.bf16.msra.mxu1 %v8193_v30  ;;  %v8271_v12 = vld [vmem:[#allocation8 + $0x7a8] ss:$16 sps:$4 sm:$0xff]   ;;  %v8276_v13 = vld [vmem:[#allocation8 + $0x7c4] ss:$16 sps:$4 sm:$0xff]   ;;  %v8279_v25 = vld [vmem:[#allocation8 + $0x7cc] ss:$16 sps:$4 sm:$0xff]  }
 0x3bf   :  { %6600 = vmatprep.mubr.bf16.mxu0 %v4880_v18  ;;  %6772 = vmatprep.mubr.bf16.mxu1 %v4880_v18  ;;  %v8274_v16 = vld [vmem:[#allocation8 + $0x7c0] ss:$16 sps:$4 sm:$0xff]   ;;  %v8277_v17 = vld [vmem:[#allocation8 + $0x7c8] ss:$16 sps:$4 sm:$0xff]   ;;  %v8282_v30 = vld [vmem:[#allocation8 + $0x7e4] ss:$16 sps:$4 sm:$0xff]  }
 0x3c0   :  { %6570 = vmatprep.subr.bf16.mxu0 %v8198_v19  ;;  %6742 = vmatprep.subr.bf16.mxu1 %v8201_v20  ;;  %v8285_v18 = vld [vmem:[#allocation8 + $0x7ec] ss:$16 sps:$4 sm:$0xff]   ;;  %v8280_v19 = vld [vmem:[#allocation8 + $0x7e0] ss:$16 sps:$4 sm:$0xff]   ;;  %v8283_v20 = vld [vmem:[#allocation8 + $0x7e8] ss:$16 sps:$4 sm:$0xff]  }
 0x3c2   :  { %6571 = vmatpush1.bf16.msra.mxu0 %v8196_v21  ;;  %6743 = vmatpush1.bf16.msra.mxu1 %v8199_v22  ;;  %v5137_v21 = vld [vmem:[#allocation10] sm:$0xf] }
 0x3c3   :  { %6572 = vmatprep.subr.bf16.mxu0 %v8204_v23  ;;  %6744 = vmatprep.subr.bf16.mxu1 %v8207_v26  ;;  %v5142_v22 = vrot.slane %v5137_v21, %v759_v43  ;;  %v5150_v23 = vrot.slane %v5137_v21, %v767_v49  ;;  %v5146_v26 = vrot.slane %v5137_v21, %v763_v50 }
 0x3c6   :  { %6573 = vmatpush1.bf16.msra.mxu0 %v8202_v0  ;;  %6745 = vmatpush1.bf16.msra.mxu1 %v8205_v27  ;;  %v5154_v0 = vrot.slane %v5137_v21, %v771_v52 }
 0x3c7   :  { %6574 = vmatprep.subr.bf16.mxu0 %v8210_v28  ;;  %6746 = vmatprep.subr.bf16.mxu1 %v8213_v37 }
 0x3ca   :  { %6575 = vmatpush1.bf16.msra.mxu0 %v8208_v46  ;;  %6747 = vmatpush1.bf16.msra.mxu1 %v8211_v29 }
 0x3cb   :  { %6576 = vmatprep.subr.bf16.mxu0 %v8216_v24  ;;  %6748 = vmatprep.subr.bf16.mxu1 %v8219_v31 }
 0x3ce   :  { %6577 = vmatpush1.bf16.msra.mxu0 %v8214_v32  ;;  %6749 = vmatpush1.bf16.msra.mxu1 %v8217_v33 }
 0x3cf   :  { %6578 = vmatprep.subr.bf16.mxu0 %v8222_v34  ;;  %6750 = vmatprep.subr.bf16.mxu1 %v8225_v51 }
 0x3d2   :  { %6579 = vmatpush1.bf16.msra.mxu0 %v8220_v10  ;;  %6751 = vmatpush1.bf16.msra.mxu1 %v8223_v35 }
 0x3d3   :  { %6580 = vmatprep.subr.bf16.mxu0 %v8228_v44  ;;  %6752 = vmatprep.subr.bf16.mxu1 %v8231_v38 }
 0x3d6   :  { %6581 = vmatpush1.bf16.msra.mxu0 %v8226_v39  ;;  %6753 = vmatpush1.bf16.msra.mxu1 %v8229_v55 }
 0x3d7   :  { %6582 = vmatprep.subr.bf16.mxu0 %v8234_v40  ;;  %6754 = vmatprep.subr.bf16.mxu1 %v8237_v57 }
 0x3da   :  { %6583 = vmatpush1.bf16.msra.mxu0 %v8232_v41  ;;  %6755 = vmatpush1.bf16.msra.mxu1 %v8235_v42 }
 0x3db   :  { %6584 = vmatprep.subr.bf16.mxu0 %v8240_v48  ;;  %6756 = vmatprep.subr.bf16.mxu1 %v8243_v45 }
 0x3de   :  { %6585 = vmatpush1.bf16.msra.mxu0 %v8238_v47  ;;  %6757 = vmatpush1.bf16.msra.mxu1 %v8241_v53 }
 0x3df   :  { %6586 = vmatprep.subr.bf16.mxu0 %v8246_v54  ;;  %6758 = vmatprep.subr.bf16.mxu1 %v8249_v56 }
 0x3e2   :  { %6587 = vmatpush1.bf16.msra.mxu0 %v8244_v59  ;;  %6759 = vmatpush1.bf16.msra.mxu1 %v8247_v58 }
 0x3e3   :  { %6588 = vmatprep.subr.bf16.mxu0 %v8252_v60  ;;  %6760 = vmatprep.subr.bf16.mxu1 %v8255_v61 }
 0x3e6   :  { %6589 = vmatpush1.bf16.msra.mxu0 %v8250_v62  ;;  %6761 = vmatpush1.bf16.msra.mxu1 %v8253_v63 }
 0x3e7   :  { %6590 = vmatprep.subr.bf16.mxu0 %v8258_v1  ;;  %6762 = vmatprep.subr.bf16.mxu1 %v8261_v2 }
 0x3ea   :  { %6591 = vmatpush1.bf16.msra.mxu0 %v8256_v3  ;;  %6763 = vmatpush1.bf16.msra.mxu1 %v8259_v15 }
 0x3eb   :  { %6592 = vmatprep.subr.bf16.mxu0 %v8264_v4  ;;  %6764 = vmatprep.subr.bf16.mxu1 %v8267_v5 }
 0x3ee   :  { %6593 = vmatpush1.bf16.msra.mxu0 %v8262_v6  ;;  %6765 = vmatpush1.bf16.msra.mxu1 %v8265_v7 }
 0x3ef   :  { %6594 = vmatprep.subr.bf16.mxu0 %v8270_v8  ;;  %6766 = vmatprep.subr.bf16.mxu1 %v8273_v9 }
 0x3f2   :  { %6595 = vmatpush1.bf16.msra.mxu0 %v8268_v11  ;;  %6767 = vmatpush1.bf16.msra.mxu1 %v8271_v12 }
 0x3f3   :  { %6596 = vmatprep.subr.bf16.mxu0 %v8276_v13  ;;  %6768 = vmatprep.subr.bf16.mxu1 %v8279_v25 }
 0x3f6   :  { %6597 = vmatpush1.bf16.msra.mxu0 %v8274_v16  ;;  %6769 = vmatpush1.bf16.msra.mxu1 %v8277_v17 }
 0x3f7   :  { %6598 = vmatprep.subr.bf16.mxu0 %v8282_v30  ;;  %6770 = vmatprep.subr.bf16.mxu1 %v8285_v18 }
 0x3fa   :  { %6599 = vmatpush1.bf16.msra.mxu0 %v8280_v19  ;;  %6771 = vmatpush1.bf16.msra.mxu1 %v8283_v20 }
 0x3fd   :  { %6601 = vmatmul.mubr.bf16.vlgmr.msra.gmra.mrb[8].mxu0 %v8658_v14  ;;  %6773 = vmatmul.mubr.bf16.vlgmr.msra.gmra.mrb[8].mxu1 %v8658_v14 }
 0x4d0   :  { %v6602_v27 = vpop.f32.mrb[8].mxu0  ;;  %v6774_v28 = vpop.f32.mrb[8].mxu1 }
 0x4d1   :  { %v8670_v37 = vadd.f32 %v6602_v27, %v5142_v22  ;;  %v8672_v46 = vadd.f32 %v6774_v28, %v5150_v23  ;;  %v6604_v14 = vpop.f32.mrb[9].mxu0  ;;  %v6776_v29 = vpop.f32.mrb[9].mxu1 }
 0x4d2   :  { %v8674_v24 = vadd.f32 %v6604_v14, %v5146_v26  ;;  %v8676_v43 = vadd.f32 %v6776_v29, %v5154_v0  ;;  %v6606_v31 = vpop.f32.mrb[10].mxu0  ;;  %v6778_v49 = vpop.f32.mrb[10].mxu1 }
 0x4d3   :  { %v6783_v32 = vand.u32 2147483647, %v8670_v37  ;;  %v6785_v50 = vand.u32 2147483647, %v8672_v46  ;;  %v8682_v51 = vadd.f32 %v6606_v31, %v5142_v22  ;;  %v8684_v10 = vadd.f32 %v6778_v49, %v5150_v23  ;;  %v6608_v35 = vpop.f32.mrb[11].mxu0  ;;  %v6780_v44 = vpop.f32.mrb[11].mxu1 }
 0x4d4   :  { %v6784_v36 = vand.u32 2147483647, %v8674_v24  ;;  %v6786_v52 = vand.u32 2147483647, %v8676_v43  ;;  %v8686_v55 = vadd.f32 %v6608_v35, %v5146_v26  ;;  %v8688_v40 = vadd.f32 %v6780_v44, %v5154_v0 }
 0x4d5   :  { %v6791_v33 = vsub.f32 0.0, %v6783_v32  ;;  %v6793_v34 = vsub.f32 0.0, %v6785_v50  ;;  %v6787_v42 = vand.u32 2147483647, %v8682_v51  ;;  %v6789_v53 = vand.u32 2147483647, %v8684_v10 }
 0x4d6   :  { %v6792_v38 = vsub.f32 0.0, %v6784_v36  ;;  %v6794_v39 = vsub.f32 0.0, %v6786_v52  ;;  %v6788_v54 = vand.u32 2147483647, %v8686_v55  ;;  %v6790_v56 = vand.u32 2147483647, %v8688_v40 }
 0x4d7   :  { %v6799_v57 = vmul.f32 1.442695, %v6791_v33  ;;  %v6803_v41 = vmul.f32 1.442695, %v6793_v34  ;;  %v6795_v47 = vsub.f32 0.0, %v6787_v42  ;;  %v6797_v58 = vsub.f32 0.0, %v6789_v53 }
 0x4d8   :  { %v6801_v48 = vmul.f32 1.442695, %v6792_v38  ;;  %v6805_v45 = vmul.f32 1.442695, %v6794_v39  ;;  %v6796_v60 = vsub.f32 0.0, %v6788_v54  ;;  %v6798_v61 = vsub.f32 0.0, %v6790_v56 }
 0x4d9   :  { %8286 = vpow2.f32 %v6799_v57  ;;  %v6807_v59 = vmul.f32 1.442695, %v6795_v47  ;;  %v6811_v62 = vmul.f32 1.442695, %v6797_v58  ;;  %vm6831_vm0 = vcmp.ge.f32.partialorder %v8670_v37, 0.0 }
 0x4da   :  { %8288 = vpow2.f32 %v6803_v41  ;;  %v6809_v63 = vmul.f32 1.442695, %v6796_v60  ;;  %v6813_v1 = vmul.f32 1.442695, %v6798_v61  ;;  %vm6833_vm1 = vcmp.ge.f32.partialorder %v8672_v46, 0.0 }
 0x4db   :  { %8290 = vpow2.f32 %v6801_v48  ;;  %vm6832_vm2 = vcmp.ge.f32.partialorder %v8674_v24, 0.0  ;;  %vm6834_vm3 = vcmp.ge.f32.partialorder %v8676_v43, 0.0  ;;  %vm6835_vm4 = vcmp.ge.f32.partialorder %v8682_v51, 0.0 }
 0x4dc   :  { %8292 = vpow2.f32 %v6805_v45  ;;  %vm6837_vm5 = vcmp.ge.f32.partialorder %v8684_v10, 0.0  ;;  %vm6836_vm6 = vcmp.ge.f32.partialorder %v8686_v55, 0.0  ;;  %vm6838_vm7 = vcmp.ge.f32.partialorder %v8688_v40, 0.0 }
 0x4dd   :  { %8294 = vpow2.f32 %v6807_v59 }
 0x4de   :  { %8296 = vpow2.f32 %v6811_v62 }
 0x4df   :  { %8298 = vpow2.f32 %v6809_v63 }
 0x4e0   :  { %8300 = vpow2.f32 %v6813_v1 }
 0x4e3   :  { %v8287_v2 = vpop.eup %8286 }
 0x4e4   :  { %v8289_v3 = vpop.eup %8288  ;;  %v6815_v15 = vadd.f32 1.0, %v8287_v2 }
 0x4e5   :  { %v8291_v4 = vpop.eup %8290  ;;  %v6817_v5 = vadd.f32 1.0, %v8289_v3 }
 0x4e6   :  { %v8293_v6 = vpop.eup %8292  ;;  %8302 = vrcp.f32 %v6815_v15  ;;  %v6816_v7 = vadd.f32 1.0, %v8291_v4 }
 0x4e7   :  { %v8295_v8 = vpop.eup %8294  ;;  %8304 = vrcp.f32 %v6817_v5  ;;  %v6818_v9 = vadd.f32 1.0, %v8293_v6 }
 0x4e8   :  { %8306 = vrcp.f32 %v6816_v7  ;;  %v6819_v11 = vadd.f32 1.0, %v8295_v8  ;;  %v8297_v12 = vpop.eup %8296 }
 0x4e9   :  { %8308 = vrcp.f32 %v6818_v9  ;;  %v8299_v13 = vpop.eup %8298  ;;  %v6821_v25 = vadd.f32 1.0, %v8297_v12 }
 0x4ea   :  { %8310 = vrcp.f32 %v6819_v11  ;;  %v8301_v16 = vpop.eup %8300  ;;  %v6820_v17 = vadd.f32 1.0, %v8299_v13 }
 0x4eb   :  { %8312 = vrcp.f32 %v6821_v25  ;;  %v6822_v30 = vadd.f32 1.0, %v8301_v16 }
 0x4ec   :  { %8314 = vrcp.f32 %v6820_v17 }
 0x4ed   :  { %8316 = vrcp.f32 %v6822_v30 }
 0x4f0   :  { %v8303_v18 = vpop.eup %8302 }
 0x4f1   :  { %v8305_v19 = vpop.eup %8304  ;;  %v6839_v20 = vmul.f32 %v8303_v18, %v8287_v2 }
 0x4f2   :  { %v8307_v21 = vpop.eup %8306  ;;  %v6841_v22 = vmul.f32 %v8305_v19, %v8289_v3 }
 0x4f3   :  { %v8309_v23 = vpop.eup %8308  ;;  %v6847_v26 = vsel %vm6831_vm0, %v8303_v18, %v6839_v20  ;;  %v6840_v0 = vmul.f32 %v8307_v21, %v8291_v4 }
 0x4f4   :  { %v8311_v27 = vpop.eup %8310  ;;  %6855 = vst [vmem:[#allocation11] sm:$0xff] %v6847_v26  ;;  %v6849_v28 = vsel %vm6833_vm1, %v8305_v19, %v6841_v22  ;;  %v6842_v14 = vmul.f32 %v8309_v23, %v8293_v6 }
 0x4f5   :  { %6857 = vst [vmem:[#allocation11 + $0x10] sm:$0xff] %v6849_v28  ;;  %v6848_v29 = vsel %vm6832_vm2, %v8307_v21, %v6840_v0  ;;  %v6843_v31 = vmul.f32 %v8311_v27, %v8295_v8  ;;  %v8313_v49 = vpop.eup %8312 }
 0x4f6   :  { %6856 = vst [vmem:[#allocation11 + $0x8] sm:$0xff] %v6848_v29  ;;  %v6850_v37 = vsel %vm6834_vm3, %v8309_v23, %v6842_v14  ;;  %v8315_v32 = vpop.eup %8314  ;;  %v6845_v50 = vmul.f32 %v8313_v49, %v8297_v12 }
 0x4f7   :  { %6858 = vst [vmem:[#allocation11 + $0x18] sm:$0xff] %v6850_v37  ;;  %v6851_v46 = vsel %vm6835_vm4, %v8311_v27, %v6843_v31  ;;  %v8317_v36 = vpop.eup %8316  ;;  %v6844_v24 = vmul.f32 %v8315_v32, %v8299_v13 }
 0x4f8   :  { %6859 = vst [vmem:[#allocation11 + $0x20] sm:$0xff] %v6851_v46  ;;  %v6853_v52 = vsel %vm6837_vm5, %v8313_v49, %v6845_v50  ;;  %v6846_v43 = vmul.f32 %v8317_v36, %v8301_v16 }
 0x4f9   :  { %6861 = vst [vmem:[#allocation11 + $0x30] sm:$0xff] %v6853_v52  ;;  %v6852_v33 = vsel %vm6836_vm6, %v8315_v32, %v6844_v24 }
 0x4fa   :  { %6860 = vst [vmem:[#allocation11 + $0x28] sm:$0xff] %v6852_v33  ;;  %v6854_v34 = vsel %vm6838_vm7, %v8317_v36, %v6846_v43 }
 0x4fb   :  { %6862 = vst [vmem:[#allocation11 + $0x38] sm:$0xff] %v6854_v34 }
 0x4fc   :  { %8440 = shalt.err (!%p8437_p2)
}
 0x4fd   :  { %s8441_s11 = scalar_lea.hbm %s8722_s5, 1024 }
 0x4fe   :  { %p8442_p3 = scmp.ne.s32.totalorder %s8722_s5, %s8441_s11  ;;  %p8445_p4 = scmp.lt.u32.totalorder %s8441_s11, %s8722_s5 }
 0x500   :  { %p8447_p5 = pnand %p8445_p4, %p8442_p3 }
 0x502   :  { %8450 = shalt.err (!%p8447_p5)
}
 0x503   :  { %6874 = dma.vmem_to_hbm [thread:$0]  %s6869_s7, 1024, %s8722_s5, [#allocation4], %s8460_s28, %s8460_s28, %s8461_s29  }
 0x504   :  { %8457 = dma.done.wait [#allocation4], 1024  }
 0x505   :  { %8458 = vsyncadd [#allocation4], 4294966272 }
 0x506   :  { %6878 = vsyncpa [#allocation3], 1 }
 0x507   :  { %6879 = vsyncpa [#allocation6], 1 }
 0x508   :  { %6880 = vsyncpa [#allocation9], 1 }
 0x509   :  { %6881 = vsyncpa [#allocation4], 1 }

</bundles_post_ra>
